<compile_context>
chip_gen: v5e
topology: v5e:2x2
jax: 0.10.0
libtpu: 0.0.40
codegen_flags: <defaults>
</compile_context>

<pallas_src>
import math

import jax
import jax.numpy as jnp
from jax.experimental import pallas as pl
from jax.experimental.pallas import tpu as pltpu


# ----------------------------------------------------------------------------- helpers
def _round_up(x, m):
    return ((x + m - 1) // m) * m


def _pick_tile(total, cap, quantum=128):
    """Largest multiple of `quantum` <= min(total, cap) that divides `total`.

    `total` is always a multiple of `quantum` where this is used, so the result
    always exactly tiles `total`.
    """
    cap = max(quantum, min(total, cap))
    best = quantum
    t = quantum
    while t <= cap:
        if total % t == 0:
            best = t
        t += quantum
    return best


def _vmem_budget():
    """Generation-aware VMEM sizing.

    Returns (physical_vmem_bytes, vmem_limit_bytes).  The limit leaves headroom for
    compiler-internal scratch: ~3/4 of a 128 MiB part (v5e/v6e -> 96 MiB) and
    capacity-16MiB on a 64 MiB part (v7x -> 48 MiB; tile budgets target ~40 MiB).
    """
    cap = 64 * 1024 * 1024  # conservative default (v7x per-TensorCore VMEM)
    try:
        info = pltpu.get_tpu_info()
        for name in ("vmem_capacity_bytes", "vmem_bytes", "vmem_size_bytes"):
            v = getattr(info, name, None)
            if v:
                cap = int(v)
                break
    except Exception:
        pass
    limit = min((cap * 3) // 4, cap - (16 << 20))
    limit = max(limit, 32 << 20)
    return cap, limit


# ------------------------------------------------------------ one-time weight preparation
def _prep_kernel(w_ref, o_ref):
    # w_ref: (TO, C, TS) native dtype -> o_ref: (TO, TS) bf16 ; eval path (mask == ones).
    o_ref[...] = jnp.sum(w_ref[...].astype(jnp.float32), axis=1).astype(o_ref.dtype)


def _prep_masked_kernel(w_ref, m_ref, o_ref):
    w = w_ref[...].astype(jnp.float32)
    m = m_ref[...].astype(jnp.float32)
    o_ref[...] = jnp.sum(w * m, axis=1).astype(o_ref.dtype)


def prepare_effective_weight(weight, mask=None):
    """Hoisted, batch-invariant precompute: ws[o, s] = sum_i (weight*mask)[o, i, s].

    Returns a zero-padded (O_pad, S_pad) bf16 slab (both padded to multiples of 128)
    ready for the forward kernel.  Call once per weight/mask update, not per forward.
    `mask is None` (eval mode, mask == ones) skips the mask operand entirely.  Operands
    keep their native dtype all the way into the kernel (no padded f32 copies in HBM);
    the upcast/multiply happens in VMEM.
    """
    O, C = weight.shape[0], weight.shape[1]
    S = math.prod(weight.shape[2:]) if weight.ndim > 2 else 1
    O_pad = _round_up(O, 128)
    S_pad = _round_up(S, 128)

    vmem_cap, vmem_limit = _vmem_budget()
    work_budget = vmem_limit - (8 << 20)
    big_vmem = vmem_cap >= (96 << 20)

    w3 = jnp.pad(weight.reshape(O, C, S),
                 ((0, O_pad - O), (0, 0), (0, S_pad - S)))        # native dtype
    n_ops = 1 if mask is None else 2
    wb = jnp.dtype(weight.dtype).itemsize
    c_sub = _round_up(C, 8)                                       # sublane padding of C

    # Joint (TO, TS) choice with a TO-shrink fallback: even at TS == 128 the
    # double-buffered (TO, C, TS) input blocks must fit the budget (large-C safety).
    to_cap = 512 if big_vmem else 256
    cands = [d for d in range(8, O_pad + 1, 8) if O_pad % d == 0]
    cands = sorted([d for d in cands if d <= to_cap] or [min(cands)], reverse=True)
    TO, ts_cap = cands[0], 128
    for TO in cands:
        per_col = 2 * TO * (n_ops * c_sub * wb + 2)   # 2 buffers: inputs + bf16 output
        ts_cap = (work_budget // per_col) // 128 * 128
        if ts_cap >= 128:
            break
    TS = _pick_tile(S_pad, min(max(ts_cap, 128), 4096 if big_vmem else 1024))
    grid = (O_pad // TO, S_pad // TS)

    out_shape = jax.ShapeDtypeStruct((O_pad, S_pad), jnp.bfloat16)
    out_spec = pl.BlockSpec((TO, TS), lambda o, s: (o, s))
    cparams = pltpu.CompilerParams(dimension_semantics=("parallel", "parallel"),
                                   vmem_limit_bytes=vmem_limit)

    if mask is None:
        return pl.pallas_call(
            _prep_kernel,
            grid=grid,
            in_specs=[pl.BlockSpec((TO, C, TS), lambda o, s: (o, 0, s))],
            out_specs=out_spec,
            out_shape=out_shape,
            compiler_params=cparams,
        )(w3)

    m3 = jnp.pad(mask.reshape(O, C, S),
                 ((0, O_pad - O), (0, 0), (0, S_pad - S)))        # native dtype
    return pl.pallas_call(
        _prep_masked_kernel,
        grid=grid,
        in_specs=[pl.BlockSpec((TO, C, TS), lambda o, s: (o, 0, s)),
                  pl.BlockSpec((TO, C, TS), lambda o, s: (o, 0, s))],
        out_specs=out_spec,
        out_shape=out_shape,
        compiler_params=cparams,
    )(w3, m3)


# ------------------------------------------------------------------------ forward kernels
def _csum_kernel(x_ref, o_ref):
    # x_ref: (TB, C, TS) native dtype -> o_ref: (TB, TS) bf16 ; xs[b,s] = sum_c x[b,c,s].
    # Upcast before the reduce (no-op for f32 inputs; v5e-safe if x arrives in bf16).
    o_ref[...] = jnp.sum(x_ref[...].astype(jnp.float32), axis=1).astype(o_ref.dtype)


def _matmul_kernel(xs_ref, ws_ref, b_ref, o_ref):
    # xs_ref: (TB, TS) bf16   ws_ref: (TO, TS) bf16
    # b_ref:  (1, TO)  f32    o_ref:  (TB, TO) f32  (resident accumulator across s)
    s = pl.program_id(2)

    @pl.when(s == 0)
    def _init():
        # Bias folded into the accumulator init — no scratch acc, no finalize copy.
        o_ref[...] = jnp.broadcast_to(b_ref[...], o_ref.shape)

    # bf16 x bf16 operands straight to the MXU, f32 accumulation in the output block.
    o_ref[...] += jax.lax.dot_general(
        xs_ref[...], ws_ref[...],
        dimension_numbers=(((1,), (1,)), ((), ())),
        preferred_element_type=jnp.float32)


def adaptive_ndlinear_forward(x, ws_pad, bias, input_dims, output_dims):
    """Per-forward path: consumes x and the hoisted (O_pad, S_pad) bf16 `ws_pad` slab."""
    B = x.shape[0]
    assert x.shape == (B,) + tuple(input_dims)
    C = input_dims[0]
    S = math.prod(input_dims[1:]) if len(input_dims) > 1 else 1
    O = math.prod(output_dims)
    O_pad, S_pad = ws_pad.shape

    vmem_cap, vmem_limit = _vmem_budget()
    work_budget = vmem_limit - (8 << 20)
    big_vmem = vmem_cap >= (96 << 20)

    # ---- pre-pass: xs[b, s] = sum_c x[b, c, s]  (x read once, in its native dtype) ----
    B_pad = _round_up(B, 16)                 # 16-sublane packing for the bf16 xs slab
    x3 = jnp.pad(x.reshape(B, C, S),
                 ((0, B_pad - B), (0, 0), (0, S_pad - S)))        # native dtype
    xb = jnp.dtype(x.dtype).itemsize
    c_sub = _round_up(C, 8)

    TBp = _pick_tile(B_pad, 256, quantum=16)
    per_col = 2 * TBp * (c_sub * xb + 2)     # 2 buffers: x block + bf16 xs block, per S col
    ts_cap = max(128, (work_budget // per_col) // 128 * 128)
    TSp = _pick_tile(S_pad, min(ts_cap, 8192 if big_vmem else 2048))

    xs = pl.pallas_call(
        _csum_kernel,
        grid=(B_pad // TBp, S_pad // TSp),
        in_specs=[pl.BlockSpec((TBp, C, TSp), lambda b, s: (b, 0, s))],
        out_specs=pl.BlockSpec((TBp, TSp), lambda b, s: (b, s)),
        out_shape=jax.ShapeDtypeStruct((B_pad, S_pad), jnp.bfloat16),
        compiler_params=pltpu.CompilerParams(
            dimension_semantics=("parallel", "parallel"),
            vmem_limit_bytes=vmem_limit),
    )(x3)

    # ---- main matmul: out = xs @ ws.T + bias -------------------------------------------
    b2 = jnp.pad(bias.astype(jnp.float32).reshape(1, O), ((0, 0), (0, O_pad - O)))

    TB = _pick_tile(B_pad, 256, quantum=16)            # batch grid axis ("parallel")
    TO = _pick_tile(O_pad, 1024 if big_vmem else 512)  # lane-dense output tile
    if (B_pad // TB) == 1 and O_pad >= 256:
        # Megacore (v7x): make sure at least one "parallel" axis has >= 2 steps.
        TO = min(TO, _pick_tile(O_pad, O_pad // 2))

    resident = TB * TO * 4 * 2 + TO * 4 * 4            # resident output block + bias
    per_col = 2 * 2 * (TB + TO)                        # bf16, double-buffered xs + ws cols
    ts_cap = max(128, ((work_budget - resident) // per_col) // 128 * 128)
    TS = _pick_tile(S_pad, min(ts_cap, 8192 if big_vmem else 4096))
    grid = (B_pad // TB, O_pad // TO, S_pad // TS)     # reduction axis (S) last

    cost = pl.CostEstimate(
        flops=2 * B_pad * S_pad * O_pad,
        transcendentals=0,
        bytes_accessed=(B_pad * S_pad * 2 + (B_pad // TB) * O_pad * S_pad * 2
                        + B_pad * O_pad * 4 + O_pad * 4))

    out = pl.pallas_call(
        _matmul_kernel,
        grid=grid,
        in_specs=[
            pl.BlockSpec((TB, TS), lambda b, o, s: (b, s)),   # xs tile (bf16)
            pl.BlockSpec((TO, TS), lambda b, o, s: (o, s)),   # ws tile (bf16)
            pl.BlockSpec((1, TO), lambda b, o, s: (0, o)),    # bias tile (f32)
        ],
        out_specs=pl.BlockSpec((TB, TO), lambda b, o, s: (b, o)),  # resident across s
        out_shape=jax.ShapeDtypeStruct((B_pad, O_pad), jnp.float32),
        compiler_params=pltpu.CompilerParams(
            dimension_semantics=("parallel", "parallel", "arbitrary"),
            vmem_limit_bytes=vmem_limit),
        cost_estimate=cost,
    )(xs, ws_pad, b2)
    # TODO(synk): on v7x, pipeline_mode=pl.Buffered(3) on the xs/ws in_specs can hide DMA
    # turnaround behind the short per-step compute; left at the default depth here.

    return out[:B, :O].reshape((B,) + tuple(output_dims))


if __name__ == "__main__":
    # Small shapes consistent with the module's forward: x (B, C, H, W).
    input_dims = (4, 16, 16)
    output_dims = (8, 4)
    B = 2
    C = input_dims[0]
    S = math.prod(input_dims[1:])              # 256
    O = math.prod(output_dims)                 # 32
    input_size = math.prod(input_dims)         # 1024

    key = jax.random.PRNGKey(0)
    kx, kw = jax.random.split(key)
    x = jax.random.normal(kx, (B,) + input_dims, dtype=jnp.float32)
    weight = jax.random.normal(kw, (O,) + input_dims, dtype=jnp.float32) / jnp.sqrt(
        jnp.float32(input_size))
    bias = jnp.zeros((O,), dtype=jnp.float32)
    mask = jnp.ones_like(weight)               # compression_mask (eval mode)
    # TODO(synk): the psutil/time-based CompressionMetrics/AdaptiveCompressor feedback loop
    # and the kthvalue/sigmoid mask update are host-side bookkeeping with no kernel
    # equivalent; only the forward math is implemented here.

    # One-time, batch-invariant weight-side reduction (hoisted out of the forward path).
    ws_masked = prepare_effective_weight(weight, mask)        # general (mask operand) path
    ws_eval = prepare_effective_weight(weight, mask=None)     # eval fast path (mask == ones)
    ws_masked, ws_eval = jax.block_until_ready((ws_masked, ws_eval))
    assert jnp.allclose(ws_masked.astype(jnp.float32), ws_eval.astype(jnp.float32),
                        rtol=1e-6, atol=1e-6)

    out = adaptive_ndlinear_forward(x, ws_eval, bias, input_dims, output_dims)
    out = jax.block_until_ready(out)
    assert out.shape == (B,) + output_dims

    # Reference 1: same math with the same bf16 quantization of the hoisted slabs.
    xs_q = jnp.sum(x.reshape(B, C, S), axis=1).astype(jnp.bfloat16).astype(jnp.float32)
    ws_q = jnp.sum(weight * mask, axis=1).reshape(O, S).astype(jnp.bfloat16).astype(jnp.float32)
    ref_q = (jnp.dot(xs_q, ws_q.T, precision=jax.lax.Precision.HIGHEST)
             + bias).reshape((B,) + output_dims)
    assert jnp.allclose(out, ref_q, rtol=5e-3, atol=5e-3), "mismatch vs bf16-consistent reference"

    # Reference 2: full-precision einsum semantics of the PyTorch forward (loose tolerance,
    # slack for the bf16 quantization of the hoisted operands).
    ref_f32 = (jnp.einsum("bhw,ohw->bo", x.sum(axis=1), jnp.sum(weight * mask, axis=1),
                          precision=jax.lax.Precision.HIGHEST)
               + bias).reshape((B,) + output_dims)
    assert jnp.allclose(out, ref_f32, rtol=5e-2, atol=2e-1), "mismatch vs f32 reference"

    print("KERNEL_OK")
</pallas_src>

<mosaic_0001>
module attributes {stable_mosaic.version = 11 : i64} {
  func.func @_prep_masked_kernel(%arg0: i32, %arg1: i32, %arg2: memref<128x4x256xf32, #tpu.memory_space<vmem>>, %arg3: memref<128x4x256xf32, #tpu.memory_space<vmem>>, %arg4: memref<128x256xbf16, #tpu.memory_space<vmem>>) attributes {dimension_semantics = [#tpu.dimension_semantics<parallel>, #tpu.dimension_semantics<parallel>], iteration_bounds = array<i64: 1, 1>, scalar_prefetch = 0 : i64, scratch_operands = 0 : i64, tpu.core_type = #tpu.core_type<tc>, window_params = [{transform_indices = @transform_0, window_bounds = array<i64: 128, 4, 256>}, {transform_indices = @transform_1, window_bounds = array<i64: 128, 4, 256>}, {transform_indices = @transform_2, window_bounds = array<i64: 128, 256>}]} {
    %c0 = arith.constant 0 : index
    %c0_0 = arith.constant 0 : index
    %c0_1 = arith.constant 0 : index
    %0 = vector.load %arg2[%c0, %c0_0, %c0_1] : memref<128x4x256xf32, #tpu.memory_space<vmem>>, vector<128x4x256xf32>
    %c0_2 = arith.constant 0 : index
    %c0_3 = arith.constant 0 : index
    %c0_4 = arith.constant 0 : index
    %1 = vector.load %arg3[%c0_2, %c0_3, %c0_4] : memref<128x4x256xf32, #tpu.memory_space<vmem>>, vector<128x4x256xf32>
    %2 = arith.mulf %0, %1 : vector<128x4x256xf32>
    %cst = arith.constant dense<0.000000e+00> : vector<128x256xf32>
    %3 = vector.multi_reduction <add>, %2, %cst [1] : vector<128x4x256xf32> to vector<128x256xf32>
    %4 = arith.truncf %3 : vector<128x256xf32> to vector<128x256xbf16>
    %c0_5 = arith.constant 0 : index
    %c0_6 = arith.constant 0 : index
    %5 = vector.load %arg4[%c0_5, %c0_6] : memref<128x256xbf16, #tpu.memory_space<vmem>>, vector<128x256xbf16>
    tpu.vector_store %arg4[%c0_5, %c0_6], %4 {strides = array<i32>} : memref<128x256xbf16, #tpu.memory_space<vmem>>, vector<128x256xbf16>,
    return
  }
  func.func @transform_0(%arg0: i32, %arg1: i32) -> (i32, i32, i32) {
    %c0_i32 = arith.constant 0 : i32
    %c0_i32_0 = arith.constant 0 : i32
    return %arg0, %c0_i32, %arg1 : i32, i32, i32
  }
  func.func @transform_1(%arg0: i32, %arg1: i32) -> (i32, i32, i32) {
    %c0_i32 = arith.constant 0 : i32
    %c0_i32_0 = arith.constant 0 : i32
    return %arg0, %c0_i32, %arg1 : i32, i32, i32
  }
  func.func @transform_2(%arg0: i32, %arg1: i32) -> (i32, i32) {
    %c0_i32 = arith.constant 0 : i32
    return %arg0, %arg1 : i32, i32
  }
}

</mosaic_0001>

<bundles_post_ra>
// kernel: tpu_custom_call.1
= control target key start
LH: loop header
LB: loop body
LE: loop exit
PB: predicated region body
PF: predicated region fallthrough
CT: control target
= control target key end

     0   :  { %7 = vsyncpa [#allocation3], 0  ;;  %s5300_s0 = inlined_call_operand.hbm [shape: f32[128,4,256], index: 0, kind: input, shape index: {}]   ;;  %s5301_s1 = inlined_call_operand.hbm [shape: f32[128,4,256], index: 1, kind: input, shape index: {}]   ;;  %s5302_s2 = inlined_call_operand.hbm [shape: bf16[128,256], index: 2, kind: output, shape index: {}]  }
   0x1   :  { %8 = vsyncpa [#allocation6], 0 }
   0x2   :  { %9 = vsyncpa [#allocation4], 0  ;;  %s14_s11 = sshll.u32 %s5300_s0, 4  ;;  %s3886_s12 = smov [#allocation2]   ;;  %s15_s11 = int_to_ptr.hbm [resolvable:$true] %s14_s11 }
   0x3   :  { %s16_s13 = sshll.u32 %s3886_s12, 4  ;;  %s27_s16 = sshll.u32 %s5301_s1, 4  ;;  %s17_s13 = int_to_ptr.vmem [resolvable:$true] %s16_s13  ;;  %s28_s16 = int_to_ptr.hbm [resolvable:$true] %s27_s16 }
   0x4   :  { %s3887_s17 = smov 128   ;;  %s3888_s18 = smov 8  }
   0x5   :  { %22 = dma.hbm_to_vmem [thread:$0]  %s15_s11, 16384, %s17_s13, [#allocation3], %s3887_s17, %s3887_s17, %s3888_s18  }
   0x6   :  { %s3889_s19 = smov [#allocation5]  }
   0x7   :  { %s29_s20 = sshll.u32 %s3889_s19, 4  ;;  %s30_s20 = int_to_ptr.vmem [resolvable:$true] %s29_s20 }
   0x8   :  { %35 = dma.hbm_to_vmem [thread:$0]  %s28_s16, 16384, %s30_s20, [#allocation6], %s3887_s17, %s3887_s17, %s3888_s18  }
   0x9   :  { %3880 = dma.done.wait [#allocation3], 16384  }
   0xa   :  { %3881 = vsyncadd [#allocation3], 4294950912 }
   0xb   :  { %3882 = dma.done.wait [#allocation6], 16384  }
   0xc   :  { %3883 = vsyncadd [#allocation6], 4294950912  ;;  %v44_v0 = vld [vmem:[#allocation2] sm:$0xff]  ;;  %v45_v2 = vld [vmem:[#allocation2 + $0x8] sm:$0xff]  ;;  %vm1199_vm0 = vcmask 1043456   ;;  %vm3504_vm1 = vcmask 1041409  }
   0xd   :  { %v172_v1 = vld [vmem:[#allocation5] sm:$0xff]  ;;  %v173_v4 = vld [vmem:[#allocation5 + $0x8] sm:$0xff]  ;;  %v46_v5 = vld [vmem:[#allocation2 + $0x10] sm:$0xff]  ;;  %vm3506_vm2 = vcmask 1042434   ;;  %vm3508_vm3 = vcmask 1043459   ;;  %vm3510_vm4 = vcmask 1044484  }
   0xe   :  { %v300_v3 = vmul.f32 %v172_v1, %v44_v0  ;;  %v174_v6 = vld [vmem:[#allocation5 + $0x10] sm:$0xff]  ;;  %v301_v7 = vmul.f32 %v173_v4, %v45_v2  ;;  %v47_v9 = vld [vmem:[#allocation2 + $0x18] sm:$0xff]  ;;  %v48_v12 = vld [vmem:[#allocation2 + $0x20] sm:$0xff]  ;;  %vm3512_vm5 = vcmask 1045509   ;;  %vm3514_vm6 = vcmask 1046534   ;;  %s3890_s0 = smov [#allocation7]  }
   0xf   :  { %v302_v8 = vmul.f32 %v174_v6, %v46_v5  ;;  %v175_v10 = vld [vmem:[#allocation5 + $0x18] sm:$0xff]  ;;  %v176_v13 = vld [vmem:[#allocation5 + $0x20] sm:$0xff]  ;;  %v49_v14 = vld [vmem:[#allocation2 + $0x28] sm:$0xff]  ;;  %vm3516_vm7 = vcmask 1047559   ;;  %s3787_s1 = sshll.u32 %s3890_s0, 4  ;;  %s3789_s23 = sshll.u32 %s5302_s2, 4  ;;  %s3788_s1 = int_to_ptr.vmem [resolvable:$true] %s3787_s1  ;;  %s3790_s23 = int_to_ptr.hbm [resolvable:$true] %s3789_s23 }
  0x10   :  { %556 = vst [vmem:[#allocation1] ss:$2 sm:$0xff] %v300_v3  ;;  %v303_v11 = vmul.f32 %v175_v10, %v47_v9  ;;  %v177_v15 = vld [vmem:[#allocation5 + $0x28] sm:$0xff]  ;;  %v50_v16 = vld [vmem:[#allocation2 + $0x30] sm:$0xff]  ;;  %v304_v19 = vmul.f32 %v176_v13, %v48_v12  ;;  %v51_v20 = vld [vmem:[#allocation2 + $0x38] sm:$0xff] }
  0x11   :  { %560 = vst [vmem:[#allocation1 + $0x10] ss:$2 sm:$0xff] %v301_v7  ;;  %v178_v17 = vld [vmem:[#allocation5 + $0x30] sm:$0xff]  ;;  %v179_v21 = vld [vmem:[#allocation5 + $0x38] sm:$0xff]  ;;  %v305_v24 = vmul.f32 %v177_v15, %v49_v14  ;;  %v52_v38 = vld [vmem:[#allocation2 + $0x40] sm:$0xff] }
  0x12   :  { %564 = vst [vmem:[#allocation1 + $0x20] ss:$2 sm:$0xff] %v302_v8  ;;  %v306_v27 = vmul.f32 %v178_v17, %v50_v16  ;;  %v307_v30 = vmul.f32 %v179_v21, %v51_v20  ;;  %v180_v39 = vld [vmem:[#allocation5 + $0x40] sm:$0xff]  ;;  %v53_v43 = vld [vmem:[#allocation2 + $0x48] sm:$0xff]  ;;  %v54_v45 = vld [vmem:[#allocation2 + $0x50] sm:$0xff] }
  0x13   :  { %568 = vst [vmem:[#allocation1 + $0x30] ss:$2 sm:$0xff] %v303_v11  ;;  %v181_v44 = vld [vmem:[#allocation5 + $0x48] sm:$0xff]  ;;  %v182_v49 = vld [vmem:[#allocation5 + $0x50] sm:$0xff]  ;;  %v55_v50 = vld [vmem:[#allocation2 + $0x58] sm:$0xff]  ;;  %v308_v57 = vmul.f32 %v180_v39, %v52_v38 }
  0x14   :  { %v183_v51 = vld [vmem:[#allocation5 + $0x58] sm:$0xff]  ;;  %v309_v63 = vmul.f32 %v181_v44, %v53_v43  ;;  %v310_v3 = vmul.f32 %v182_v49, %v54_v45  ;;  %v56_v15 = vld [vmem:[#allocation2 + $0x60] sm:$0xff]  ;;  %v57_v21 = vld [vmem:[#allocation2 + $0x68] sm:$0xff] }
  0x15   :  { %v311_v7 = vmul.f32 %v183_v51, %v55_v50  ;;  %v184_v16 = vld [vmem:[#allocation5 + $0x60] sm:$0xff]  ;;  %v62_v38 = vld [vmem:[#allocation2 + $0x90] sm:$0xff]  ;;  %v63_v44 = vld [vmem:[#allocation2 + $0x98] sm:$0xff] }
  0x16   :  { %v190_v43 = vld [vmem:[#allocation5 + $0x90] sm:$0xff]  ;;  %v191_v45 = vld [vmem:[#allocation5 + $0x98] sm:$0xff] }
  0x17   :  { %v557_v18 = vld.sshfl [vmem:[#allocation1] sm:$0xff pattern:$0x75316420]  ;;  %v558_v22 = vld.sshfl [vmem:[#allocation1 + $0x8] sm:$0xff pattern:$0x75316420] }
  0x18   :  { %v561_v23 = vld.sshfl [vmem:[#allocation1 + $0x10] sm:$0xff pattern:$0x75316420]  ;;  %v562_v25 = vld.sshfl [vmem:[#allocation1 + $0x18] sm:$0xff pattern:$0x75316420] }
  0x19   :  { %v565_v26 = vld.sshfl [vmem:[#allocation1 + $0x20] sm:$0xff pattern:$0x75316420]  ;;  %v566_v28 = vld.sshfl [vmem:[#allocation1 + $0x28] sm:$0xff pattern:$0x75316420] }
  0x1a   :  { %v569_v29 = vld.sshfl [vmem:[#allocation1 + $0x30] sm:$0xff pattern:$0x75316420]  ;;  %v570_v31 = vld.sshfl [vmem:[#allocation1 + $0x38] sm:$0xff pattern:$0x75316420] }
  0x1b   :  { %571 = vst [vmem:[#allocation1] ss:$2 sm:$0xff] %v304_v19  ;;  %v1200_v32 = vsel %vm1199_vm0, %v557_v18, 0.0  ;;  %v1207_v34 = vsel %vm1199_vm0, %v558_v22, 0.0  ;;  %v1214_v37 = vsel %vm1199_vm0, %v561_v23, 0.0  ;;  %v1221_v41 = vsel %vm1199_vm0, %v562_v25, 0.0 }
  0x1c   :  { %574 = vst [vmem:[#allocation1 + $0x10] ss:$2 sm:$0xff] %v305_v24  ;;  %v1201_v33 = vrot.slane %v1200_v32, 4  ;;  %v1208_v36 = vrot.slane %v1207_v34, 4  ;;  %v1215_v40 = vrot.slane %v1214_v37, 4  ;;  %v1228_v42 = vsel %vm1199_vm0, %v565_v26, 0.0 }
  0x1d   :  { %577 = vst [vmem:[#allocation1 + $0x20] ss:$2 sm:$0xff] %v306_v27  ;;  %v1222_v47 = vrot.slane %v1221_v41, 4  ;;  %v1229_v48 = vrot.slane %v1228_v42, 4  ;;  %v1235_v52 = vsel %vm1199_vm0, %v566_v28, 0.0  ;;  %v1242_v53 = vsel %vm1199_vm0, %v569_v29, 0.0 }
  0x1e   :  { %580 = vst [vmem:[#allocation1 + $0x30] ss:$2 sm:$0xff] %v307_v30  ;;  %v1202_v35 = vadd.f32 %v1201_v33, %v1200_v32  ;;  %v1249_v54 = vsel %vm1199_vm0, %v570_v31, 0.0  ;;  %v1209_v58 = vadd.f32 %v1208_v36, %v1207_v34  ;;  %v1216_v59 = vadd.f32 %v1215_v40, %v1214_v37  ;;  %v185_v22 = vld [vmem:[#allocation5 + $0x68] sm:$0xff]  ;;  %v58_v23 = vld [vmem:[#allocation2 + $0x70] sm:$0xff]  ;;  %v59_v29 = vld [vmem:[#allocation2 + $0x78] sm:$0xff] }
  0x1f   :  { %v1223_v60 = vadd.f32 %v1222_v47, %v1221_v41  ;;  %v1230_v0 = vadd.f32 %v1229_v48, %v1228_v42  ;;  %v1236_v12 = vrot.slane %v1235_v52, 4  ;;  %v1243_v13 = vrot.slane %v1242_v53, 4  ;;  %v186_v24 = vld [vmem:[#allocation5 + $0x70] sm:$0xff]  ;;  %v187_v30 = vld [vmem:[#allocation5 + $0x78] sm:$0xff]  ;;  %v60_v31 = vld [vmem:[#allocation2 + $0x80] sm:$0xff] }
  0x20   :  { %v1203_v46 = vrot.slane %v1202_v35, 2  ;;  %v1210_v8 = vrot.slane %v1209_v58, 2  ;;  %v1217_v9 = vrot.slane %v1216_v59, 2  ;;  %v1250_v14 = vrot.slane %v1249_v54, 4  ;;  %v188_v32 = vld [vmem:[#allocation5 + $0x80] sm:$0xff]  ;;  %v61_v36 = vld [vmem:[#allocation2 + $0x88] sm:$0xff] }
  0x21   :  { %v1224_v10 = vrot.slane %v1223_v60, 2  ;;  %v1231_v11 = vrot.slane %v1230_v0, 2  ;;  %v1237_v26 = vadd.f32 %v1236_v12, %v1235_v52  ;;  %v1244_v27 = vadd.f32 %v1243_v13, %v1242_v53  ;;  %v189_v37 = vld [vmem:[#allocation5 + $0x88] sm:$0xff] }
  0x22   :  { %v572_v55 = vld.sshfl [vmem:[#allocation1] sm:$0xff pattern:$0x75316420]  ;;  %v3926_v56 = vld.sshfl [vmem:[#allocation1 + $0x8] sm:$0xff pattern:$0x75316420]  ;;  %v1204_v4 = vadd.f32 %v1203_v46, %v1202_v35  ;;  %v1211_v18 = vadd.f32 %v1210_v8, %v1209_v58  ;;  %v1218_v19 = vadd.f32 %v1217_v9, %v1216_v59  ;;  %v1251_v28 = vadd.f32 %v1250_v14, %v1249_v54 }
  0x23   :  { %v3928_v61 = vld.sshfl [vmem:[#allocation1 + $0x10] sm:$0xff pattern:$0x75316420]  ;;  %v3930_v62 = vld.sshfl [vmem:[#allocation1 + $0x18] sm:$0xff pattern:$0x75316420]  ;;  %v1225_v20 = vadd.f32 %v1224_v10, %v1223_v60  ;;  %v1232_v25 = vadd.f32 %v1231_v11, %v1230_v0  ;;  %v312_v52 = vmul.f32 %v184_v16, %v56_v15  ;;  %v313_v59 = vmul.f32 %v185_v22, %v57_v21 }
  0x24   :  { %v3932_v1 = vld.sshfl [vmem:[#allocation1 + $0x20] sm:$0xff pattern:$0x75316420]  ;;  %v3934_v2 = vld.sshfl [vmem:[#allocation1 + $0x28] sm:$0xff pattern:$0x75316420]  ;;  %v314_v60 = vmul.f32 %v186_v24, %v58_v23  ;;  %v3959_v12 = vmul.f32 %v189_v37, %v61_v36  ;;  %v3961_v13 = vmul.f32 %v190_v43, %v62_v38  ;;  %v3963_v14 = vmul.f32 %v191_v45, %v63_v44 }
  0x25   :  { %v3936_v5 = vld.sshfl [vmem:[#allocation1 + $0x30] sm:$0xff pattern:$0x75316420]  ;;  %v3938_v6 = vld.sshfl [vmem:[#allocation1 + $0x38] sm:$0xff pattern:$0x75316420] }
  0x26   :  { %583 = vst [vmem:[#allocation1] ss:$2 sm:$0xff] %v308_v57  ;;  %v1205_v17 = vrot.slane %v1204_v4, 1  ;;  %v1212_v33 = vrot.slane %v1211_v18, 1  ;;  %v1219_v34 = vrot.slane %v1218_v19, 1  ;;  %v1256_v35 = vsel %vm1199_vm0, %v572_v55, 0.0 }
  0x27   :  { %586 = vst [vmem:[#allocation1 + $0x10] ss:$2 sm:$0xff] %v309_v63  ;;  %v1226_v39 = vrot.slane %v1225_v20, 1  ;;  %v1238_v40 = vrot.slane %v1237_v26, 2  ;;  %v1245_v41 = vrot.slane %v1244_v27, 2  ;;  %v1252_v42 = vrot.slane %v1251_v28, 2 }
  0x28   :  { %589 = vst [vmem:[#allocation1 + $0x20] ss:$2 sm:$0xff] %v310_v3  ;;  %v1206_v46 = vadd.f32 %v1205_v17, %v1204_v4  ;;  %v1213_v47 = vadd.f32 %v1212_v33, %v1211_v18  ;;  %v1233_v48 = vrot.slane %v1232_v25, 1  ;;  %v1257_v49 = vrot.slane %v1256_v35, 4  ;;  %v64_v36 = vld [vmem:[#allocation2 + $0xa0] sm:$0xff]  ;;  %v65_v38 = vld [vmem:[#allocation2 + $0xa8] sm:$0xff] }
  0x29   :  { %592 = vst [vmem:[#allocation1 + $0x30] ss:$2 sm:$0xff] %v311_v7  ;;  %v1239_v53 = vadd.f32 %v1238_v40, %v1237_v26  ;;  %v1246_v54 = vadd.f32 %v1245_v41, %v1244_v27  ;;  %v1253_v55 = vadd.f32 %v1252_v42, %v1251_v28  ;;  %v315_v4 = vmul.f32 %v187_v30, %v59_v29  ;;  %v192_v37 = vld [vmem:[#allocation5 + $0xa0] sm:$0xff]  ;;  %v193_v42 = vld [vmem:[#allocation5 + $0xa8] sm:$0xff]  ;;  %v66_v43 = vld [vmem:[#allocation2 + $0xb0] sm:$0xff] }
  0x2a   :  { %v1258_v63 = vadd.f32 %v1257_v49, %v1256_v35  ;;  %v3953_v7 = vmul.f32 %v188_v32, %v60_v31  ;;  %v1220_v8 = vadd.f32 %v1219_v34, %v1218_v19  ;;  %v1227_v9 = vadd.f32 %v1226_v39, %v1225_v20 }
  0x2b   :  { %v3965_v15 = vpack.c.bf16 %v1213_v47, %v1206_v46  ;;  %v1240_v16 = vrot.slane %v1239_v53, 1  ;;  %v1247_v17 = vrot.slane %v1246_v54, 1  ;;  %v1254_v18 = vrot.slane %v1253_v55, 1 }
  0x2c   :  { %v1259_v21 = vrot.slane %v1258_v63, 2  ;;  %v1263_v19 = vsel %vm1199_vm0, %v3926_v56, 0.0  ;;  %v1270_v20 = vsel %vm1199_vm0, %v3928_v61, 0.0  ;;  %v1277_v22 = vsel %vm1199_vm0, %v3930_v62, 0.0 }
  0x2d   :  { %v3941_v50 = vld.sshfl [vmem:[#allocation1] sm:$0xff pattern:$0x75316420]  ;;  %v3943_v51 = vld.sshfl [vmem:[#allocation1 + $0x8] sm:$0xff pattern:$0x75316420]  ;;  %v1234_v24 = vadd.f32 %v1233_v48, %v1232_v25  ;;  %v1241_v26 = vadd.f32 %v1240_v16, %v1239_v53  ;;  %v3975_v28 = vpack.c.bf16 %v1227_v9, %v1220_v8  ;;  %v3248_v25 = vunpack.c.l.b16 %v3965_v15 }
  0x2e   :  { %v3945_v57 = vld.sshfl [vmem:[#allocation1 + $0x10] sm:$0xff pattern:$0x75316420]  ;;  %v3947_v58 = vld.sshfl [vmem:[#allocation1 + $0x18] sm:$0xff pattern:$0x75316420]  ;;  %v1260_v27 = vadd.f32 %v1259_v21, %v1258_v63  ;;  %v1248_v32 = vadd.f32 %v1247_v17, %v1246_v54  ;;  %v1255_v33 = vadd.f32 %v1254_v18, %v1253_v55  ;;  %v3249_v35 = vunpack.c.h.b16 %v3965_v15 }
  0x2f   :  { %v3949_v0 = vld.sshfl [vmem:[#allocation1 + $0x20] sm:$0xff pattern:$0x75316420]  ;;  %v3951_v3 = vld.sshfl [vmem:[#allocation1 + $0x28] sm:$0xff pattern:$0x75316420]  ;;  %v3989_v48 = vpack.c.bf16 %v1241_v26, %v1234_v24  ;;  %v3251_v9 = vunpack.c.h.b16 %v3975_v28  ;;  %v4003_v16 = vmul.f32 %v192_v37, %v64_v36 }
  0x30   :  { %v3955_v10 = vld.sshfl [vmem:[#allocation1 + $0x30] sm:$0xff pattern:$0x75316420]  ;;  %v3957_v11 = vld.sshfl [vmem:[#allocation1 + $0x38] sm:$0xff pattern:$0x75316420]  ;;  %v4000_v8 = vpack.c.bf16 %v1255_v33, %v1248_v32 }
  0x31   :  { %595 = vst [vmem:[#allocation1] ss:$2 sm:$0xff] %v312_v52  ;;  %v1284_v23 = vsel %vm1199_vm0, %v3932_v1, 0.0  ;;  %v1264_v29 = vrot.slane %v1263_v19, 4  ;;  %v1271_v30 = vrot.slane %v1270_v20, 4  ;;  %v1278_v31 = vrot.slane %v1277_v22, 4 }
  0x32   :  { %598 = vst [vmem:[#allocation1 + $0x10] ss:$2 sm:$0xff] %v313_v59  ;;  %v1285_v56 = vrot.slane %v1284_v23, 4  ;;  %v1291_v61 = vsel %vm1199_vm0, %v3934_v2, 0.0  ;;  %v1298_v62 = vsel %vm1199_vm0, %v3936_v5, 0.0  ;;  %v1305_v1 = vsel %vm1199_vm0, %v3938_v6, 0.0 }
  0x33   :  { %601 = vst [vmem:[#allocation1 + $0x20] ss:$2 sm:$0xff] %v314_v60  ;;  %v1261_v34 = vrot.slane %v1260_v27, 1  ;;  %v1265_v39 = vadd.f32 %v1264_v29, %v1263_v19  ;;  %v1292_v40 = vrot.slane %v1291_v61, 4  ;;  %v1299_v41 = vrot.slane %v1298_v62, 4  ;;  %v194_v5 = vld [vmem:[#allocation5 + $0xb0] sm:$0xff] }
  0x34   :  { %604 = vst [vmem:[#allocation1 + $0x30] ss:$2 sm:$0xff] %v315_v4  ;;  %v1306_v2 = vrot.slane %v1305_v1, 4  ;;  %v1272_v45 = vadd.f32 %v1271_v30, %v1270_v20  ;;  %v1279_v46 = vadd.f32 %v1278_v31, %v1277_v22  ;;  %v1286_v47 = vadd.f32 %v1285_v56, %v1284_v23 }
  0x35   :  { %v1293_v53 = vadd.f32 %v1292_v40, %v1291_v61  ;;  %v1300_v54 = vadd.f32 %v1299_v41, %v1298_v62  ;;  %v3250_v59 = vunpack.c.l.b16 %v3975_v28  ;;  %v1262_v4 = vadd.f32 %v1261_v34, %v1260_v27 }
  0x36   :  { %v1307_v55 = vadd.f32 %v1306_v2, %v1305_v1  ;;  %v3252_v21 = vunpack.c.l.b16 %v3989_v48  ;;  %v3253_v19 = vunpack.c.h.b16 %v3989_v48  ;;  %v4011_v20 = vmul.f32 %v193_v42, %v65_v38 }
  0x37   :  { %v4013_v22 = vmul.f32 %v194_v5, %v66_v43  ;;  %v1266_v23 = vrot.slane %v1265_v39, 2  ;;  %v1273_v24 = vrot.slane %v1272_v45, 2  ;;  %v1280_v26 = vrot.slane %v1279_v46, 2  ;;  %v67_v43 = vld [vmem:[#allocation2 + $0xb8] sm:$0xff] }
  0x38   :  { %v3985_v44 = vld.sshfl [vmem:[#allocation1] sm:$0xff pattern:$0x75316420]  ;;  %v3987_v6 = vld.sshfl [vmem:[#allocation1 + $0x8] sm:$0xff pattern:$0x75316420]  ;;  %v3505_v33 = vsel %vm3504_vm1, %v3250_v59, %v3248_v25  ;;  %v3254_v25 = vunpack.c.l.b16 %v4000_v8  ;;  %v3255_v59 = vunpack.c.h.b16 %v4000_v8 }
  0x39   :  { %v3991_v49 = vld.sshfl [vmem:[#allocation1 + $0x10] sm:$0xff pattern:$0x75316420]  ;;  %v3993_v52 = vld.sshfl [vmem:[#allocation1 + $0x18] sm:$0xff pattern:$0x75316420]  ;;  %v1267_v31 = vadd.f32 %v1266_v23, %v1265_v39  ;;  %v1274_v56 = vadd.f32 %v1273_v24, %v1272_v45  ;;  %v1281_v61 = vadd.f32 %v1280_v26, %v1279_v46  ;;  %v3518_v23 = vsel %vm3504_vm1, %v3251_v9, %v3249_v35 }
  0x3a   :  { %v3996_v60 = vld.sshfl [vmem:[#allocation1 + $0x20] sm:$0xff pattern:$0x75316420]  ;;  %v3998_v63 = vld.sshfl [vmem:[#allocation1 + $0x28] sm:$0xff pattern:$0x75316420]  ;;  %v3519_v15 = vsel %vm3506_vm2, %v3253_v19, %v3518_v23 }
  0x3b   :  { %v4005_v17 = vld.sshfl [vmem:[#allocation1 + $0x30] sm:$0xff pattern:$0x75316420]  ;;  %v4007_v18 = vld.sshfl [vmem:[#allocation1 + $0x38] sm:$0xff pattern:$0x75316420]  ;;  %v3520_v19 = vsel %vm3508_vm3, %v3255_v59, %v3519_v15 }
  0x3c   :  { %607 = vst [vmem:[#allocation1] ss:$2 sm:$0xff] %v3953_v7  ;;  %v1287_v27 = vrot.slane %v1286_v47, 2  ;;  %v1294_v28 = vrot.slane %v1293_v53, 2  ;;  %v1301_v29 = vrot.slane %v1300_v54, 2  ;;  %v1308_v30 = vrot.slane %v1307_v55, 2 }
  0x3d   :  { %610 = vst [vmem:[#allocation1 + $0x10] ss:$2 sm:$0xff] %v3959_v12  ;;  %v1268_v34 = vrot.slane %v1267_v31, 1  ;;  %v1275_v36 = vrot.slane %v1274_v56, 1  ;;  %v1282_v12 = vrot.slane %v1281_v61, 1  ;;  %v195_v5 = vld [vmem:[#allocation5 + $0xb8] sm:$0xff] }
  0x3e   :  { %613 = vst [vmem:[#allocation1 + $0x20] ss:$2 sm:$0xff] %v3961_v13  ;;  %v1288_v62 = vadd.f32 %v1287_v27, %v1286_v47  ;;  %v1295_v1 = vadd.f32 %v1294_v28, %v1293_v53  ;;  %v1302_v7 = vadd.f32 %v1301_v29, %v1300_v54  ;;  %v1309_v32 = vadd.f32 %v1308_v30, %v1307_v55 }
  0x3f   :  { %616 = vst [vmem:[#allocation1 + $0x30] ss:$2 sm:$0xff] %v3963_v14  ;;  %v1269_v13 = vadd.f32 %v1268_v34, %v1267_v31  ;;  %v1276_v39 = vadd.f32 %v1275_v36, %v1274_v56  ;;  %v1283_v2 = vadd.f32 %v1282_v12, %v1281_v61  ;;  %v3507_v29 = vsel %vm3506_vm2, %v3252_v21, %v3505_v33 }
  0x40   :  { %v1289_v37 = vrot.slane %v1288_v62, 1  ;;  %v1296_v38 = vrot.slane %v1295_v1, 1  ;;  %v1303_v40 = vrot.slane %v1302_v7, 1  ;;  %v1310_v41 = vrot.slane %v1309_v32, 1 }
  0x41   :  { %v2996_v54 = vpack.c.bf16 %v1269_v13, %v1262_v4  ;;  %v2997_v55 = vpack.c.bf16 %v1283_v2, %v1276_v39  ;;  %v323_v30 = vmul.f32 %v195_v5, %v67_v43  ;;  %v3509_v21 = vsel %vm3508_vm3, %v3254_v25, %v3507_v29  ;;  %v69_v39 = vld [vmem:[#allocation2 + $0xc8] sm:$0xff] }
  0x42   :  { %v1290_v42 = vadd.f32 %v1289_v37, %v1288_v62  ;;  %v1297_v45 = vadd.f32 %v1296_v38, %v1295_v1  ;;  %v1304_v46 = vadd.f32 %v1303_v40, %v1302_v7  ;;  %v1311_v47 = vadd.f32 %v1310_v41, %v1309_v32  ;;  %v68_v37 = vld [vmem:[#allocation2 + $0xc0] sm:$0xff]  ;;  %v197_v2 = vld [vmem:[#allocation5 + $0xc8] sm:$0xff] }
  0x43   :  { %v4020_v14 = vld.sshfl [vmem:[#allocation1] sm:$0xff pattern:$0x75316420]  ;;  %v4023_v48 = vld.sshfl [vmem:[#allocation1 + $0x8] sm:$0xff pattern:$0x75316420]  ;;  %v3256_v4 = vunpack.c.l.b16 %v2996_v54  ;;  %v3257_v61 = vunpack.c.h.b16 %v2996_v54  ;;  %v3258_v8 = vunpack.c.l.b16 %v2997_v55  ;;  %v3259_v35 = vunpack.c.h.b16 %v2997_v55 }
  0x44   :  { %v4025_v53 = vld.sshfl [vmem:[#allocation1 + $0x10] sm:$0xff pattern:$0x75316420]  ;;  %v4031_v24 = vld.sshfl [vmem:[#allocation1 + $0x18] sm:$0xff pattern:$0x75316420]  ;;  %v2998_v27 = vpack.c.bf16 %v1297_v45, %v1290_v42  ;;  %v2999_v28 = vpack.c.bf16 %v1311_v47, %v1304_v46 }
  0x45   :  { %v4033_v26 = vld.sshfl [vmem:[#allocation1 + $0x20] sm:$0xff pattern:$0x75316420]  ;;  %v4036_v31 = vld.sshfl [vmem:[#allocation1 + $0x28] sm:$0xff pattern:$0x75316420]  ;;  %v3511_v33 = vsel %vm3510_vm4, %v3256_v4, %v3509_v21  ;;  %v3521_v34 = vsel %vm3510_vm4, %v3257_v61, %v3520_v19 }
  0x46   :  { %v4038_v56 = vld.sshfl [vmem:[#allocation1 + $0x30] sm:$0xff pattern:$0x75316420]  ;;  %v4041_v62 = vld.sshfl [vmem:[#allocation1 + $0x38] sm:$0xff pattern:$0x75316420]  ;;  %v3260_v9 = vunpack.c.l.b16 %v2998_v27  ;;  %v3261_v1 = vunpack.c.h.b16 %v2998_v27  ;;  %v3262_v7 = vunpack.c.l.b16 %v2999_v28  ;;  %v3263_v32 = vunpack.c.h.b16 %v2999_v28 }
  0x47   :  { %619 = vst [vmem:[#allocation1] ss:$2 sm:$0xff] %v4003_v16  ;;  %v1312_v16 = vsel %vm1199_vm0, %v3941_v50, 0.0  ;;  %v1319_v36 = vsel %vm1199_vm0, %v3943_v51, 0.0  ;;  %v3522_v12 = vsel %vm3512_vm5, %v3259_v35, %v3521_v34  ;;  %v196_v38 = vld [vmem:[#allocation5 + $0xc0] sm:$0xff]  ;;  %v70_v42 = vld [vmem:[#allocation2 + $0xd0] sm:$0xff] }
  0x48   :  { %622 = vst [vmem:[#allocation1 + $0x10] ss:$2 sm:$0xff] %v4011_v20  ;;  %v3513_v20 = vsel %vm3512_vm5, %v3258_v8, %v3511_v33  ;;  %v1313_v40 = vrot.slane %v1312_v16, 4  ;;  %v1320_v41 = vrot.slane %v1319_v36, 4  ;;  %v3523_v13 = vsel %vm3514_vm6, %v3261_v1, %v3522_v12  ;;  %v198_v45 = vld [vmem:[#allocation5 + $0xd0] sm:$0xff]  ;;  %v71_v46 = vld [vmem:[#allocation2 + $0xd8] sm:$0xff] }
  0x49   :  { %625 = vst [vmem:[#allocation1 + $0x20] ss:$2 sm:$0xff] %v4013_v22  ;;  %v3515_v22 = vsel %vm3514_vm6, %v3260_v9, %v3513_v20  ;;  %v1326_v50 = vsel %vm1199_vm0, %v3945_v57, 0.0  ;;  %v1333_v51 = vsel %vm1199_vm0, %v3947_v58, 0.0  ;;  %v3524_v5 = vsel %vm3516_vm7, %v3263_v32, %v3523_v13  ;;  %v199_v47 = vld [vmem:[#allocation5 + $0xd8] sm:$0xff] }
  0x4a   :  { %628 = vst [vmem:[#allocation1 + $0x30] ss:$2 sm:$0xff] %v323_v30  ;;  %v3517_v43 = vsel %vm3516_vm7, %v3262_v7, %v3515_v22  ;;  %v1314_v25 = vadd.f32 %v1313_v40, %v1312_v16  ;;  %v1321_v54 = vadd.f32 %v1320_v41, %v1319_v36  ;;  %v324_v27 = vmul.f32 %v196_v38, %v68_v37 }
  0x4b   :  { %v3735_v55 = vpack.c.b16 %v3524_v5, %v3517_v43  ;;  %v325_v58 = vmul.f32 %v197_v2, %v69_v39  ;;  %v326_v30 = vmul.f32 %v198_v45, %v70_v42  ;;  %v327_v35 = vmul.f32 %v199_v47, %v71_v46 }
  0x4c   :  { %v1315_v4 = vrot.slane %v1314_v25, 2  ;;  %v1322_v61 = vrot.slane %v1321_v54, 2  ;;  %v1327_v32 = vrot.slane %v1326_v50, 4  ;;  %v1334_v21 = vrot.slane %v1333_v51, 4 }
  0x4d   :  { %3767 = vst [vmem:[#allocation7] sm:$0xff] %v3735_v55  ;;  %v1340_v19 = vsel %vm1199_vm0, %v3949_v0, 0.0  ;;  %v1347_v33 = vsel %vm1199_vm0, %v3951_v3, 0.0  ;;  %v1354_v34 = vsel %vm1199_vm0, %v3955_v10, 0.0  ;;  %v1361_v41 = vsel %vm1199_vm0, %v3957_v11, 0.0 }
  0x4e   :  { %v4064_v59 = vld.sshfl [vmem:[#allocation1] sm:$0xff pattern:$0x75316420]  ;;  %v4066_v23 = vld.sshfl [vmem:[#allocation1 + $0x8] sm:$0xff pattern:$0x75316420]  ;;  %v1316_v1 = vadd.f32 %v1315_v4, %v1314_v25  ;;  %v1323_v7 = vadd.f32 %v1322_v61, %v1321_v54  ;;  %v1328_v20 = vadd.f32 %v1327_v32, %v1326_v50  ;;  %v1335_v37 = vadd.f32 %v1334_v21, %v1333_v51 }
  0x4f   :  { %v4068_v28 = vld.sshfl [vmem:[#allocation1 + $0x10] sm:$0xff pattern:$0x75316420]  ;;  %v4070_v57 = vld.sshfl [vmem:[#allocation1 + $0x18] sm:$0xff pattern:$0x75316420] }
  0x50   :  { %v4072_v29 = vld.sshfl [vmem:[#allocation1 + $0x20] sm:$0xff pattern:$0x75316420]  ;;  %v4074_v8 = vld.sshfl [vmem:[#allocation1 + $0x28] sm:$0xff pattern:$0x75316420] }
  0x51   :  { %v4076_v15 = vld.sshfl [vmem:[#allocation1 + $0x30] sm:$0xff pattern:$0x75316420]  ;;  %v4078_v9 = vld.sshfl [vmem:[#allocation1 + $0x38] sm:$0xff pattern:$0x75316420] }
  0x52   :  { %631 = vst [vmem:[#allocation1] ss:$2 sm:$0xff] %v324_v27  ;;  %v1317_v16 = vrot.slane %v1316_v1, 1  ;;  %v1324_v36 = vrot.slane %v1323_v7, 1  ;;  %v1341_v12 = vrot.slane %v1340_v19, 4  ;;  %v1348_v38 = vrot.slane %v1347_v33, 4 }
  0x53   :  { %634 = vst [vmem:[#allocation1 + $0x10] ss:$2 sm:$0xff] %v325_v58  ;;  %v1355_v40 = vrot.slane %v1354_v34, 4  ;;  %v1329_v13 = vrot.slane %v1328_v20, 2  ;;  %v1336_v3 = vrot.slane %v1335_v37, 2  ;;  %v1362_v2 = vrot.slane %v1361_v41, 4 }
  0x54   :  { %637 = vst [vmem:[#allocation1 + $0x20] ss:$2 sm:$0xff] %v326_v30  ;;  %v1318_v22 = vadd.f32 %v1317_v16, %v1316_v1  ;;  %v1325_v0 = vadd.f32 %v1324_v36, %v1323_v7  ;;  %v1342_v39 = vadd.f32 %v1341_v12, %v1340_v19  ;;  %v1349_v5 = vadd.f32 %v1348_v38, %v1347_v33 }
  0x55   :  { %640 = vst [vmem:[#allocation1 + $0x30] ss:$2 sm:$0xff] %v327_v35  ;;  %v1330_v10 = vadd.f32 %v1329_v13, %v1328_v20  ;;  %v1337_v43 = vadd.f32 %v1336_v3, %v1335_v37  ;;  %v1356_v46 = vadd.f32 %v1355_v40, %v1354_v34  ;;  %v1363_v51 = vadd.f32 %v1362_v2, %v1361_v41 }
  0x56   :  { %v1343_v42 = vrot.slane %v1342_v39, 2  ;;  %v4088_v45 = vpack.c.bf16 %v1325_v0, %v1318_v22  ;;  %v1368_v47 = vsel %vm1199_vm0, %v3985_v44, 0.0  ;;  %v1375_v11 = vsel %vm1199_vm0, %v3987_v6, 0.0 }
  0x57   :  { %v1331_v54 = vrot.slane %v1330_v10, 1  ;;  %v1338_v55 = vrot.slane %v1337_v43, 1  ;;  %v1350_v58 = vrot.slane %v1349_v5, 2  ;;  %v1357_v30 = vrot.slane %v1356_v46, 2 }
  0x58   :  { %v1344_v50 = vadd.f32 %v1343_v42, %v1342_v39  ;;  %v3264_v25 = vunpack.c.l.b16 %v4088_v45  ;;  %v1364_v4 = vrot.slane %v1363_v51, 2  ;;  %v1369_v61 = vrot.slane %v1368_v47, 4 }
  0x59   :  { %v1376_v35 = vrot.slane %v1375_v11, 4  ;;  %v1332_v1 = vadd.f32 %v1331_v54, %v1330_v10  ;;  %v1339_v7 = vadd.f32 %v1338_v55, %v1337_v43  ;;  %v1351_v21 = vadd.f32 %v1350_v58, %v1349_v5 }
  0x5a   :  { %v1345_v27 = vrot.slane %v1344_v50, 1  ;;  %v1358_v19 = vadd.f32 %v1357_v30, %v1356_v46  ;;  %v1365_v33 = vadd.f32 %v1364_v4, %v1363_v51  ;;  %v1370_v44 = vadd.f32 %v1369_v61, %v1368_v47 }
  0x5b   :  { %v1377_v34 = vadd.f32 %v1376_v35, %v1375_v11  ;;  %v1352_v16 = vrot.slane %v1351_v21, 1  ;;  %v1382_v6 = vsel %vm1199_vm0, %v3991_v49, 0.0  ;;  %v1389_v36 = vsel %vm1199_vm0, %v3993_v52, 0.0 }
  0x5c   :  { %v1346_v32 = vadd.f32 %v1345_v27, %v1344_v50  ;;  %v1396_v20 = vsel %vm1199_vm0, %v3996_v60, 0.0  ;;  %v1359_v12 = vrot.slane %v1358_v19, 1  ;;  %v1366_v37 = vrot.slane %v1365_v33, 1 }
  0x5d   :  { %v1371_v38 = vrot.slane %v1370_v44, 2  ;;  %v1378_v40 = vrot.slane %v1377_v34, 2  ;;  %v1353_v41 = vadd.f32 %v1352_v16, %v1351_v21  ;;  %v1383_v22 = vrot.slane %v1382_v6, 4 }
  0x5e   :  { %v1390_v0 = vrot.slane %v1389_v36, 4  ;;  %v1397_v13 = vrot.slane %v1396_v20, 4  ;;  %v1360_v39 = vadd.f32 %v1359_v12, %v1358_v19  ;;  %v1367_v3 = vadd.f32 %v1366_v37, %v1365_v33 }
  0x5f   :  { %v1372_v2 = vadd.f32 %v1371_v38, %v1370_v44  ;;  %v1379_v42 = vadd.f32 %v1378_v40, %v1377_v34  ;;  %v1384_v10 = vadd.f32 %v1383_v22, %v1382_v6  ;;  %v1403_v52 = vsel %vm1199_vm0, %v3998_v63, 0.0 }
  0x60   :  { %v1391_v49 = vadd.f32 %v1390_v0, %v1389_v36  ;;  %v1398_v43 = vadd.f32 %v1397_v13, %v1396_v20  ;;  %v1404_v50 = vrot.slane %v1403_v52, 4  ;;  %v1410_v46 = vsel %vm1199_vm0, %v4005_v17, 0.0 }
  0x61   :  { %v1373_v5 = vrot.slane %v1372_v2, 1  ;;  %v1380_v60 = vrot.slane %v1379_v42, 1  ;;  %v1385_v51 = vrot.slane %v1384_v10, 2  ;;  %v1411_v54 = vrot.slane %v1410_v46, 4 }
  0x62   :  { %v1392_v47 = vrot.slane %v1391_v49, 2  ;;  %v1399_v11 = vrot.slane %v1398_v43, 2  ;;  %v1405_v58 = vadd.f32 %v1404_v50, %v1403_v52  ;;  %v1417_v30 = vsel %vm1199_vm0, %v4007_v18, 0.0  ;;  %v73_v50 = vld [vmem:[#allocation2 + $0xe8] sm:$0xff] }
  0x63   :  { %v1374_v55 = vadd.f32 %v1373_v5, %v1372_v2  ;;  %v1381_v27 = vadd.f32 %v1380_v60, %v1379_v42  ;;  %v1386_v4 = vadd.f32 %v1385_v51, %v1384_v10  ;;  %v1412_v63 = vadd.f32 %v1411_v54, %v1410_v46  ;;  %v200_v60 = vld [vmem:[#allocation5 + $0xe0] sm:$0xff]  ;;  %v201_v46 = vld [vmem:[#allocation5 + $0xe8] sm:$0xff] }
  0x64   :  { %v1393_v61 = vadd.f32 %v1392_v47, %v1391_v49  ;;  %v1400_v35 = vadd.f32 %v1399_v11, %v1398_v43  ;;  %v1406_v21 = vrot.slane %v1405_v58, 2  ;;  %v1418_v19 = vrot.slane %v1417_v30, 4  ;;  %v4108_v49 = vld.sshfl [vmem:[#allocation1] sm:$0xff pattern:$0x75316420] }
  0x65   :  { %v3001_v33 = vpack.c.bf16 %v1339_v7, %v1332_v1  ;;  %v3002_v44 = vpack.c.bf16 %v1353_v41, %v1346_v32  ;;  %v1387_v34 = vrot.slane %v1386_v4, 1  ;;  %v1413_v6 = vrot.slane %v1412_v63, 2  ;;  %v72_v41 = vld [vmem:[#allocation2 + $0xe0] sm:$0xff]  ;;  %v4112_v51 = vld.sshfl [vmem:[#allocation1 + $0x10] sm:$0xff pattern:$0x75316420] }
  0x66   :  { %v1394_v17 = vrot.slane %v1393_v61, 1  ;;  %v1401_v16 = vrot.slane %v1400_v35, 1  ;;  %v1407_v36 = vadd.f32 %v1406_v21, %v1405_v58  ;;  %v1419_v20 = vadd.f32 %v1418_v19, %v1417_v30  ;;  %v4110_v43 = vld.sshfl [vmem:[#allocation1 + $0x8] sm:$0xff pattern:$0x75316420]  ;;  %v203_v21 = vld [vmem:[#allocation5 + $0xf8] sm:$0xff] }
  0x67   :  { %v3003_v12 = vpack.c.bf16 %v1367_v3, %v1360_v39  ;;  %v3265_v37 = vunpack.c.h.b16 %v4088_v45  ;;  %v1388_v38 = vadd.f32 %v1387_v34, %v1386_v4  ;;  %v1414_v18 = vadd.f32 %v1413_v6, %v1412_v63  ;;  %v75_v63 = vld [vmem:[#allocation2 + $0xf8] sm:$0xff]  ;;  %v4117_v19 = vld.sshfl [vmem:[#allocation1 + $0x18] sm:$0xff pattern:$0x75316420] }
  0x68   :  { %v1395_v40 = vadd.f32 %v1394_v17, %v1393_v61  ;;  %v3004_v22 = vpack.c.bf16 %v1381_v27, %v1374_v55  ;;  %v1402_v0 = vadd.f32 %v1401_v16, %v1400_v35  ;;  %v1408_v13 = vrot.slane %v1407_v36, 1  ;;  %v74_v27 = vld [vmem:[#allocation2 + $0xf0] sm:$0xff]  ;;  %v4123_v6 = vld.sshfl [vmem:[#allocation1 + $0x28] sm:$0xff pattern:$0x75316420] }
  0x69   :  { %v1420_v2 = vrot.slane %v1419_v20, 2  ;;  %v3266_v42 = vunpack.c.l.b16 %v3001_v33  ;;  %v1415_v10 = vrot.slane %v1414_v18, 1  ;;  %v3267_v7 = vunpack.c.h.b16 %v3001_v33  ;;  %v202_v35 = vld [vmem:[#allocation5 + $0xf0] sm:$0xff]  ;;  %v4119_v33 = vld.sshfl [vmem:[#allocation1 + $0x20] sm:$0xff pattern:$0x75316420] }
  0x6a   :  { %v3005_v1 = vpack.c.bf16 %v1395_v40, %v1388_v38  ;;  %v3268_v32 = vunpack.c.l.b16 %v3002_v44  ;;  %v1409_v39 = vadd.f32 %v1408_v13, %v1407_v36  ;;  %v3269_v52 = vunpack.c.h.b16 %v3002_v44  ;;  %v4125_v36 = vld.sshfl [vmem:[#allocation1 + $0x30] sm:$0xff pattern:$0x75316420]  ;;  %v4128_v38 = vld.sshfl [vmem:[#allocation1 + $0x38] sm:$0xff pattern:$0x75316420] }
  0x6b   :  { %v1421_v3 = vadd.f32 %v1420_v2, %v1419_v20  ;;  %v3270_v5 = vunpack.c.l.b16 %v3003_v12  ;;  %v1416_v47 = vadd.f32 %v1415_v10, %v1414_v18  ;;  %v3271_v11 = vunpack.c.h.b16 %v3003_v12 }
  0x6c   :  { %v3272_v54 = vunpack.c.l.b16 %v3004_v22  ;;  %v3273_v55 = vunpack.c.h.b16 %v3004_v22  ;;  %v3006_v30 = vpack.c.bf16 %v1409_v39, %v1402_v0  ;;  %v3274_v4 = vunpack.c.l.b16 %v3005_v1  ;;  %v76_v39 = vld [vmem:[#allocation2 + $0x100] sm:$0xff] }
  0x6d   :  { %v1422_v58 = vrot.slane %v1421_v3, 1  ;;  %v3525_v61 = vsel %vm3504_vm1, %v3266_v42, %v3264_v25  ;;  %v3532_v34 = vsel %vm3504_vm1, %v3267_v7, %v3265_v37  ;;  %v328_v17 = vmul.f32 %v200_v60, %v72_v41  ;;  %v205_v60 = vld [vmem:[#allocation5 + $0x108] sm:$0xff] }
  0x6e   :  { %v3526_v44 = vsel %vm3506_vm2, %v3268_v32, %v3525_v61  ;;  %v329_v16 = vmul.f32 %v201_v46, %v73_v50  ;;  %v3275_v20 = vunpack.c.h.b16 %v3005_v1  ;;  %v3276_v25 = vunpack.c.l.b16 %v3006_v30  ;;  %v79_v61 = vld [vmem:[#allocation2 + $0x118] sm:$0xff] }
  0x6f   :  { %v1423_v45 = vadd.f32 %v1422_v58, %v1421_v3  ;;  %v3527_v12 = vsel %vm3508_vm3, %v3270_v5, %v3526_v44  ;;  %v3533_v18 = vsel %vm3506_vm2, %v3269_v52, %v3532_v34  ;;  %643 = vst [vmem:[#allocation1] ss:$2 sm:$0xff] %v328_v17  ;;  %v330_v22 = vmul.f32 %v202_v35, %v74_v27  ;;  %v204_v52 = vld [vmem:[#allocation5 + $0x100] sm:$0xff]  ;;  %v77_v5 = vld [vmem:[#allocation2 + $0x108] sm:$0xff]  ;;  %v207_v35 = vld [vmem:[#allocation5 + $0x118] sm:$0xff] }
  0x70   :  { %v3528_v40 = vsel %vm3510_vm4, %v3272_v54, %v3527_v12  ;;  %v331_v37 = vmul.f32 %v203_v21, %v75_v63  ;;  %v3534_v2 = vsel %vm3508_vm3, %v3271_v11, %v3533_v18  ;;  %646 = vst [vmem:[#allocation1 + $0x10] ss:$2 sm:$0xff] %v329_v16  ;;  %v3277_v42 = vunpack.c.h.b16 %v3006_v30 }
  0x71   :  { %v3007_v0 = vpack.c.bf16 %v1423_v45, %v1416_v47  ;;  %v3529_v13 = vsel %vm3512_vm5, %v3274_v4, %v3528_v40  ;;  %v3535_v1 = vsel %vm3510_vm4, %v3273_v55, %v3534_v2  ;;  %649 = vst [vmem:[#allocation1 + $0x20] ss:$2 sm:$0xff] %v330_v22  ;;  %v1424_v50 = vsel %vm1199_vm0, %v4020_v14, 0.0  ;;  %v78_v55 = vld [vmem:[#allocation2 + $0x110] sm:$0xff] }
  0x72   :  { %v3530_v10 = vsel %vm3514_vm6, %v3276_v25, %v3529_v13  ;;  %v3536_v41 = vsel %vm3512_vm5, %v3275_v20, %v3535_v1  ;;  %652 = vst [vmem:[#allocation1 + $0x30] ss:$2 sm:$0xff] %v331_v37  ;;  %v1431_v46 = vsel %vm1199_vm0, %v4023_v48, 0.0  ;;  %v1438_v47 = vsel %vm1199_vm0, %v4025_v53, 0.0  ;;  %v206_v4 = vld [vmem:[#allocation5 + $0x110] sm:$0xff] }
  0x73   :  { %v3278_v7 = vunpack.c.l.b16 %v3007_v0  ;;  %v3279_v32 = vunpack.c.h.b16 %v3007_v0  ;;  %v3537_v3 = vsel %vm3514_vm6, %v3277_v42, %v3536_v41  ;;  %v1425_v27 = vrot.slane %v1424_v50, 4 }
  0x74   :  { %v1432_v58 = vrot.slane %v1431_v46, 4  ;;  %v1439_v63 = vrot.slane %v1438_v47, 4  ;;  %v1445_v14 = vsel %vm1199_vm0, %v4031_v24, 0.0  ;;  %v1452_v48 = vsel %vm1199_vm0, %v4033_v26, 0.0 }
  0x75   :  { %v3531_v11 = vsel %vm3516_vm7, %v3278_v7, %v3530_v10  ;;  %v3538_v54 = vsel %vm3516_vm7, %v3279_v32, %v3537_v3  ;;  %v332_v44 = vmul.f32 %v204_v52, %v76_v39  ;;  %v333_v34 = vmul.f32 %v205_v60, %v77_v5 }
  0x76   :  { %v3736_v30 = vpack.c.b16 %v3538_v54, %v3531_v11  ;;  %v4150_v21 = vld.sshfl [vmem:[#allocation1] sm:$0xff pattern:$0x75316420]  ;;  %v4152_v53 = vld.sshfl [vmem:[#allocation1 + $0x8] sm:$0xff pattern:$0x75316420]  ;;  %v1426_v17 = vadd.f32 %v1425_v27, %v1424_v50  ;;  %v1433_v45 = vadd.f32 %v1432_v58, %v1431_v46  ;;  %v1440_v20 = vadd.f32 %v1439_v63, %v1438_v47 }
  0x77   :  { %v4154_v16 = vld.sshfl [vmem:[#allocation1 + $0x10] sm:$0xff pattern:$0x75316420]  ;;  %v1446_v25 = vrot.slane %v1445_v14, 4  ;;  %v1453_v12 = vrot.slane %v1452_v48, 4  ;;  %v334_v18 = vmul.f32 %v206_v4, %v78_v55  ;;  %v335_v37 = vmul.f32 %v207_v35, %v79_v61 }
  0x78   :  { %3768 = vst [vmem:[#allocation7 + $0x8] sm:$0xff] %v3736_v30  ;;  %v4156_v40 = vld.sshfl [vmem:[#allocation1 + $0x18] sm:$0xff pattern:$0x75316420]  ;;  %v1427_v42 = vrot.slane %v1426_v17, 2  ;;  %v1434_v10 = vrot.slane %v1433_v45, 2 }
  0x79   :  { %v4158_v24 = vld.sshfl [vmem:[#allocation1 + $0x20] sm:$0xff pattern:$0x75316420]  ;;  %v4160_v26 = vld.sshfl [vmem:[#allocation1 + $0x28] sm:$0xff pattern:$0x75316420]  ;;  %v1447_v0 = vadd.f32 %v1446_v25, %v1445_v14  ;;  %v1454_v13 = vadd.f32 %v1453_v12, %v1452_v48 }
  0x7a   :  { %v4162_v22 = vld.sshfl [vmem:[#allocation1 + $0x30] sm:$0xff pattern:$0x75316420]  ;;  %v4164_v2 = vld.sshfl [vmem:[#allocation1 + $0x38] sm:$0xff pattern:$0x75316420]  ;;  %v1428_v41 = vadd.f32 %v1427_v42, %v1426_v17  ;;  %v1435_v5 = vadd.f32 %v1434_v10, %v1433_v45 }
  0x7b   :  { %655 = vst [vmem:[#allocation1] ss:$2 sm:$0xff] %v332_v44  ;;  %v1441_v1 = vrot.slane %v1440_v20, 2  ;;  %v1448_v7 = vrot.slane %v1447_v0, 2  ;;  %v1455_v32 = vrot.slane %v1454_v13, 2  ;;  %v1459_v39 = vsel %vm1199_vm0, %v4036_v31, 0.0 }
  0x7c   :  { %658 = vst [vmem:[#allocation1 + $0x10] ss:$2 sm:$0xff] %v333_v34  ;;  %v1466_v3 = vsel %vm1199_vm0, %v4038_v56, 0.0  ;;  %v1473_v52 = vsel %vm1199_vm0, %v4041_v62, 0.0  ;;  %v1429_v47 = vrot.slane %v1428_v41, 1  ;;  %v1460_v11 = vrot.slane %v1459_v39, 4 }
  0x7d   :  { %661 = vst [vmem:[#allocation1 + $0x20] ss:$2 sm:$0xff] %v334_v18  ;;  %v1442_v60 = vadd.f32 %v1441_v1, %v1440_v20  ;;  %v1449_v50 = vadd.f32 %v1448_v7, %v1447_v0  ;;  %v1456_v46 = vadd.f32 %v1455_v32, %v1454_v13  ;;  %v1467_v54 = vrot.slane %v1466_v3, 4 }
  0x7e   :  { %664 = vst [vmem:[#allocation1 + $0x30] ss:$2 sm:$0xff] %v335_v37  ;;  %v1474_v55 = vrot.slane %v1473_v52, 4  ;;  %v1436_v27 = vrot.slane %v1435_v5, 1  ;;  %v1430_v4 = vadd.f32 %v1429_v47, %v1428_v41  ;;  %v1461_v61 = vadd.f32 %v1460_v11, %v1459_v39 }
  0x7f   :  { %v1443_v58 = vrot.slane %v1442_v60, 1  ;;  %v1450_v30 = vrot.slane %v1449_v50, 1  ;;  %v1457_v31 = vrot.slane %v1456_v46, 1  ;;  %v1468_v35 = vadd.f32 %v1467_v54, %v1466_v3 }
  0x80   :  { %v1437_v56 = vadd.f32 %v1436_v27, %v1435_v5  ;;  %v1475_v62 = vadd.f32 %v1474_v55, %v1473_v52  ;;  %v1462_v17 = vrot.slane %v1461_v61, 2  ;;  %v1480_v25 = vsel %vm1199_vm0, %v4064_v59, 0.0 }
  0x81   :  { %v1444_v63 = vadd.f32 %v1443_v58, %v1442_v60  ;;  %v1451_v14 = vadd.f32 %v1450_v30, %v1449_v50  ;;  %v1458_v48 = vadd.f32 %v1457_v31, %v1456_v46  ;;  %v1469_v45 = vrot.slane %v1468_v35, 2 }
  0x82   :  { %v4172_v44 = vpack.c.bf16 %v1437_v56, %v1430_v4  ;;  %v1476_v20 = vrot.slane %v1475_v62, 2  ;;  %v1481_v12 = vrot.slane %v1480_v25, 4  ;;  %v1487_v18 = vsel %vm1199_vm0, %v4066_v23, 0.0 }
  0x83   :  { %v4174_v34 = vpack.c.bf16 %v1451_v14, %v1444_v63  ;;  %v1494_v37 = vsel %vm1199_vm0, %v4068_v28, 0.0  ;;  %v1501_v0 = vsel %vm1199_vm0, %v4070_v57, 0.0  ;;  %v1463_v13 = vadd.f32 %v1462_v17, %v1461_v61 }
  0x84   :  { %v1470_v42 = vadd.f32 %v1469_v45, %v1468_v35  ;;  %v1477_v10 = vadd.f32 %v1476_v20, %v1475_v62  ;;  %v1488_v1 = vrot.slane %v1487_v18, 4  ;;  %v1482_v7 = vadd.f32 %v1481_v12, %v1480_v25 }
  0x85   :  { %v1495_v32 = vrot.slane %v1494_v37, 4  ;;  %v1502_v41 = vrot.slane %v1501_v0, 4  ;;  %v1508_v59 = vsel %vm1199_vm0, %v4072_v29, 0.0  ;;  %v1464_v39 = vrot.slane %v1463_v13, 1 }
  0x86   :  { %v1471_v3 = vrot.slane %v1470_v42, 1  ;;  %v1478_v52 = vrot.slane %v1477_v10, 1  ;;  %v1489_v23 = vadd.f32 %v1488_v1, %v1487_v18  ;;  %v1483_v5 = vrot.slane %v1482_v7, 2 }
  0x87   :  { %v1496_v60 = vadd.f32 %v1495_v32, %v1494_v37  ;;  %v1503_v28 = vadd.f32 %v1502_v41, %v1501_v0  ;;  %v1509_v50 = vrot.slane %v1508_v59, 4  ;;  %v1465_v46 = vadd.f32 %v1464_v39, %v1463_v13 }
  0x88   :  { %v1472_v57 = vadd.f32 %v1471_v3, %v1470_v42  ;;  %v1479_v47 = vadd.f32 %v1478_v52, %v1477_v10  ;;  %v1490_v11 = vrot.slane %v1489_v23, 2  ;;  %v1484_v54 = vadd.f32 %v1483_v5, %v1482_v7 }
  0x89   :  { %v1497_v55 = vrot.slane %v1496_v60, 2  ;;  %v1504_v27 = vrot.slane %v1503_v28, 2  ;;  %v1510_v58 = vadd.f32 %v1509_v50, %v1508_v59  ;;  %v1515_v29 = vsel %vm1199_vm0, %v4074_v8, 0.0 }
  0x8a   :  { %v1491_v30 = vadd.f32 %v1490_v11, %v1489_v23  ;;  %v1522_v4 = vsel %vm1199_vm0, %v4076_v15, 0.0  ;;  %v1529_v31 = vsel %vm1199_vm0, %v4078_v9, 0.0  ;;  %v1485_v61 = vrot.slane %v1484_v54, 1 }
  0x8b   :  { %v1498_v35 = vadd.f32 %v1497_v55, %v1496_v60  ;;  %v1505_v56 = vadd.f32 %v1504_v27, %v1503_v28  ;;  %v1511_v63 = vrot.slane %v1510_v58, 2  ;;  %v1516_v62 = vrot.slane %v1515_v29, 4  ;;  %v4196_v55 = vld.sshfl [vmem:[#allocation1] sm:$0xff pattern:$0x75316420] }
  0x8c   :  { %v1492_v14 = vrot.slane %v1491_v30, 1  ;;  %v1523_v17 = vrot.slane %v1522_v4, 4  ;;  %v1530_v45 = vrot.slane %v1529_v31, 4  ;;  %v1486_v20 = vadd.f32 %v1485_v61, %v1484_v54  ;;  %v4200_v61 = vld.sshfl [vmem:[#allocation1 + $0x10] sm:$0xff pattern:$0x75316420] }
  0x8d   :  { %v1499_v25 = vrot.slane %v1498_v35, 1  ;;  %v1506_v12 = vrot.slane %v1505_v56, 1  ;;  %v1512_v18 = vadd.f32 %v1511_v63, %v1510_v58  ;;  %v1517_v8 = vadd.f32 %v1516_v62, %v1515_v29  ;;  %v208_v29 = vld [vmem:[#allocation5 + $0x120] sm:$0xff]  ;;  %v82_v63 = vld [vmem:[#allocation2 + $0x130] sm:$0xff] }
  0x8e   :  { %v1493_v37 = vadd.f32 %v1492_v14, %v1491_v30  ;;  %v1524_v0 = vadd.f32 %v1523_v17, %v1522_v4  ;;  %v1531_v13 = vadd.f32 %v1530_v45, %v1529_v31  ;;  %v3010_v9 = vpack.c.bf16 %v1465_v46, %v1458_v48  ;;  %v80_v46 = vld [vmem:[#allocation2 + $0x120] sm:$0xff]  ;;  %v81_v4 = vld [vmem:[#allocation2 + $0x128] sm:$0xff] }
  0x8f   :  { %v1500_v15 = vadd.f32 %v1499_v25, %v1498_v35  ;;  %v1507_v42 = vadd.f32 %v1506_v12, %v1505_v56  ;;  %v1513_v10 = vrot.slane %v1512_v18, 1  ;;  %v1518_v1 = vrot.slane %v1517_v8, 2  ;;  %v209_v31 = vld [vmem:[#allocation5 + $0x128] sm:$0xff]  ;;  %v83_v25 = vld [vmem:[#allocation2 + $0x138] sm:$0xff] }
  0x90   :  { %v1525_v7 = vrot.slane %v1524_v0, 2  ;;  %v1532_v32 = vrot.slane %v1531_v13, 2  ;;  %v3011_v41 = vpack.c.bf16 %v1479_v47, %v1472_v57  ;;  %v3012_v39 = vpack.c.bf16 %v1493_v37, %v1486_v20  ;;  %v4198_v57 = vld.sshfl [vmem:[#allocation1 + $0x8] sm:$0xff pattern:$0x75316420]  ;;  %v210_v20 = vld [vmem:[#allocation5 + $0x130] sm:$0xff] }
  0x91   :  { %v1514_v59 = vadd.f32 %v1513_v10, %v1512_v18  ;;  %v3013_v3 = vpack.c.bf16 %v1507_v42, %v1500_v15  ;;  %v3280_v52 = vunpack.c.l.b16 %v4172_v44  ;;  %v1519_v23 = vadd.f32 %v1518_v1, %v1517_v8  ;;  %v211_v12 = vld [vmem:[#allocation5 + $0x138] sm:$0xff]  ;;  %v4202_v18 = vld.sshfl [vmem:[#allocation1 + $0x18] sm:$0xff pattern:$0x75316420] }
  0x92   :  { %v1526_v5 = vadd.f32 %v1525_v7, %v1524_v0  ;;  %v1533_v60 = vadd.f32 %v1532_v32, %v1531_v13  ;;  %v3281_v28 = vunpack.c.h.b16 %v4172_v44  ;;  %v3282_v50 = vunpack.c.l.b16 %v4174_v34  ;;  %v4204_v37 = vld.sshfl [vmem:[#allocation1 + $0x20] sm:$0xff pattern:$0x75316420]  ;;  %v4208_v42 = vld.sshfl [vmem:[#allocation1 + $0x28] sm:$0xff pattern:$0x75316420] }
  0x93   :  { %v3283_v11 = vunpack.c.h.b16 %v4174_v34  ;;  %v3284_v54 = vunpack.c.l.b16 %v3010_v9  ;;  %v3285_v48 = vunpack.c.h.b16 %v3010_v9  ;;  %v1520_v47 = vrot.slane %v1519_v23, 1  ;;  %v4210_v10 = vld.sshfl [vmem:[#allocation1 + $0x30] sm:$0xff pattern:$0x75316420] }
  0x94   :  { %v1527_v27 = vrot.slane %v1526_v5, 1  ;;  %v1534_v58 = vrot.slane %v1533_v60, 1  ;;  %v3286_v30 = vunpack.c.l.b16 %v3011_v41  ;;  %v3287_v44 = vunpack.c.h.b16 %v3011_v41  ;;  %v4214_v41 = vld.sshfl [vmem:[#allocation1 + $0x38] sm:$0xff pattern:$0x75316420] }
  0x95   :  { %v3288_v35 = vunpack.c.l.b16 %v3012_v39  ;;  %v3289_v56 = vunpack.c.h.b16 %v3012_v39  ;;  %v3290_v34 = vunpack.c.l.b16 %v3013_v3  ;;  %v1521_v14 = vadd.f32 %v1520_v47, %v1519_v23 }
  0x96   :  { %v1528_v62 = vadd.f32 %v1527_v27, %v1526_v5  ;;  %v1535_v17 = vadd.f32 %v1534_v58, %v1533_v60  ;;  %v3291_v45 = vunpack.c.h.b16 %v3013_v3  ;;  %v3539_v8 = vsel %vm3504_vm1, %v3282_v50, %v3280_v52  ;;  %v84_v27 = vld [vmem:[#allocation2 + $0x140] sm:$0xff] }
  0x97   :  { %v3546_v0 = vsel %vm3504_vm1, %v3283_v11, %v3281_v28  ;;  %v336_v13 = vmul.f32 %v208_v29, %v80_v46  ;;  %v337_v15 = vmul.f32 %v209_v31, %v81_v4  ;;  %v3014_v9 = vpack.c.bf16 %v1521_v14, %v1514_v59  ;;  %v212_v58 = vld [vmem:[#allocation5 + $0x140] sm:$0xff] }
  0x98   :  { %v3015_v1 = vpack.c.bf16 %v1535_v17, %v1528_v62  ;;  %v3540_v7 = vsel %vm3506_vm2, %v3284_v54, %v3539_v8  ;;  %v3547_v32 = vsel %vm3506_vm2, %v3285_v48, %v3546_v0  ;;  %v338_v39 = vmul.f32 %v210_v20, %v82_v63  ;;  %v214_v62 = vld [vmem:[#allocation5 + $0x150] sm:$0xff]  ;;  %v87_v17 = vld [vmem:[#allocation2 + $0x158] sm:$0xff] }
  0x99   :  { %667 = vst [vmem:[#allocation1] ss:$2 sm:$0xff] %v336_v13  ;;  %v339_v3 = vmul.f32 %v211_v12, %v83_v25  ;;  %v3541_v52 = vsel %vm3508_vm3, %v3286_v30, %v3540_v7  ;;  %v3548_v23 = vsel %vm3508_vm3, %v3287_v44, %v3547_v32  ;;  %v3292_v5 = vunpack.c.l.b16 %v3014_v9  ;;  %v85_v44 = vld [vmem:[#allocation2 + $0x148] sm:$0xff] }
  0x9a   :  { %670 = vst [vmem:[#allocation1 + $0x10] ss:$2 sm:$0xff] %v337_v15  ;;  %v3293_v60 = vunpack.c.h.b16 %v3014_v9  ;;  %v3542_v28 = vsel %vm3510_vm4, %v3288_v35, %v3541_v52  ;;  %v3549_v59 = vsel %vm3510_vm4, %v3289_v56, %v3548_v23  ;;  %v3294_v50 = vunpack.c.l.b16 %v3015_v1  ;;  %v213_v35 = vld [vmem:[#allocation5 + $0x148] sm:$0xff]  ;;  %v86_v56 = vld [vmem:[#allocation2 + $0x150] sm:$0xff] }
  0x9b   :  { %673 = vst [vmem:[#allocation1 + $0x20] ss:$2 sm:$0xff] %v338_v39  ;;  %v3295_v11 = vunpack.c.h.b16 %v3015_v1  ;;  %v3543_v54 = vsel %vm3512_vm5, %v3290_v34, %v3542_v28  ;;  %v3550_v48 = vsel %vm3512_vm5, %v3291_v45, %v3549_v59  ;;  %v1536_v30 = vsel %vm1199_vm0, %v4108_v49, 0.0  ;;  %v215_v45 = vld [vmem:[#allocation5 + $0x158] sm:$0xff] }
  0x9c   :  { %676 = vst [vmem:[#allocation1 + $0x30] ss:$2 sm:$0xff] %v339_v3  ;;  %v3544_v46 = vsel %vm3514_vm6, %v3292_v5, %v3543_v54  ;;  %v3551_v47 = vsel %vm3514_vm6, %v3293_v60, %v3550_v48  ;;  %v1543_v29 = vsel %vm1199_vm0, %v4110_v43, 0.0  ;;  %v1537_v34 = vrot.slane %v1536_v30, 4 }
  0x9d   :  { %v3545_v4 = vsel %vm3516_vm7, %v3294_v50, %v3544_v46  ;;  %v3552_v31 = vsel %vm3516_vm7, %v3295_v11, %v3551_v47  ;;  %v1544_v63 = vrot.slane %v1543_v29, 4  ;;  %v1550_v20 = vsel %vm1199_vm0, %v4112_v51, 0.0 }
  0x9e   :  { %v3737_v14 = vpack.c.b16 %v3552_v31, %v3545_v4  ;;  %v1557_v49 = vsel %vm1199_vm0, %v4117_v19, 0.0  ;;  %v1564_v43 = vsel %vm1199_vm0, %v4119_v33, 0.0  ;;  %v340_v8 = vmul.f32 %v212_v58, %v84_v27 }
  0x9f   :  { %v1538_v0 = vadd.f32 %v1537_v34, %v1536_v30  ;;  %v341_v15 = vmul.f32 %v213_v35, %v85_v44  ;;  %v1545_v9 = vadd.f32 %v1544_v63, %v1543_v29  ;;  %v1551_v1 = vrot.slane %v1550_v20, 4 }
  0xa0   :  { %v4236_v25 = vld.sshfl [vmem:[#allocation1] sm:$0xff pattern:$0x75316420]  ;;  %v4238_v12 = vld.sshfl [vmem:[#allocation1 + $0x8] sm:$0xff pattern:$0x75316420]  ;;  %v342_v19 = vmul.f32 %v214_v62, %v86_v56  ;;  %v343_v3 = vmul.f32 %v215_v45, %v87_v17 }
  0xa1   :  { %3769 = vst [vmem:[#allocation7 + $0x10] sm:$0xff] %v3737_v14  ;;  %v4240_v13 = vld.sshfl [vmem:[#allocation1 + $0x10] sm:$0xff pattern:$0x75316420]  ;;  %v1558_v7 = vrot.slane %v1557_v49, 4  ;;  %v1552_v52 = vadd.f32 %v1551_v1, %v1550_v20  ;;  %v1539_v60 = vrot.slane %v1538_v0, 2 }
  0xa2   :  { %v4242_v51 = vld.sshfl [vmem:[#allocation1 + $0x18] sm:$0xff pattern:$0x75316420]  ;;  %v4244_v32 = vld.sshfl [vmem:[#allocation1 + $0x20] sm:$0xff pattern:$0x75316420] }
  0xa3   :  { %v4246_v39 = vld.sshfl [vmem:[#allocation1 + $0x28] sm:$0xff pattern:$0x75316420]  ;;  %v4248_v33 = vld.sshfl [vmem:[#allocation1 + $0x30] sm:$0xff pattern:$0x75316420]  ;;  %v1559_v23 = vadd.f32 %v1558_v7, %v1557_v49  ;;  %v1540_v54 = vadd.f32 %v1539_v60, %v1538_v0 }
  0xa4   :  { %v4250_v5 = vld.sshfl [vmem:[#allocation1 + $0x38] sm:$0xff pattern:$0x75316420]  ;;  %679 = vst [vmem:[#allocation1] ss:$2 sm:$0xff] %v340_v8  ;;  %v1546_v28 = vrot.slane %v1545_v9, 2 }
  0xa5   :  { %682 = vst [vmem:[#allocation1 + $0x10] ss:$2 sm:$0xff] %v341_v15  ;;  %v1553_v59 = vrot.slane %v1552_v52, 2  ;;  %v1560_v50 = vrot.slane %v1559_v23, 2  ;;  %v1565_v11 = vrot.slane %v1564_v43, 4  ;;  %v1571_v48 = vsel %vm1199_vm0, %v4123_v6, 0.0 }
  0xa6   :  { %685 = vst [vmem:[#allocation1 + $0x20] ss:$2 sm:$0xff] %v342_v19  ;;  %v1578_v46 = vsel %vm1199_vm0, %v4125_v36, 0.0  ;;  %v1585_v47 = vsel %vm1199_vm0, %v4128_v38, 0.0  ;;  %v1547_v27 = vadd.f32 %v1546_v28, %v1545_v9  ;;  %v1541_v4 = vrot.slane %v1540_v54, 1 }
  0xa7   :  { %688 = vst [vmem:[#allocation1 + $0x30] ss:$2 sm:$0xff] %v343_v3  ;;  %v1554_v58 = vadd.f32 %v1553_v59, %v1552_v52  ;;  %v1561_v30 = vadd.f32 %v1560_v50, %v1559_v23  ;;  %v1566_v29 = vadd.f32 %v1565_v11, %v1564_v43  ;;  %v1572_v31 = vrot.slane %v1571_v48, 4 }
  0xa8   :  { %v1579_v44 = vrot.slane %v1578_v46, 4  ;;  %v1586_v35 = vrot.slane %v1585_v47, 4  ;;  %v1548_v56 = vrot.slane %v1547_v27, 1  ;;  %v1542_v6 = vadd.f32 %v1541_v4, %v1540_v54 }
  0xa9   :  { %v1555_v34 = vrot.slane %v1554_v58, 1  ;;  %v1562_v63 = vrot.slane %v1561_v30, 1  ;;  %v1567_v14 = vrot.slane %v1566_v29, 2  ;;  %v1573_v62 = vadd.f32 %v1572_v31, %v1571_v48 }
  0xaa   :  { %v1580_v17 = vadd.f32 %v1579_v44, %v1578_v46  ;;  %v1587_v36 = vadd.f32 %v1586_v35, %v1585_v47  ;;  %v1549_v45 = vadd.f32 %v1548_v56, %v1547_v27  ;;  %v1592_v7 = vsel %vm1199_vm0, %v4150_v21, 0.0 }
  0xab   :  { %v1556_v20 = vadd.f32 %v1555_v34, %v1554_v58  ;;  %v1563_v38 = vadd.f32 %v1562_v63, %v1561_v30  ;;  %v1568_v49 = vadd.f32 %v1567_v14, %v1566_v29  ;;  %v1574_v15 = vrot.slane %v1573_v62, 2 }
  0xac   :  { %v4258_v8 = vpack.c.bf16 %v1549_v45, %v1542_v6  ;;  %v1581_v9 = vrot.slane %v1580_v17, 2  ;;  %v1588_v1 = vrot.slane %v1587_v36, 2  ;;  %v1599_v19 = vsel %vm1199_vm0, %v4152_v53, 0.0 }
  0xad   :  { %v4260_v0 = vpack.c.bf16 %v1563_v38, %v1556_v20  ;;  %v1569_v43 = vrot.slane %v1568_v49, 1  ;;  %v1606_v3 = vsel %vm1199_vm0, %v4154_v16, 0.0  ;;  %v1613_v52 = vsel %vm1199_vm0, %v4156_v40, 0.0 }
  0xae   :  { %v1575_v60 = vadd.f32 %v1574_v15, %v1573_v62  ;;  %v1582_v28 = vadd.f32 %v1581_v9, %v1580_v17  ;;  %v1589_v59 = vadd.f32 %v1588_v1, %v1587_v36  ;;  %v1593_v50 = vrot.slane %v1592_v7, 4 }
  0xaf   :  { %v1570_v23 = vadd.f32 %v1569_v43, %v1568_v49  ;;  %v1600_v11 = vrot.slane %v1599_v19, 4  ;;  %v1607_v54 = vrot.slane %v1606_v3, 4  ;;  %v1614_v48 = vrot.slane %v1613_v52, 4 }
  0xb0   :  { %v1576_v46 = vrot.slane %v1575_v60, 1  ;;  %v1583_v47 = vrot.slane %v1582_v28, 1  ;;  %v1590_v21 = vrot.slane %v1589_v59, 1  ;;  %v1620_v53 = vsel %vm1199_vm0, %v4158_v24, 0.0 }
  0xb1   :  { %v1594_v27 = vadd.f32 %v1593_v50, %v1592_v7  ;;  %v1601_v58 = vadd.f32 %v1600_v11, %v1599_v19  ;;  %v1608_v16 = vadd.f32 %v1607_v54, %v1606_v3  ;;  %v1615_v30 = vadd.f32 %v1614_v48, %v1613_v52 }
  0xb2   :  { %v1577_v29 = vadd.f32 %v1576_v46, %v1575_v60  ;;  %v1584_v40 = vadd.f32 %v1583_v47, %v1582_v28  ;;  %v1591_v4 = vadd.f32 %v1590_v21, %v1589_v59  ;;  %v1621_v31 = vrot.slane %v1620_v53, 4 }
  0xb3   :  { %v1595_v44 = vrot.slane %v1594_v27, 2  ;;  %v1602_v35 = vrot.slane %v1601_v58, 2  ;;  %v1609_v56 = vrot.slane %v1608_v16, 2  ;;  %v1616_v34 = vrot.slane %v1615_v30, 2 }
  0xb4   :  { %v1622_v63 = vadd.f32 %v1621_v31, %v1620_v53  ;;  %v1627_v14 = vsel %vm1199_vm0, %v4160_v26, 0.0  ;;  %v1634_v6 = vsel %vm1199_vm0, %v4162_v22, 0.0  ;;  %v1641_v24 = vsel %vm1199_vm0, %v4164_v2, 0.0 }
  0xb5   :  { %v1596_v62 = vadd.f32 %v1595_v44, %v1594_v27  ;;  %v1603_v17 = vadd.f32 %v1602_v35, %v1601_v58  ;;  %v1610_v36 = vadd.f32 %v1609_v56, %v1608_v16  ;;  %v1617_v45 = vadd.f32 %v1616_v34, %v1615_v30 }
  0xb6   :  { %v1623_v20 = vrot.slane %v1622_v63, 2  ;;  %v1628_v38 = vrot.slane %v1627_v14, 4  ;;  %v1635_v49 = vrot.slane %v1634_v6, 4  ;;  %v1642_v43 = vrot.slane %v1641_v24, 4 }
  0xb7   :  { %v1597_v15 = vrot.slane %v1596_v62, 1  ;;  %v1604_v9 = vrot.slane %v1603_v17, 1  ;;  %v1611_v1 = vrot.slane %v1610_v36, 1  ;;  %v1618_v7 = vrot.slane %v1617_v45, 1 }
  0xb8   :  { %v1624_v19 = vadd.f32 %v1623_v20, %v1622_v63  ;;  %v1629_v26 = vadd.f32 %v1628_v38, %v1627_v14  ;;  %v1636_v3 = vadd.f32 %v1635_v49, %v1634_v6  ;;  %v1643_v52 = vadd.f32 %v1642_v43, %v1641_v24  ;;  %v88_v6 = vld [vmem:[#allocation2 + $0x160] sm:$0xff]  ;;  %v4282_v24 = vld.sshfl [vmem:[#allocation1] sm:$0xff pattern:$0x75316420]  ;;  %v89_v38 = vld [vmem:[#allocation2 + $0x168] sm:$0xff] }
  0xb9   :  { %v1598_v22 = vadd.f32 %v1597_v15, %v1596_v62  ;;  %v1605_v60 = vadd.f32 %v1604_v9, %v1603_v17  ;;  %v1612_v28 = vadd.f32 %v1611_v1, %v1610_v36  ;;  %v1619_v2 = vadd.f32 %v1618_v7, %v1617_v45  ;;  %v4284_v62 = vld.sshfl [vmem:[#allocation1 + $0x8] sm:$0xff pattern:$0x75316420]  ;;  %v4286_v49 = vld.sshfl [vmem:[#allocation1 + $0x10] sm:$0xff pattern:$0x75316420] }
  0xba   :  { %v1625_v59 = vrot.slane %v1624_v19, 1  ;;  %v1630_v50 = vrot.slane %v1629_v26, 2  ;;  %v1637_v11 = vrot.slane %v1636_v3, 2  ;;  %v1644_v54 = vrot.slane %v1643_v52, 2  ;;  %v216_v20 = vld [vmem:[#allocation5 + $0x160] sm:$0xff]  ;;  %v90_v7 = vld [vmem:[#allocation2 + $0x170] sm:$0xff] }
  0xbb   :  { %v3018_v48 = vpack.c.bf16 %v1577_v29, %v1570_v23  ;;  %v3019_v46 = vpack.c.bf16 %v1591_v4, %v1584_v40  ;;  %v3020_v47 = vpack.c.bf16 %v1605_v60, %v1598_v22  ;;  %v3021_v21 = vpack.c.bf16 %v1619_v2, %v1612_v28  ;;  %v218_v22 = vld [vmem:[#allocation5 + $0x170] sm:$0xff]  ;;  %v91_v60 = vld [vmem:[#allocation2 + $0x178] sm:$0xff] }
  0xbc   :  { %v1626_v53 = vadd.f32 %v1625_v59, %v1624_v19  ;;  %v1631_v27 = vadd.f32 %v1630_v50, %v1629_v26  ;;  %v1638_v58 = vadd.f32 %v1637_v11, %v1636_v3  ;;  %v1645_v16 = vadd.f32 %v1644_v54, %v1643_v52  ;;  %v219_v28 = vld [vmem:[#allocation5 + $0x178] sm:$0xff]  ;;  %v4292_v2 = vld.sshfl [vmem:[#allocation1 + $0x18] sm:$0xff pattern:$0x75316420] }
  0xbd   :  { %v3296_v30 = vunpack.c.l.b16 %v4258_v8  ;;  %v3297_v31 = vunpack.c.h.b16 %v4258_v8  ;;  %v3298_v44 = vunpack.c.l.b16 %v4260_v0  ;;  %v3299_v35 = vunpack.c.h.b16 %v4260_v0  ;;  %v217_v0 = vld [vmem:[#allocation5 + $0x168] sm:$0xff]  ;;  %v4294_v59 = vld.sshfl [vmem:[#allocation1 + $0x20] sm:$0xff pattern:$0x75316420] }
  0xbe   :  { %v1632_v56 = vrot.slane %v1631_v27, 1  ;;  %v1639_v34 = vrot.slane %v1638_v58, 1  ;;  %v1646_v63 = vrot.slane %v1645_v16, 1  ;;  %v3300_v14 = vunpack.c.l.b16 %v3018_v48  ;;  %v4296_v54 = vld.sshfl [vmem:[#allocation1 + $0x28] sm:$0xff pattern:$0x75316420] }
  0xbf   :  { %v3301_v23 = vunpack.c.h.b16 %v3018_v48  ;;  %v3302_v29 = vunpack.c.l.b16 %v3019_v46  ;;  %v3303_v40 = vunpack.c.h.b16 %v3019_v46  ;;  %v3304_v4 = vunpack.c.l.b16 %v3020_v47  ;;  %v4298_v48 = vld.sshfl [vmem:[#allocation1 + $0x30] sm:$0xff pattern:$0x75316420] }
  0xc0   :  { %v1633_v17 = vadd.f32 %v1632_v56, %v1631_v27  ;;  %v1640_v36 = vadd.f32 %v1639_v34, %v1638_v58  ;;  %v1647_v8 = vadd.f32 %v1646_v63, %v1645_v16  ;;  %v3305_v45 = vunpack.c.h.b16 %v3020_v47  ;;  %v4302_v27 = vld.sshfl [vmem:[#allocation1 + $0x38] sm:$0xff pattern:$0x75316420] }
  0xc1   :  { %v3306_v43 = vunpack.c.l.b16 %v3021_v21  ;;  %v3307_v15 = vunpack.c.h.b16 %v3021_v21  ;;  %v3553_v9 = vsel %vm3504_vm1, %v3298_v44, %v3296_v30  ;;  %v3560_v1 = vsel %vm3504_vm1, %v3299_v35, %v3297_v31 }
  0xc2   :  { %v3022_v19 = vpack.c.bf16 %v1633_v17, %v1626_v53  ;;  %v3023_v26 = vpack.c.bf16 %v1647_v8, %v1640_v36  ;;  %v3554_v3 = vsel %vm3506_vm2, %v3300_v14, %v3553_v9  ;;  %v3561_v52 = vsel %vm3506_vm2, %v3301_v23, %v3560_v1  ;;  %v92_v17 = vld [vmem:[#allocation2 + $0x180] sm:$0xff]  ;;  %v93_v8 = vld [vmem:[#allocation2 + $0x188] sm:$0xff] }
  0xc3   :  { %v344_v50 = vmul.f32 %v216_v20, %v88_v6  ;;  %v345_v11 = vmul.f32 %v217_v0, %v89_v38  ;;  %v3555_v21 = vsel %vm3508_vm3, %v3302_v29, %v3554_v3  ;;  %v3562_v53 = vsel %vm3508_vm3, %v3303_v40, %v3561_v52  ;;  %v220_v36 = vld [vmem:[#allocation5 + $0x180] sm:$0xff]  ;;  %v221_v0 = vld [vmem:[#allocation5 + $0x188] sm:$0xff] }
  0xc4   :  { %v3308_v46 = vunpack.c.l.b16 %v3022_v19  ;;  %v3309_v47 = vunpack.c.h.b16 %v3022_v19  ;;  %v3556_v58 = vsel %vm3510_vm4, %v3304_v4, %v3555_v21  ;;  %v3563_v16 = vsel %vm3510_vm4, %v3305_v45, %v3562_v53 }
  0xc5   :  { %691 = vst [vmem:[#allocation1] ss:$2 sm:$0xff] %v344_v50  ;;  %v346_v30 = vmul.f32 %v218_v22, %v90_v7  ;;  %v347_v31 = vmul.f32 %v219_v28, %v91_v60  ;;  %v3310_v44 = vunpack.c.l.b16 %v3023_v26  ;;  %v3311_v35 = vunpack.c.h.b16 %v3023_v26  ;;  %v223_v7 = vld [vmem:[#allocation5 + $0x198] sm:$0xff] }
  0xc6   :  { %v3557_v56 = vsel %vm3512_vm5, %v3306_v43, %v3556_v58  ;;  %v3564_v34 = vsel %vm3512_vm5, %v3307_v15, %v3563_v16  ;;  %694 = vst [vmem:[#allocation1 + $0x10] ss:$2 sm:$0xff] %v345_v11  ;;  %v1648_v40 = vsel %vm1199_vm0, %v4196_v55, 0.0  ;;  %v1655_v4 = vsel %vm1199_vm0, %v4198_v57, 0.0  ;;  %v94_v43 = vld [vmem:[#allocation2 + $0x190] sm:$0xff]  ;;  %v95_v57 = vld [vmem:[#allocation2 + $0x198] sm:$0xff] }
  0xc7   :  { %v3558_v63 = vsel %vm3514_vm6, %v3308_v46, %v3557_v56  ;;  %v3565_v14 = vsel %vm3514_vm6, %v3309_v47, %v3564_v34  ;;  %697 = vst [vmem:[#allocation1 + $0x20] ss:$2 sm:$0xff] %v346_v30  ;;  %v1649_v45 = vrot.slane %v1648_v40, 4  ;;  %v1656_v20 = vrot.slane %v1655_v4, 4  ;;  %v222_v15 = vld [vmem:[#allocation5 + $0x190] sm:$0xff] }
  0xc8   :  { %v3559_v23 = vsel %vm3516_vm7, %v3310_v44, %v3558_v63  ;;  %v3566_v29 = vsel %vm3516_vm7, %v3311_v35, %v3565_v14  ;;  %700 = vst [vmem:[#allocation1 + $0x30] ss:$2 sm:$0xff] %v347_v31  ;;  %v1662_v38 = vsel %vm1199_vm0, %v4200_v61, 0.0  ;;  %v1669_v1 = vsel %vm1199_vm0, %v4202_v18, 0.0 }
  0xc9   :  { %v3738_v6 = vpack.c.b16 %v3566_v29, %v3559_v23  ;;  %v1663_v9 = vrot.slane %v1662_v38, 4  ;;  %v1676_v55 = vsel %vm1199_vm0, %v4204_v37, 0.0  ;;  %v1670_v19 = vrot.slane %v1669_v1, 4 }
  0xca   :  { %v1677_v26 = vrot.slane %v1676_v55, 4  ;;  %v1683_v3 = vsel %vm1199_vm0, %v4208_v42, 0.0  ;;  %v348_v22 = vmul.f32 %v220_v36, %v92_v17  ;;  %v1650_v60 = vadd.f32 %v1649_v45, %v1648_v40 }
  0xcb   :  { %3770 = vst [vmem:[#allocation7 + $0x18] sm:$0xff] %v3738_v6  ;;  %v1657_v28 = vadd.f32 %v1656_v20, %v1655_v4  ;;  %v1664_v50 = vadd.f32 %v1663_v9, %v1662_v38  ;;  %v349_v37 = vmul.f32 %v221_v0, %v93_v8  ;;  %v1671_v46 = vadd.f32 %v1670_v19, %v1669_v1 }
  0xcc   :  { %v4324_v52 = vld.sshfl [vmem:[#allocation1] sm:$0xff pattern:$0x75316420]  ;;  %v4326_v61 = vld.sshfl [vmem:[#allocation1 + $0x8] sm:$0xff pattern:$0x75316420]  ;;  %v1678_v47 = vadd.f32 %v1677_v26, %v1676_v55  ;;  %v350_v42 = vmul.f32 %v222_v15, %v94_v43  ;;  %v351_v30 = vmul.f32 %v223_v7, %v95_v57 }
  0xcd   :  { %v4328_v18 = vld.sshfl [vmem:[#allocation1 + $0x10] sm:$0xff pattern:$0x75316420]  ;;  %v4330_v11 = vld.sshfl [vmem:[#allocation1 + $0x18] sm:$0xff pattern:$0x75316420] }
  0xce   :  { %v4332_v21 = vld.sshfl [vmem:[#allocation1 + $0x20] sm:$0xff pattern:$0x75316420]  ;;  %v4334_v53 = vld.sshfl [vmem:[#allocation1 + $0x28] sm:$0xff pattern:$0x75316420] }
  0xcf   :  { %v4336_v58 = vld.sshfl [vmem:[#allocation1 + $0x30] sm:$0xff pattern:$0x75316420]  ;;  %v4338_v16 = vld.sshfl [vmem:[#allocation1 + $0x38] sm:$0xff pattern:$0x75316420] }
  0xd0   :  { %703 = vst [vmem:[#allocation1] ss:$2 sm:$0xff] %v348_v22  ;;  %v1651_v31 = vrot.slane %v1650_v60, 2  ;;  %v1658_v44 = vrot.slane %v1657_v28, 2  ;;  %v1665_v35 = vrot.slane %v1664_v50, 2  ;;  %v1672_v56 = vrot.slane %v1671_v46, 2 }
  0xd1   :  { %706 = vst [vmem:[#allocation1 + $0x10] ss:$2 sm:$0xff] %v349_v37  ;;  %v1679_v34 = vrot.slane %v1678_v47, 2  ;;  %v1684_v63 = vrot.slane %v1683_v3, 4  ;;  %v1690_v14 = vsel %vm1199_vm0, %v4210_v10, 0.0  ;;  %v1697_v23 = vsel %vm1199_vm0, %v4214_v41, 0.0 }
  0xd2   :  { %709 = vst [vmem:[#allocation1 + $0x20] ss:$2 sm:$0xff] %v350_v42  ;;  %v1652_v29 = vadd.f32 %v1651_v31, %v1650_v60  ;;  %v1659_v40 = vadd.f32 %v1658_v44, %v1657_v28  ;;  %v1666_v4 = vadd.f32 %v1665_v35, %v1664_v50  ;;  %v1673_v6 = vadd.f32 %v1672_v56, %v1671_v46 }
  0xd3   :  { %712 = vst [vmem:[#allocation1 + $0x30] ss:$2 sm:$0xff] %v351_v30  ;;  %v1680_v17 = vadd.f32 %v1679_v34, %v1678_v47  ;;  %v1685_v36 = vadd.f32 %v1684_v63, %v1683_v3  ;;  %v1691_v8 = vrot.slane %v1690_v14, 4  ;;  %v1698_v45 = vrot.slane %v1697_v23, 4 }
  0xd4   :  { %v1653_v20 = vrot.slane %v1652_v29, 1  ;;  %v1660_v38 = vrot.slane %v1659_v40, 1  ;;  %v1667_v0 = vrot.slane %v1666_v4, 1  ;;  %v1674_v43 = vrot.slane %v1673_v6, 1 }
  0xd5   :  { %v1681_v15 = vrot.slane %v1680_v17, 1  ;;  %v1686_v9 = vrot.slane %v1685_v36, 2  ;;  %v1692_v7 = vadd.f32 %v1691_v8, %v1690_v14  ;;  %v1699_v19 = vadd.f32 %v1698_v45, %v1697_v23 }
  0xd6   :  { %v1654_v10 = vadd.f32 %v1653_v20, %v1652_v29  ;;  %v1661_v1 = vadd.f32 %v1660_v38, %v1659_v40  ;;  %v1668_v55 = vadd.f32 %v1667_v0, %v1666_v4  ;;  %v1675_v41 = vadd.f32 %v1674_v43, %v1673_v6 }
  0xd7   :  { %v1687_v57 = vadd.f32 %v1686_v9, %v1685_v36  ;;  %v1682_v3 = vadd.f32 %v1681_v15, %v1680_v17  ;;  %v1693_v47 = vrot.slane %v1692_v7, 2  ;;  %v1700_v42 = vrot.slane %v1699_v19, 2 }
  0xd8   :  { %v4344_v26 = vpack.c.bf16 %v1661_v1, %v1654_v10  ;;  %v4346_v22 = vpack.c.bf16 %v1675_v41, %v1668_v55  ;;  %v1704_v30 = vsel %vm1199_vm0, %v4236_v25, 0.0  ;;  %v1711_v44 = vsel %vm1199_vm0, %v4238_v12, 0.0 }
  0xd9   :  { %v1688_v46 = vrot.slane %v1687_v57, 1  ;;  %v1705_v31 = vrot.slane %v1704_v30, 4  ;;  %v1718_v35 = vsel %vm1199_vm0, %v4240_v13, 0.0  ;;  %v1725_v56 = vsel %vm1199_vm0, %v4242_v51, 0.0 }
  0xda   :  { %v3312_v60 = vunpack.c.l.b16 %v4344_v26  ;;  %v3313_v28 = vunpack.c.h.b16 %v4344_v26  ;;  %v3314_v50 = vunpack.c.l.b16 %v4346_v22  ;;  %v3315_v37 = vunpack.c.h.b16 %v4346_v22 }
  0xdb   :  { %v1689_v34 = vadd.f32 %v1688_v46, %v1687_v57  ;;  %v1694_v63 = vadd.f32 %v1693_v47, %v1692_v7  ;;  %v1701_v14 = vadd.f32 %v1700_v42, %v1699_v19  ;;  %v1712_v23 = vrot.slane %v1711_v44, 4 }
  0xdc   :  { %v1706_v29 = vadd.f32 %v1705_v31, %v1704_v30  ;;  %v1719_v40 = vrot.slane %v1718_v35, 4  ;;  %v1726_v4 = vrot.slane %v1725_v56, 4  ;;  %v1732_v25 = vsel %vm1199_vm0, %v4244_v32, 0.0 }
  0xdd   :  { %v1695_v6 = vrot.slane %v1694_v63, 1  ;;  %v1702_v17 = vrot.slane %v1701_v14, 1  ;;  %v1713_v36 = vadd.f32 %v1712_v23, %v1711_v44  ;;  %v1733_v12 = vrot.slane %v1732_v25, 4 }
  0xde   :  { %v1707_v8 = vrot.slane %v1706_v29, 2  ;;  %v1720_v45 = vadd.f32 %v1719_v40, %v1718_v35  ;;  %v1727_v13 = vadd.f32 %v1726_v4, %v1725_v56  ;;  %v1739_v51 = vsel %vm1199_vm0, %v4246_v39, 0.0 }
  0xdf   :  { %v1696_v20 = vadd.f32 %v1695_v6, %v1694_v63  ;;  %v1703_v38 = vadd.f32 %v1702_v17, %v1701_v14  ;;  %v1714_v0 = vrot.slane %v1713_v36, 2  ;;  %v1734_v43 = vadd.f32 %v1733_v12, %v1732_v25 }
  0xe0   :  { %v1708_v15 = vadd.f32 %v1707_v8, %v1706_v29  ;;  %v1721_v9 = vrot.slane %v1720_v45, 2  ;;  %v1728_v10 = vrot.slane %v1727_v13, 2  ;;  %v1740_v1 = vrot.slane %v1739_v51, 4 }
  0xe1   :  { %v1715_v55 = vadd.f32 %v1714_v0, %v1713_v36  ;;  %v1735_v32 = vrot.slane %v1734_v43, 2  ;;  %v1746_v41 = vsel %vm1199_vm0, %v4248_v33, 0.0  ;;  %v1753_v57 = vsel %vm1199_vm0, %v4250_v5, 0.0 }
  0xe2   :  { %v1709_v7 = vrot.slane %v1708_v15, 1  ;;  %v1722_v19 = vadd.f32 %v1721_v9, %v1720_v45  ;;  %v1729_v46 = vadd.f32 %v1728_v10, %v1727_v13  ;;  %v1741_v39 = vadd.f32 %v1740_v1, %v1739_v51  ;;  %v96_v10 = vld [vmem:[#allocation2 + $0x1a0] sm:$0xff] }
  0xe3   :  { %v1716_v47 = vrot.slane %v1715_v55, 1  ;;  %v1736_v42 = vadd.f32 %v1735_v32, %v1734_v43  ;;  %v1747_v30 = vrot.slane %v1746_v41, 4  ;;  %v1754_v31 = vrot.slane %v1753_v57, 4  ;;  %v224_v1 = vld [vmem:[#allocation5 + $0x1a0] sm:$0xff] }
  0xe4   :  { %v1710_v44 = vadd.f32 %v1709_v7, %v1708_v15  ;;  %v1723_v35 = vrot.slane %v1722_v19, 1  ;;  %v1730_v56 = vrot.slane %v1729_v46, 1  ;;  %v1742_v63 = vrot.slane %v1741_v39, 2 }
  0xe5   :  { %v1717_v14 = vadd.f32 %v1716_v47, %v1715_v55  ;;  %v1737_v23 = vrot.slane %v1736_v42, 1  ;;  %v1748_v29 = vadd.f32 %v1747_v30, %v1746_v41  ;;  %v1755_v40 = vadd.f32 %v1754_v31, %v1753_v57  ;;  %v4368_v55 = vld.sshfl [vmem:[#allocation1] sm:$0xff pattern:$0x75316420] }
  0xe6   :  { %v1724_v33 = vadd.f32 %v1723_v35, %v1722_v19  ;;  %v1731_v4 = vadd.f32 %v1730_v56, %v1729_v46  ;;  %v1743_v25 = vadd.f32 %v1742_v63, %v1741_v39  ;;  %v3026_v5 = vpack.c.bf16 %v1689_v34, %v1682_v3  ;;  %v4370_v34 = vld.sshfl [vmem:[#allocation1 + $0x8] sm:$0xff pattern:$0x75316420]  ;;  %v4372_v46 = vld.sshfl [vmem:[#allocation1 + $0x10] sm:$0xff pattern:$0x75316420] }
  0xe7   :  { %v1738_v6 = vadd.f32 %v1737_v23, %v1736_v42  ;;  %v1749_v17 = vrot.slane %v1748_v29, 2  ;;  %v1756_v36 = vrot.slane %v1755_v40, 2  ;;  %v3027_v12 = vpack.c.bf16 %v1703_v38, %v1696_v20  ;;  %v4374_v39 = vld.sshfl [vmem:[#allocation1 + $0x18] sm:$0xff pattern:$0x75316420]  ;;  %v225_v35 = vld [vmem:[#allocation5 + $0x1a8] sm:$0xff] }
  0xe8   :  { %v1744_v8 = vrot.slane %v1743_v25, 1  ;;  %v3028_v45 = vpack.c.bf16 %v1717_v14, %v1710_v44  ;;  %v3029_v13 = vpack.c.bf16 %v1731_v4, %v1724_v33  ;;  %v3316_v51 = vunpack.c.l.b16 %v3026_v5  ;;  %v97_v44 = vld [vmem:[#allocation2 + $0x1a8] sm:$0xff]  ;;  %v98_v56 = vld [vmem:[#allocation2 + $0x1b0] sm:$0xff]  ;;  %v99_v33 = vld [vmem:[#allocation2 + $0x1b8] sm:$0xff] }
  0xe9   :  { %v1750_v0 = vadd.f32 %v1749_v17, %v1748_v29  ;;  %v1757_v43 = vadd.f32 %v1756_v36, %v1755_v40  ;;  %v3317_v15 = vunpack.c.h.b16 %v3026_v5  ;;  %v3318_v9 = vunpack.c.l.b16 %v3027_v12  ;;  %v226_v40 = vld [vmem:[#allocation5 + $0x1b0] sm:$0xff]  ;;  %v227_v4 = vld [vmem:[#allocation5 + $0x1b8] sm:$0xff]  ;;  %v100_v36 = vld [vmem:[#allocation2 + $0x1c0] sm:$0xff] }
  0xea   :  { %v1745_v32 = vadd.f32 %v1744_v8, %v1743_v25  ;;  %v3319_v41 = vunpack.c.h.b16 %v3027_v12  ;;  %v3320_v57 = vunpack.c.l.b16 %v3028_v45  ;;  %v3321_v3 = vunpack.c.h.b16 %v3028_v45  ;;  %v228_v12 = vld [vmem:[#allocation5 + $0x1c0] sm:$0xff]  ;;  %v4396_v8 = vld.sshfl [vmem:[#allocation1 + $0x30] sm:$0xff pattern:$0x75316420] }
  0xeb   :  { %v1751_v7 = vrot.slane %v1750_v0, 1  ;;  %v1758_v20 = vrot.slane %v1757_v43, 1  ;;  %v3322_v38 = vunpack.c.l.b16 %v3029_v13  ;;  %v3323_v19 = vunpack.c.h.b16 %v3029_v13  ;;  %v4398_v45 = vld.sshfl [vmem:[#allocation1 + $0x38] sm:$0xff pattern:$0x75316420] }
  0xec   :  { %v3030_v47 = vpack.c.bf16 %v1745_v32, %v1738_v6  ;;  %v3567_v42 = vsel %vm3504_vm1, %v3314_v50, %v3312_v60  ;;  %v3574_v30 = vsel %vm3504_vm1, %v3315_v37, %v3313_v28  ;;  %v352_v31 = vmul.f32 %v224_v1, %v96_v10  ;;  %v4388_v60 = vld.sshfl [vmem:[#allocation1 + $0x20] sm:$0xff pattern:$0x75316420]  ;;  %v4392_v37 = vld.sshfl [vmem:[#allocation1 + $0x28] sm:$0xff pattern:$0x75316420] }
  0xed   :  { %v1752_v63 = vadd.f32 %v1751_v7, %v1750_v0  ;;  %v1759_v14 = vadd.f32 %v1758_v20, %v1757_v43  ;;  %v3568_v23 = vsel %vm3506_vm2, %v3316_v51, %v3567_v42  ;;  %v3575_v29 = vsel %vm3506_vm2, %v3317_v15, %v3574_v30  ;;  %v230_v42 = vld [vmem:[#allocation5 + $0x1d0] sm:$0xff] }
  0xee   :  { %v3324_v26 = vunpack.c.l.b16 %v3030_v47  ;;  %v3325_v50 = vunpack.c.h.b16 %v3030_v47  ;;  %v3569_v22 = vsel %vm3508_vm3, %v3318_v9, %v3568_v23  ;;  %v3576_v28 = vsel %vm3508_vm3, %v3319_v41, %v3575_v29  ;;  %715 = vst [vmem:[#allocation1] ss:$2 sm:$0xff] %v352_v31  ;;  %v101_v41 = vld [vmem:[#allocation2 + $0x1c8] sm:$0xff]  ;;  %v102_v47 = vld [vmem:[#allocation2 + $0x1d0] sm:$0xff]  ;;  %v231_v23 = vld [vmem:[#allocation5 + $0x1d8] sm:$0xff] }
  0xef   :  { %v3031_v25 = vpack.c.bf16 %v1759_v14, %v1752_v63  ;;  %v3570_v5 = vsel %vm3510_vm4, %v3320_v57, %v3569_v22  ;;  %v3577_v6 = vsel %vm3510_vm4, %v3321_v3, %v3576_v28  ;;  %v353_v17 = vmul.f32 %v225_v35, %v97_v44  ;;  %v229_v57 = vld [vmem:[#allocation5 + $0x1c8] sm:$0xff]  ;;  %v103_v14 = vld [vmem:[#allocation2 + $0x1d8] sm:$0xff] }
  0xf0   :  { %v3571_v13 = vsel %vm3512_vm5, %v3322_v38, %v3570_v5  ;;  %v3578_v51 = vsel %vm3512_vm5, %v3323_v19, %v3577_v6  ;;  %v354_v0 = vmul.f32 %v226_v40, %v98_v56  ;;  %v355_v43 = vmul.f32 %v227_v4, %v99_v33 }
  0xf1   :  { %v3326_v15 = vunpack.c.l.b16 %v3031_v25  ;;  %v3327_v9 = vunpack.c.h.b16 %v3031_v25  ;;  %v3572_v10 = vsel %vm3514_vm6, %v3324_v26, %v3571_v13  ;;  %v3579_v1 = vsel %vm3514_vm6, %v3325_v50, %v3578_v51  ;;  %718 = vst [vmem:[#allocation1 + $0x10] ss:$2 sm:$0xff] %v353_v17 }
  0xf2   :  { %721 = vst [vmem:[#allocation1 + $0x20] ss:$2 sm:$0xff] %v354_v0  ;;  %v356_v32 = vmul.f32 %v228_v12, %v100_v36  ;;  %v1760_v20 = vsel %vm1199_vm0, %v4282_v24, 0.0  ;;  %v1767_v38 = vsel %vm1199_vm0, %v4284_v62, 0.0  ;;  %v1774_v44 = vsel %vm1199_vm0, %v4286_v49, 0.0 }
  0xf3   :  { %v3573_v3 = vsel %vm3516_vm7, %v3326_v15, %v3572_v10  ;;  %v3580_v7 = vsel %vm3516_vm7, %v3327_v9, %v3579_v1  ;;  %724 = vst [vmem:[#allocation1 + $0x30] ss:$2 sm:$0xff] %v355_v43  ;;  %v1761_v30 = vrot.slane %v1760_v20, 4  ;;  %v1768_v31 = vrot.slane %v1767_v38, 4 }
  0xf4   :  { %v3739_v19 = vpack.c.b16 %v3580_v7, %v3573_v3  ;;  %v357_v63 = vmul.f32 %v229_v57, %v101_v41  ;;  %v1775_v40 = vrot.slane %v1774_v44, 4  ;;  %v1781_v62 = vsel %vm1199_vm0, %v4292_v2, 0.0 }
  0xf5   :  { %v4412_v35 = vld.sshfl [vmem:[#allocation1] sm:$0xff pattern:$0x75316420]  ;;  %v4414_v56 = vld.sshfl [vmem:[#allocation1 + $0x8] sm:$0xff pattern:$0x75316420]  ;;  %v1762_v24 = vadd.f32 %v1761_v30, %v1760_v20  ;;  %v1769_v29 = vadd.f32 %v1768_v31, %v1767_v38  ;;  %v358_v28 = vmul.f32 %v230_v42, %v102_v47  ;;  %v359_v6 = vmul.f32 %v231_v23, %v103_v14 }
  0xf6   :  { %3771 = vst [vmem:[#allocation7 + $0x20] sm:$0xff] %v3739_v19  ;;  %v1782_v33 = vrot.slane %v1781_v62, 4  ;;  %v1788_v4 = vsel %vm1199_vm0, %v4294_v59, 0.0  ;;  %v1795_v49 = vsel %vm1199_vm0, %v4296_v54, 0.0  ;;  %v1802_v26 = vsel %vm1199_vm0, %v4298_v48, 0.0 }
  0xf7   :  { %727 = vst [vmem:[#allocation1] ss:$2 sm:$0xff] %v356_v32  ;;  %v1776_v25 = vadd.f32 %v1775_v40, %v1774_v44  ;;  %v1763_v54 = vrot.slane %v1762_v24, 2  ;;  %v1770_v12 = vrot.slane %v1769_v29, 2  ;;  %v1789_v51 = vrot.slane %v1788_v4, 4 }
  0xf8   :  { %v4424_v50 = vld.sshfl [vmem:[#allocation1 + $0x10] sm:$0xff pattern:$0x75316420]  ;;  %v4426_v22 = vld.sshfl [vmem:[#allocation1 + $0x18] sm:$0xff pattern:$0x75316420]  ;;  %v1783_v17 = vadd.f32 %v1782_v33, %v1781_v62 }
  0xf9   :  { %v4428_v5 = vld.sshfl [vmem:[#allocation1 + $0x20] sm:$0xff pattern:$0x75316420]  ;;  %v4430_v2 = vld.sshfl [vmem:[#allocation1 + $0x28] sm:$0xff pattern:$0x75316420]  ;;  %v1764_v9 = vadd.f32 %v1763_v54, %v1762_v24  ;;  %v1771_v10 = vadd.f32 %v1770_v12, %v1769_v29  ;;  %v1790_v41 = vadd.f32 %v1789_v51, %v1788_v4 }
  0xfa   :  { %v4432_v36 = vld.sshfl [vmem:[#allocation1 + $0x30] sm:$0xff pattern:$0x75316420]  ;;  %v4434_v59 = vld.sshfl [vmem:[#allocation1 + $0x38] sm:$0xff pattern:$0x75316420] }
  0xfb   :  { %730 = vst [vmem:[#allocation1 + $0x10] ss:$2 sm:$0xff] %v357_v63  ;;  %v1777_v48 = vrot.slane %v1776_v25, 2  ;;  %v1784_v13 = vrot.slane %v1783_v17, 2  ;;  %v1796_v0 = vrot.slane %v1795_v49, 4  ;;  %v1803_v43 = vrot.slane %v1802_v26, 4 }
  0xfc   :  { %733 = vst [vmem:[#allocation1 + $0x20] ss:$2 sm:$0xff] %v358_v28  ;;  %v1809_v15 = vsel %vm1199_vm0, %v4302_v27, 0.0  ;;  %v1765_v7 = vrot.slane %v1764_v9, 1  ;;  %v1772_v20 = vrot.slane %v1771_v10, 1  ;;  %v1791_v47 = vrot.slane %v1790_v41, 2 }
  0xfd   :  { %736 = vst [vmem:[#allocation1 + $0x30] ss:$2 sm:$0xff] %v359_v6  ;;  %v1778_v1 = vadd.f32 %v1777_v48, %v1776_v25  ;;  %v1785_v32 = vadd.f32 %v1784_v13, %v1783_v17  ;;  %v1797_v57 = vadd.f32 %v1796_v0, %v1795_v49  ;;  %v1804_v3 = vadd.f32 %v1803_v43, %v1802_v26 }
  0xfe   :  { %v1810_v31 = vrot.slane %v1809_v15, 4  ;;  %v1766_v44 = vadd.f32 %v1765_v7, %v1764_v9  ;;  %v1773_v63 = vadd.f32 %v1772_v20, %v1771_v10  ;;  %v1792_v23 = vadd.f32 %v1791_v47, %v1790_v41 }
  0xff   :  { %v1779_v38 = vrot.slane %v1778_v1, 1  ;;  %v1786_v19 = vrot.slane %v1785_v32, 1  ;;  %v1798_v42 = vrot.slane %v1797_v57, 2  ;;  %v1805_v30 = vrot.slane %v1804_v3, 2 }
 0x100   :  { %v1811_v40 = vadd.f32 %v1810_v31, %v1809_v15  ;;  %v4438_v62 = vpack.c.bf16 %v1773_v63, %v1766_v44  ;;  %v1793_v4 = vrot.slane %v1792_v23, 1  ;;  %v1816_v25 = vsel %vm1199_vm0, %v4324_v52, 0.0 }
 0x101   :  { %v1780_v14 = vadd.f32 %v1779_v38, %v1778_v1  ;;  %v1787_v27 = vadd.f32 %v1786_v19, %v1785_v32  ;;  %v1799_v24 = vadd.f32 %v1798_v42, %v1797_v57  ;;  %v1806_v29 = vadd.f32 %v1805_v30, %v1804_v3 }
 0x102   :  { %v1812_v28 = vrot.slane %v1811_v40, 2  ;;  %v1823_v6 = vsel %vm1199_vm0, %v4326_v61, 0.0  ;;  %v1830_v17 = vsel %vm1199_vm0, %v4328_v18, 0.0  ;;  %v1837_v54 = vsel %vm1199_vm0, %v4330_v11, 0.0 }
 0x103   :  { %v4440_v33 = vpack.c.bf16 %v1787_v27, %v1780_v14  ;;  %v1800_v49 = vrot.slane %v1799_v24, 1  ;;  %v1807_v26 = vrot.slane %v1806_v29, 1  ;;  %v1794_v12 = vadd.f32 %v1793_v4, %v1792_v23 }
 0x104   :  { %v1813_v51 = vadd.f32 %v1812_v28, %v1811_v40  ;;  %v1817_v0 = vrot.slane %v1816_v25, 4  ;;  %v1824_v43 = vrot.slane %v1823_v6, 4  ;;  %v1831_v15 = vrot.slane %v1830_v17, 4 }
 0x105   :  { %v1801_v48 = vadd.f32 %v1800_v49, %v1799_v24  ;;  %v1808_v13 = vadd.f32 %v1807_v26, %v1806_v29  ;;  %v1838_v9 = vrot.slane %v1837_v54, 4  ;;  %v1844_v52 = vsel %vm1199_vm0, %v4332_v21, 0.0 }
 0x106   :  { %v1814_v10 = vrot.slane %v1813_v51, 1  ;;  %v1851_v61 = vsel %vm1199_vm0, %v4334_v53, 0.0  ;;  %v1858_v18 = vsel %vm1199_vm0, %v4336_v58, 0.0  ;;  %v1818_v1 = vadd.f32 %v1817_v0, %v1816_v25 }
 0x107   :  { %v1825_v11 = vadd.f32 %v1824_v43, %v1823_v6  ;;  %v1832_v32 = vadd.f32 %v1831_v15, %v1830_v17  ;;  %v1839_v41 = vadd.f32 %v1838_v9, %v1837_v54  ;;  %v1845_v3 = vrot.slane %v1844_v52, 4 }
 0x108   :  { %v1815_v57 = vadd.f32 %v1814_v10, %v1813_v51  ;;  %v1852_v7 = vrot.slane %v1851_v61, 4  ;;  %v1859_v20 = vrot.slane %v1858_v18, 4  ;;  %v1819_v38 = vrot.slane %v1818_v1, 2 }
 0x109   :  { %v1826_v19 = vrot.slane %v1825_v11, 2  ;;  %v1833_v47 = vrot.slane %v1832_v32, 2  ;;  %v1840_v42 = vrot.slane %v1839_v41, 2  ;;  %v1846_v30 = vadd.f32 %v1845_v3, %v1844_v52 }
 0x10a   :  { %v1853_v21 = vadd.f32 %v1852_v7, %v1851_v61  ;;  %v1860_v31 = vadd.f32 %v1859_v20, %v1858_v18  ;;  %v1865_v53 = vsel %vm1199_vm0, %v4338_v16, 0.0  ;;  %v1820_v44 = vadd.f32 %v1819_v38, %v1818_v1 }
 0x10b   :  { %v1827_v58 = vadd.f32 %v1826_v19, %v1825_v11  ;;  %v1834_v63 = vadd.f32 %v1833_v47, %v1832_v32  ;;  %v1841_v14 = vadd.f32 %v1840_v42, %v1839_v41  ;;  %v1847_v27 = vrot.slane %v1846_v30, 2  ;;  %v4462_v19 = vld.sshfl [vmem:[#allocation1] sm:$0xff pattern:$0x75316420] }
 0x10c   :  { %v1854_v23 = vrot.slane %v1853_v21, 2  ;;  %v1861_v24 = vrot.slane %v1860_v31, 2  ;;  %v1866_v29 = vrot.slane %v1865_v53, 4  ;;  %v1821_v40 = vrot.slane %v1820_v44, 1 }
 0x10d   :  { %v1828_v4 = vrot.slane %v1827_v58, 1  ;;  %v1835_v49 = vrot.slane %v1834_v63, 1  ;;  %v1842_v26 = vrot.slane %v1841_v14, 1  ;;  %v1848_v28 = vadd.f32 %v1847_v27, %v1846_v30  ;;  %v4464_v47 = vld.sshfl [vmem:[#allocation1 + $0x8] sm:$0xff pattern:$0x75316420] }
 0x10e   :  { %v1855_v25 = vadd.f32 %v1854_v23, %v1853_v21  ;;  %v1862_v6 = vadd.f32 %v1861_v24, %v1860_v31  ;;  %v1867_v17 = vadd.f32 %v1866_v29, %v1865_v53  ;;  %v1822_v54 = vadd.f32 %v1821_v40, %v1820_v44  ;;  %v232_v30 = vld [vmem:[#allocation5 + $0x1e0] sm:$0xff]  ;;  %v4466_v21 = vld.sshfl [vmem:[#allocation1 + $0x10] sm:$0xff pattern:$0x75316420]  ;;  %v234_v24 = vld [vmem:[#allocation5 + $0x1f0] sm:$0xff] }
 0x10f   :  { %v1829_v51 = vadd.f32 %v1828_v4, %v1827_v58  ;;  %v1836_v0 = vadd.f32 %v1835_v49, %v1834_v63  ;;  %v1843_v16 = vadd.f32 %v1842_v26, %v1841_v14  ;;  %v1849_v43 = vrot.slane %v1848_v28, 1  ;;  %v233_v58 = vld [vmem:[#allocation5 + $0x1e8] sm:$0xff]  ;;  %v106_v63 = vld [vmem:[#allocation2 + $0x1f0] sm:$0xff]  ;;  %v107_v29 = vld [vmem:[#allocation2 + $0x1f8] sm:$0xff] }
 0x110   :  { %v1856_v15 = vrot.slane %v1855_v25, 1  ;;  %v1863_v9 = vrot.slane %v1862_v6, 1  ;;  %v1868_v10 = vrot.slane %v1867_v17, 2  ;;  %v3034_v52 = vpack.c.bf16 %v1801_v48, %v1794_v12  ;;  %v235_v40 = vld [vmem:[#allocation5 + $0x1f8] sm:$0xff] }
 0x111   :  { %v3035_v61 = vpack.c.bf16 %v1815_v57, %v1808_v13  ;;  %v3036_v18 = vpack.c.bf16 %v1829_v51, %v1822_v54  ;;  %v1850_v1 = vadd.f32 %v1849_v43, %v1848_v28  ;;  %v3037_v41 = vpack.c.bf16 %v1843_v16, %v1836_v0  ;;  %v104_v57 = vld [vmem:[#allocation2 + $0x1e0] sm:$0xff]  ;;  %v4468_v4 = vld.sshfl [vmem:[#allocation1 + $0x18] sm:$0xff pattern:$0x75316420] }
 0x112   :  { %v1857_v11 = vadd.f32 %v1856_v15, %v1855_v25  ;;  %v1869_v32 = vadd.f32 %v1868_v10, %v1867_v17  ;;  %v3328_v3 = vunpack.c.l.b16 %v4438_v62  ;;  %v3329_v7 = vunpack.c.h.b16 %v4438_v62  ;;  %v105_v62 = vld [vmem:[#allocation2 + $0x1e8] sm:$0xff]  ;;  %v4470_v49 = vld.sshfl [vmem:[#allocation1 + $0x20] sm:$0xff pattern:$0x75316420] }
 0x113   :  { %v3330_v20 = vunpack.c.l.b16 %v4440_v33  ;;  %v3331_v38 = vunpack.c.h.b16 %v4440_v33  ;;  %v1864_v42 = vadd.f32 %v1863_v9, %v1862_v6  ;;  %v3332_v48 = vunpack.c.l.b16 %v3034_v52  ;;  %v4474_v17 = vld.sshfl [vmem:[#allocation1 + $0x28] sm:$0xff pattern:$0x75316420]  ;;  %v4476_v54 = vld.sshfl [vmem:[#allocation1 + $0x30] sm:$0xff pattern:$0x75316420] }
 0x114   :  { %v1870_v12 = vrot.slane %v1869_v32, 1  ;;  %v3333_v13 = vunpack.c.h.b16 %v3034_v52  ;;  %v3038_v31 = vpack.c.bf16 %v1857_v11, %v1850_v1  ;;  %v3334_v53 = vunpack.c.l.b16 %v3035_v61  ;;  %v4480_v15 = vld.sshfl [vmem:[#allocation1 + $0x38] sm:$0xff pattern:$0x75316420] }
 0x115   :  { %v3335_v44 = vunpack.c.h.b16 %v3035_v61  ;;  %v3336_v33 = vunpack.c.l.b16 %v3036_v18  ;;  %v3337_v27 = vunpack.c.h.b16 %v3036_v18  ;;  %v3338_v23 = vunpack.c.l.b16 %v3037_v41 }
 0x116   :  { %v1871_v14 = vadd.f32 %v1870_v12, %v1869_v32  ;;  %v3339_v26 = vunpack.c.h.b16 %v3037_v41  ;;  %v3581_v28 = vsel %vm3504_vm1, %v3330_v20, %v3328_v3  ;;  %v3588_v25 = vsel %vm3504_vm1, %v3331_v38, %v3329_v7 }
 0x117   :  { %v360_v6 = vmul.f32 %v232_v30, %v104_v57  ;;  %v3582_v0 = vsel %vm3506_vm2, %v3332_v48, %v3581_v28  ;;  %v3589_v16 = vsel %vm3506_vm2, %v3333_v13, %v3588_v25  ;;  %v361_v43 = vmul.f32 %v233_v58, %v105_v62  ;;  %v108_v13 = vld [vmem:[#allocation2 + $0x200] sm:$0xff]  ;;  %v109_v30 = vld [vmem:[#allocation2 + $0x208] sm:$0xff]  ;;  %v110_v58 = vld [vmem:[#allocation2 + $0x210] sm:$0xff] }
 0x118   :  { %v3039_v51 = vpack.c.bf16 %v1871_v14, %v1864_v42  ;;  %v3583_v9 = vsel %vm3508_vm3, %v3334_v53, %v3582_v0  ;;  %v3590_v10 = vsel %vm3508_vm3, %v3335_v44, %v3589_v16  ;;  %v362_v52 = vmul.f32 %v234_v24, %v106_v63  ;;  %v236_v57 = vld [vmem:[#allocation5 + $0x200] sm:$0xff]  ;;  %v237_v62 = vld [vmem:[#allocation5 + $0x208] sm:$0xff]  ;;  %v238_v63 = vld [vmem:[#allocation5 + $0x210] sm:$0xff] }
 0x119   :  { %739 = vst [vmem:[#allocation1] ss:$2 sm:$0xff] %v360_v6  ;;  %v363_v61 = vmul.f32 %v235_v40, %v107_v29  ;;  %v3340_v18 = vunpack.c.l.b16 %v3038_v31  ;;  %v3341_v1 = vunpack.c.h.b16 %v3038_v31  ;;  %v3584_v11 = vsel %vm3510_vm4, %v3336_v33, %v3583_v9  ;;  %v239_v24 = vld [vmem:[#allocation5 + $0x218] sm:$0xff] }
 0x11a   :  { %v3591_v32 = vsel %vm3510_vm4, %v3337_v27, %v3590_v10  ;;  %742 = vst [vmem:[#allocation1 + $0x10] ss:$2 sm:$0xff] %v361_v43  ;;  %v3342_v41 = vunpack.c.l.b16 %v3039_v51  ;;  %v3343_v3 = vunpack.c.h.b16 %v3039_v51  ;;  %v3585_v7 = vsel %vm3512_vm5, %v3338_v23, %v3584_v11  ;;  %v111_v23 = vld [vmem:[#allocation2 + $0x218] sm:$0xff] }
 0x11b   :  { %v3592_v20 = vsel %vm3512_vm5, %v3339_v26, %v3591_v32  ;;  %745 = vst [vmem:[#allocation1 + $0x20] ss:$2 sm:$0xff] %v362_v52  ;;  %v3586_v38 = vsel %vm3514_vm6, %v3340_v18, %v3585_v7  ;;  %v1872_v31 = vsel %vm1199_vm0, %v4368_v55, 0.0  ;;  %v1879_v53 = vsel %vm1199_vm0, %v4370_v34, 0.0 }
 0x11c   :  { %v3593_v42 = vsel %vm3514_vm6, %v3341_v1, %v3592_v20  ;;  %748 = vst [vmem:[#allocation1 + $0x30] ss:$2 sm:$0xff] %v363_v61  ;;  %v3587_v12 = vsel %vm3516_vm7, %v3342_v41, %v3586_v38  ;;  %v1873_v14 = vrot.slane %v1872_v31, 4  ;;  %v1880_v33 = vrot.slane %v1879_v53, 4 }
 0x11d   :  { %v3594_v48 = vsel %vm3516_vm7, %v3343_v3, %v3593_v42  ;;  %v1886_v27 = vsel %vm1199_vm0, %v4372_v46, 0.0  ;;  %v1893_v40 = vsel %vm1199_vm0, %v4374_v39, 0.0  ;;  %v1900_v55 = vsel %vm1199_vm0, %v4388_v60, 0.0 }
 0x11e   :  { %v3740_v44 = vpack.c.b16 %v3594_v48, %v3587_v12  ;;  %v1887_v29 = vrot.slane %v1886_v27, 4  ;;  %v1907_v34 = vsel %vm1199_vm0, %v4392_v37, 0.0  ;;  %v364_v28 = vmul.f32 %v236_v57, %v108_v13 }
 0x11f   :  { %v1874_v25 = vadd.f32 %v1873_v14, %v1872_v31  ;;  %v1894_v6 = vrot.slane %v1893_v40, 4  ;;  %v1901_v51 = vrot.slane %v1900_v55, 4  ;;  %v365_v16 = vmul.f32 %v237_v62, %v109_v30 }
 0x120   :  { %3772 = vst [vmem:[#allocation7 + $0x28] sm:$0xff] %v3740_v44  ;;  %v4504_v26 = vld.sshfl [vmem:[#allocation1] sm:$0xff pattern:$0x75316420]  ;;  %v1881_v43 = vadd.f32 %v1880_v33, %v1879_v53  ;;  %v1888_v39 = vadd.f32 %v1887_v29, %v1886_v27  ;;  %v366_v10 = vmul.f32 %v238_v63, %v110_v58  ;;  %v367_v1 = vmul.f32 %v239_v24, %v111_v23 }
 0x121   :  { %v4506_v46 = vld.sshfl [vmem:[#allocation1 + $0x8] sm:$0xff pattern:$0x75316420]  ;;  %v4508_v0 = vld.sshfl [vmem:[#allocation1 + $0x10] sm:$0xff pattern:$0x75316420]  ;;  %v1895_v37 = vadd.f32 %v1894_v6, %v1893_v40  ;;  %v1902_v52 = vadd.f32 %v1901_v51, %v1900_v55 }
 0x122   :  { %v4510_v9 = vld.sshfl [vmem:[#allocation1 + $0x18] sm:$0xff pattern:$0x75316420]  ;;  %v4512_v60 = vld.sshfl [vmem:[#allocation1 + $0x20] sm:$0xff pattern:$0x75316420] }
 0x123   :  { %v4514_v61 = vld.sshfl [vmem:[#allocation1 + $0x28] sm:$0xff pattern:$0x75316420]  ;;  %v4516_v18 = vld.sshfl [vmem:[#allocation1 + $0x30] sm:$0xff pattern:$0x75316420] }
 0x124   :  { %v4518_v11 = vld.sshfl [vmem:[#allocation1 + $0x38] sm:$0xff pattern:$0x75316420]  ;;  %751 = vst [vmem:[#allocation1] ss:$2 sm:$0xff] %v364_v28  ;;  %v1875_v32 = vrot.slane %v1874_v25, 2 }
 0x125   :  { %754 = vst [vmem:[#allocation1 + $0x10] ss:$2 sm:$0xff] %v365_v16  ;;  %v1882_v41 = vrot.slane %v1881_v43, 2  ;;  %v1889_v3 = vrot.slane %v1888_v39, 2  ;;  %v1896_v7 = vrot.slane %v1895_v37, 2  ;;  %v1903_v20 = vrot.slane %v1902_v52, 2 }
 0x126   :  { %757 = vst [vmem:[#allocation1 + $0x20] ss:$2 sm:$0xff] %v366_v10  ;;  %v1876_v38 = vadd.f32 %v1875_v32, %v1874_v25  ;;  %v1908_v42 = vrot.slane %v1907_v34, 4  ;;  %v1914_v12 = vsel %vm1199_vm0, %v4396_v8, 0.0  ;;  %v1921_v48 = vsel %vm1199_vm0, %v4398_v45, 0.0 }
 0x127   :  { %760 = vst [vmem:[#allocation1 + $0x30] ss:$2 sm:$0xff] %v367_v1  ;;  %v1883_v13 = vadd.f32 %v1882_v41, %v1881_v43  ;;  %v1890_v57 = vadd.f32 %v1889_v3, %v1888_v39  ;;  %v1897_v30 = vadd.f32 %v1896_v7, %v1895_v37  ;;  %v1904_v31 = vadd.f32 %v1903_v20, %v1902_v52 }
 0x128   :  { %v1877_v53 = vrot.slane %v1876_v38, 1  ;;  %v1909_v44 = vadd.f32 %v1908_v42, %v1907_v34  ;;  %v1915_v62 = vrot.slane %v1914_v12, 4  ;;  %v1922_v58 = vrot.slane %v1921_v48, 4 }
 0x129   :  { %v1884_v63 = vrot.slane %v1883_v13, 1  ;;  %v1891_v14 = vrot.slane %v1890_v57, 1  ;;  %v1898_v33 = vrot.slane %v1897_v30, 1  ;;  %v1905_v23 = vrot.slane %v1904_v31, 1 }
 0x12a   :  { %v1878_v27 = vadd.f32 %v1877_v53, %v1876_v38  ;;  %v1910_v24 = vrot.slane %v1909_v44, 2  ;;  %v1916_v29 = vadd.f32 %v1915_v62, %v1914_v12  ;;  %v1923_v45 = vadd.f32 %v1922_v58, %v1921_v48 }
 0x12b   :  { %v1885_v8 = vadd.f32 %v1884_v63, %v1883_v13  ;;  %v1892_v40 = vadd.f32 %v1891_v14, %v1890_v57  ;;  %v1899_v55 = vadd.f32 %v1898_v33, %v1897_v30  ;;  %v1906_v25 = vadd.f32 %v1905_v23, %v1904_v31 }
 0x12c   :  { %v1911_v28 = vadd.f32 %v1910_v24, %v1909_v44  ;;  %v1917_v16 = vrot.slane %v1916_v29, 2  ;;  %v1924_v43 = vrot.slane %v1923_v45, 2  ;;  %v1928_v39 = vsel %vm1199_vm0, %v4412_v35, 0.0 }
 0x12d   :  { %v4524_v6 = vpack.c.bf16 %v1885_v8, %v1878_v27  ;;  %v4526_v51 = vpack.c.bf16 %v1899_v55, %v1892_v40  ;;  %v1929_v10 = vrot.slane %v1928_v39, 4  ;;  %v1935_v37 = vsel %vm1199_vm0, %v4414_v56, 0.0 }
 0x12e   :  { %v1912_v34 = vrot.slane %v1911_v28, 1  ;;  %v1942_v52 = vsel %vm1199_vm0, %v4424_v50, 0.0  ;;  %v1949_v1 = vsel %vm1199_vm0, %v4426_v22, 0.0  ;;  %v1918_v41 = vadd.f32 %v1917_v16, %v1916_v29 }
 0x12f   :  { %v1925_v3 = vadd.f32 %v1924_v43, %v1923_v45  ;;  %v1936_v7 = vrot.slane %v1935_v37, 4  ;;  %v1930_v20 = vadd.f32 %v1929_v10, %v1928_v39  ;;  %v1943_v38 = vrot.slane %v1942_v52, 4 }
 0x130   :  { %v1913_v32 = vadd.f32 %v1912_v34, %v1911_v28  ;;  %v1950_v42 = vrot.slane %v1949_v1, 4  ;;  %v1956_v35 = vsel %vm1199_vm0, %v4428_v5, 0.0  ;;  %v1919_v12 = vrot.slane %v1918_v41, 1 }
 0x131   :  { %v1926_v48 = vrot.slane %v1925_v3, 1  ;;  %v1937_v13 = vadd.f32 %v1936_v7, %v1935_v37  ;;  %v1957_v56 = vrot.slane %v1956_v35, 4  ;;  %v1931_v57 = vrot.slane %v1930_v20, 2 }
 0x132   :  { %v1944_v30 = vadd.f32 %v1943_v38, %v1942_v52  ;;  %v1951_v50 = vadd.f32 %v1950_v42, %v1949_v1  ;;  %v1963_v22 = vsel %vm1199_vm0, %v4430_v2, 0.0  ;;  %v1920_v31 = vadd.f32 %v1919_v12, %v1918_v41 }
 0x133   :  { %v1927_v53 = vadd.f32 %v1926_v48, %v1925_v3  ;;  %v1938_v44 = vrot.slane %v1937_v13, 2  ;;  %v1958_v62 = vadd.f32 %v1957_v56, %v1956_v35  ;;  %v1932_v58 = vadd.f32 %v1931_v57, %v1930_v20 }
 0x134   :  { %v1945_v63 = vrot.slane %v1944_v30, 2  ;;  %v1952_v14 = vrot.slane %v1951_v50, 2  ;;  %v1964_v33 = vrot.slane %v1963_v22, 4  ;;  %v1970_v23 = vsel %vm1199_vm0, %v4432_v36, 0.0 }
 0x135   :  { %v1939_v27 = vadd.f32 %v1938_v44, %v1937_v13  ;;  %v1959_v5 = vrot.slane %v1958_v62, 2  ;;  %v1977_v24 = vsel %vm1199_vm0, %v4434_v59, 0.0  ;;  %v1933_v29 = vrot.slane %v1932_v58, 1 }
 0x136   :  { %v1946_v8 = vadd.f32 %v1945_v63, %v1944_v30  ;;  %v1953_v40 = vadd.f32 %v1952_v14, %v1951_v50  ;;  %v1965_v2 = vadd.f32 %v1964_v33, %v1963_v22  ;;  %v1971_v28 = vrot.slane %v1970_v23, 4  ;;  %v4550_v14 = vld.sshfl [vmem:[#allocation1 + $0x8] sm:$0xff pattern:$0x75316420] }
 0x137   :  { %v1940_v55 = vrot.slane %v1939_v27, 1  ;;  %v1960_v45 = vadd.f32 %v1959_v5, %v1958_v62  ;;  %v1978_v34 = vrot.slane %v1977_v24, 4  ;;  %v1934_v16 = vadd.f32 %v1933_v29, %v1932_v58  ;;  %v240_v29 = vld [vmem:[#allocation5 + $0x220] sm:$0xff] }
 0x138   :  { %v1947_v43 = vrot.slane %v1946_v8, 1  ;;  %v1954_v39 = vrot.slane %v1953_v40, 1  ;;  %v1966_v10 = vrot.slane %v1965_v2, 2  ;;  %v1972_v1 = vadd.f32 %v1971_v28, %v1970_v23  ;;  %v242_v28 = vld [vmem:[#allocation5 + $0x230] sm:$0xff] }
 0x139   :  { %v1941_v37 = vadd.f32 %v1940_v55, %v1939_v27  ;;  %v1961_v52 = vrot.slane %v1960_v45, 1  ;;  %v1979_v41 = vadd.f32 %v1978_v34, %v1977_v24  ;;  %v3042_v59 = vpack.c.bf16 %v1913_v32, %v1906_v25  ;;  %v112_v24 = vld [vmem:[#allocation2 + $0x220] sm:$0xff]  ;;  %v241_v55 = vld [vmem:[#allocation5 + $0x228] sm:$0xff] }
 0x13a   :  { %v1948_v36 = vadd.f32 %v1947_v43, %v1946_v8  ;;  %v1955_v3 = vadd.f32 %v1954_v39, %v1953_v40  ;;  %v1967_v7 = vadd.f32 %v1966_v10, %v1965_v2  ;;  %v1973_v20 = vrot.slane %v1972_v1, 2  ;;  %v113_v8 = vld [vmem:[#allocation2 + $0x228] sm:$0xff] }
 0x13b   :  { %v1980_v38 = vrot.slane %v1979_v41, 2  ;;  %v3043_v42 = vpack.c.bf16 %v1927_v53, %v1920_v31  ;;  %v1962_v35 = vadd.f32 %v1961_v52, %v1960_v45  ;;  %v3044_v48 = vpack.c.bf16 %v1941_v37, %v1934_v16  ;;  %v4548_v53 = vld.sshfl [vmem:[#allocation1] sm:$0xff pattern:$0x75316420]  ;;  %v114_v45 = vld [vmem:[#allocation2 + $0x230] sm:$0xff] }
 0x13c   :  { %v1968_v12 = vrot.slane %v1967_v7, 1  ;;  %v3045_v13 = vpack.c.bf16 %v1955_v3, %v1948_v36  ;;  %v1974_v56 = vadd.f32 %v1973_v20, %v1972_v1  ;;  %v3344_v30 = vunpack.c.l.b16 %v4524_v6  ;;  %v4553_v34 = vld.sshfl [vmem:[#allocation1 + $0x10] sm:$0xff pattern:$0x75316420] }
 0x13d   :  { %v1981_v57 = vadd.f32 %v1980_v38, %v1979_v41  ;;  %v3346_v50 = vunpack.c.l.b16 %v4526_v51  ;;  %v3345_v44 = vunpack.c.h.b16 %v4524_v6  ;;  %v3347_v62 = vunpack.c.h.b16 %v4526_v51  ;;  %v4555_v16 = vld.sshfl [vmem:[#allocation1 + $0x18] sm:$0xff pattern:$0x75316420]  ;;  %v4559_v52 = vld.sshfl [vmem:[#allocation1 + $0x20] sm:$0xff pattern:$0x75316420] }
 0x13e   :  { %v1969_v22 = vadd.f32 %v1968_v12, %v1967_v7  ;;  %v3348_v58 = vunpack.c.l.b16 %v3042_v59  ;;  %v1975_v25 = vrot.slane %v1974_v56, 1  ;;  %v3349_v63 = vunpack.c.h.b16 %v3042_v59  ;;  %v115_v7 = vld [vmem:[#allocation2 + $0x238] sm:$0xff]  ;;  %v4563_v20 = vld.sshfl [vmem:[#allocation1 + $0x28] sm:$0xff pattern:$0x75316420] }
 0x13f   :  { %v1982_v32 = vrot.slane %v1981_v57, 1  ;;  %v3350_v31 = vunpack.c.l.b16 %v3043_v42  ;;  %v3351_v27 = vunpack.c.h.b16 %v3043_v42  ;;  %v3352_v5 = vunpack.c.l.b16 %v3044_v48  ;;  %v243_v59 = vld [vmem:[#allocation5 + $0x238] sm:$0xff]  ;;  %v4565_v38 = vld.sshfl [vmem:[#allocation1 + $0x30] sm:$0xff pattern:$0x75316420] }
 0x140   :  { %v3046_v33 = vpack.c.bf16 %v1969_v22, %v1962_v35  ;;  %v3353_v23 = vunpack.c.h.b16 %v3044_v48  ;;  %v1976_v40 = vadd.f32 %v1975_v25, %v1974_v56  ;;  %v3354_v2 = vunpack.c.l.b16 %v3045_v13 }
 0x141   :  { %v1983_v6 = vadd.f32 %v1982_v32, %v1981_v57  ;;  %v3595_v51 = vsel %vm3504_vm1, %v3346_v50, %v3344_v30  ;;  %v3355_v43 = vunpack.c.h.b16 %v3045_v13  ;;  %v3602_v37 = vsel %vm3504_vm1, %v3347_v62, %v3345_v44  ;;  %v4569_v13 = vld.sshfl [vmem:[#allocation1 + $0x38] sm:$0xff pattern:$0x75316420] }
 0x142   :  { %v3356_v39 = vunpack.c.l.b16 %v3046_v33  ;;  %v3596_v10 = vsel %vm3506_vm2, %v3348_v58, %v3595_v51  ;;  %v3603_v36 = vsel %vm3506_vm2, %v3349_v63, %v3602_v37  ;;  %v368_v3 = vmul.f32 %v240_v29, %v112_v24  ;;  %v117_v24 = vld [vmem:[#allocation2 + $0x248] sm:$0xff]  ;;  %v246_v51 = vld [vmem:[#allocation5 + $0x250] sm:$0xff] }
 0x143   :  { %v3047_v1 = vpack.c.bf16 %v1983_v6, %v1976_v40  ;;  %v3597_v41 = vsel %vm3508_vm3, %v3350_v31, %v3596_v10  ;;  %v3604_v35 = vsel %vm3508_vm3, %v3351_v27, %v3603_v36  ;;  %v369_v12 = vmul.f32 %v241_v55, %v113_v8  ;;  %v245_v6 = vld [vmem:[#allocation5 + $0x248] sm:$0xff] }
 0x144   :  { %v3598_v42 = vsel %vm3510_vm4, %v3352_v5, %v3597_v41  ;;  %v370_v48 = vmul.f32 %v242_v28, %v114_v45  ;;  %v3357_v56 = vunpack.c.h.b16 %v3046_v33  ;;  %v3605_v50 = vsel %vm3510_vm4, %v3353_v23, %v3604_v35  ;;  %763 = vst [vmem:[#allocation1] ss:$2 sm:$0xff] %v368_v3  ;;  %v116_v5 = vld [vmem:[#allocation2 + $0x240] sm:$0xff]  ;;  %v247_v28 = vld [vmem:[#allocation5 + $0x258] sm:$0xff] }
 0x145   :  { %v3358_v57 = vunpack.c.l.b16 %v3047_v1  ;;  %v3599_v30 = vsel %vm3512_vm5, %v3354_v2, %v3598_v42  ;;  %v3359_v22 = vunpack.c.h.b16 %v3047_v1  ;;  %v3606_v62 = vsel %vm3512_vm5, %v3355_v43, %v3605_v50  ;;  %766 = vst [vmem:[#allocation1 + $0x10] ss:$2 sm:$0xff] %v369_v12  ;;  %v244_v23 = vld [vmem:[#allocation5 + $0x240] sm:$0xff]  ;;  %v118_v2 = vld [vmem:[#allocation2 + $0x250] sm:$0xff] }
 0x146   :  { %v3600_v44 = vsel %vm3514_vm6, %v3356_v39, %v3599_v30  ;;  %v371_v58 = vmul.f32 %v243_v59, %v115_v7  ;;  %v3607_v32 = vsel %vm3514_vm6, %v3357_v56, %v3606_v62  ;;  %769 = vst [vmem:[#allocation1 + $0x20] ss:$2 sm:$0xff] %v370_v48  ;;  %v1984_v31 = vsel %vm1199_vm0, %v4462_v19, 0.0 }
 0x147   :  { %v3601_v25 = vsel %vm3516_vm7, %v3358_v57, %v3600_v44  ;;  %v3608_v63 = vsel %vm3516_vm7, %v3359_v22, %v3607_v32  ;;  %v1991_v33 = vsel %vm1199_vm0, %v4464_v47, 0.0  ;;  %v1985_v29 = vrot.slane %v1984_v31, 4  ;;  %v119_v47 = vld [vmem:[#allocation2 + $0x258] sm:$0xff] }
 0x148   :  { %772 = vst [vmem:[#allocation1 + $0x30] ss:$2 sm:$0xff] %v371_v58  ;;  %v3741_v27 = vpack.c.b16 %v3608_v63, %v3601_v25  ;;  %v1992_v8 = vrot.slane %v1991_v33, 4  ;;  %v1998_v40 = vsel %vm1199_vm0, %v4466_v21, 0.0  ;;  %v2005_v45 = vsel %vm1199_vm0, %v4468_v4, 0.0 }
 0x149   :  { %v1999_v55 = vrot.slane %v1998_v40, 4  ;;  %v2012_v19 = vsel %vm1199_vm0, %v4470_v49, 0.0  ;;  %v2006_v43 = vrot.slane %v2005_v45, 4  ;;  %v2019_v10 = vsel %vm1199_vm0, %v4474_v17, 0.0 }
 0x14a   :  { %3773 = vst [vmem:[#allocation7 + $0x30] sm:$0xff] %v3741_v27  ;;  %v2013_v39 = vrot.slane %v2012_v19, 4  ;;  %v372_v1 = vmul.f32 %v244_v23, %v116_v5  ;;  %v1986_v41 = vadd.f32 %v1985_v29, %v1984_v31  ;;  %v1993_v36 = vadd.f32 %v1992_v8, %v1991_v33 }
 0x14b   :  { %v4590_v37 = vld.sshfl [vmem:[#allocation1] sm:$0xff pattern:$0x75316420]  ;;  %v4592_v21 = vld.sshfl [vmem:[#allocation1 + $0x8] sm:$0xff pattern:$0x75316420]  ;;  %v2000_v3 = vadd.f32 %v1999_v55, %v1998_v40  ;;  %v373_v49 = vmul.f32 %v245_v6, %v117_v24  ;;  %v2007_v59 = vadd.f32 %v2006_v43, %v2005_v45  ;;  %v374_v17 = vmul.f32 %v246_v51, %v118_v2 }
 0x14c   :  { %v4594_v4 = vld.sshfl [vmem:[#allocation1 + $0x10] sm:$0xff pattern:$0x75316420]  ;;  %v4596_v7 = vld.sshfl [vmem:[#allocation1 + $0x18] sm:$0xff pattern:$0x75316420]  ;;  %v2014_v42 = vadd.f32 %v2013_v39, %v2012_v19  ;;  %v375_v57 = vmul.f32 %v247_v28, %v119_v47 }
 0x14d   :  { %v4598_v35 = vld.sshfl [vmem:[#allocation1 + $0x20] sm:$0xff pattern:$0x75316420]  ;;  %v4600_v12 = vld.sshfl [vmem:[#allocation1 + $0x28] sm:$0xff pattern:$0x75316420] }
 0x14e   :  { %775 = vst [vmem:[#allocation1] ss:$2 sm:$0xff] %v372_v1  ;;  %v1987_v30 = vrot.slane %v1986_v41, 2  ;;  %v1994_v50 = vrot.slane %v1993_v36, 2  ;;  %v2001_v22 = vrot.slane %v2000_v3, 2  ;;  %v2008_v44 = vrot.slane %v2007_v59, 2 }
 0x14f   :  { %v4602_v48 = vld.sshfl [vmem:[#allocation1 + $0x30] sm:$0xff pattern:$0x75316420]  ;;  %v4604_v56 = vld.sshfl [vmem:[#allocation1 + $0x38] sm:$0xff pattern:$0x75316420] }
 0x150   :  { %778 = vst [vmem:[#allocation1 + $0x10] ss:$2 sm:$0xff] %v373_v49  ;;  %v2015_v62 = vrot.slane %v2014_v42, 2  ;;  %v2020_v58 = vrot.slane %v2019_v10, 4  ;;  %v2026_v25 = vsel %vm1199_vm0, %v4476_v54, 0.0  ;;  %v2033_v32 = vsel %vm1199_vm0, %v4480_v15, 0.0 }
 0x151   :  { %781 = vst [vmem:[#allocation1 + $0x20] ss:$2 sm:$0xff] %v374_v17  ;;  %v1988_v63 = vadd.f32 %v1987_v30, %v1986_v41  ;;  %v1995_v31 = vadd.f32 %v1994_v50, %v1993_v36  ;;  %v2002_v33 = vadd.f32 %v2001_v22, %v2000_v3  ;;  %v2009_v27 = vadd.f32 %v2008_v44, %v2007_v59 }
 0x152   :  { %784 = vst [vmem:[#allocation1 + $0x30] ss:$2 sm:$0xff] %v375_v57  ;;  %v2016_v5 = vadd.f32 %v2015_v62, %v2014_v42  ;;  %v2021_v23 = vadd.f32 %v2020_v58, %v2019_v10  ;;  %v2027_v24 = vrot.slane %v2026_v25, 4  ;;  %v2034_v29 = vrot.slane %v2033_v32, 4 }
 0x153   :  { %v1989_v8 = vrot.slane %v1988_v63, 1  ;;  %v1996_v40 = vrot.slane %v1995_v31, 1  ;;  %v2003_v6 = vrot.slane %v2002_v33, 1  ;;  %v2010_v2 = vrot.slane %v2009_v27, 1 }
 0x154   :  { %v2017_v51 = vrot.slane %v2016_v5, 1  ;;  %v2022_v55 = vrot.slane %v2021_v23, 2  ;;  %v2028_v28 = vadd.f32 %v2027_v24, %v2026_v25  ;;  %v2035_v43 = vadd.f32 %v2034_v29, %v2033_v32 }
 0x155   :  { %v1990_v54 = vadd.f32 %v1989_v8, %v1988_v63  ;;  %v1997_v45 = vadd.f32 %v1996_v40, %v1995_v31  ;;  %v2004_v19 = vadd.f32 %v2003_v6, %v2002_v33  ;;  %v2011_v15 = vadd.f32 %v2010_v2, %v2009_v27 }
 0x156   :  { %v2023_v47 = vadd.f32 %v2022_v55, %v2021_v23  ;;  %v2018_v10 = vadd.f32 %v2017_v51, %v2016_v5  ;;  %v2029_v42 = vrot.slane %v2028_v28, 2  ;;  %v2036_v17 = vrot.slane %v2035_v43, 2 }
 0x157   :  { %v4610_v39 = vpack.c.bf16 %v1997_v45, %v1990_v54  ;;  %v4612_v1 = vpack.c.bf16 %v2011_v15, %v2004_v19  ;;  %v2040_v57 = vsel %vm1199_vm0, %v4504_v26, 0.0  ;;  %v2047_v50 = vsel %vm1199_vm0, %v4506_v46, 0.0 }
 0x158   :  { %v2024_v59 = vrot.slane %v2023_v47, 1  ;;  %v2041_v30 = vrot.slane %v2040_v57, 4  ;;  %v2054_v22 = vsel %vm1199_vm0, %v4508_v0, 0.0  ;;  %v2061_v44 = vsel %vm1199_vm0, %v4510_v9, 0.0 }
 0x159   :  { %v3360_v41 = vunpack.c.l.b16 %v4610_v39  ;;  %v3361_v36 = vunpack.c.h.b16 %v4610_v39  ;;  %v3362_v3 = vunpack.c.l.b16 %v4612_v1  ;;  %v3363_v49 = vunpack.c.h.b16 %v4612_v1 }
 0x15a   :  { %v2025_v62 = vadd.f32 %v2024_v59, %v2023_v47  ;;  %v2030_v58 = vadd.f32 %v2029_v42, %v2028_v28  ;;  %v2037_v25 = vadd.f32 %v2036_v17, %v2035_v43  ;;  %v2048_v32 = vrot.slane %v2047_v50, 4 }
 0x15b   :  { %v2042_v63 = vadd.f32 %v2041_v30, %v2040_v57  ;;  %v2055_v31 = vrot.slane %v2054_v22, 4  ;;  %v2062_v33 = vrot.slane %v2061_v44, 4  ;;  %v2068_v26 = vsel %vm1199_vm0, %v4512_v60, 0.0 }
 0x15c   :  { %v2031_v27 = vrot.slane %v2030_v58, 1  ;;  %v2038_v5 = vrot.slane %v2037_v25, 1  ;;  %v2049_v23 = vadd.f32 %v2048_v32, %v2047_v50  ;;  %v2069_v46 = vrot.slane %v2068_v26, 4 }
 0x15d   :  { %v2043_v24 = vrot.slane %v2042_v63, 2  ;;  %v2056_v29 = vadd.f32 %v2055_v31, %v2054_v22  ;;  %v2063_v0 = vadd.f32 %v2062_v33, %v2061_v44  ;;  %v2075_v9 = vsel %vm1199_vm0, %v4514_v61, 0.0 }
 0x15e   :  { %v2032_v8 = vadd.f32 %v2031_v27, %v2030_v58  ;;  %v2039_v40 = vadd.f32 %v2038_v5, %v2037_v25  ;;  %v2050_v6 = vrot.slane %v2049_v23, 2  ;;  %v2070_v2 = vadd.f32 %v2069_v46, %v2068_v26 }
 0x15f   :  { %v2044_v51 = vadd.f32 %v2043_v24, %v2042_v63  ;;  %v2057_v55 = vrot.slane %v2056_v29, 2  ;;  %v2064_v54 = vrot.slane %v2063_v0, 2  ;;  %v2076_v45 = vrot.slane %v2075_v9, 4 }
 0x160   :  { %v2051_v19 = vadd.f32 %v2050_v6, %v2049_v23  ;;  %v2071_v60 = vrot.slane %v2070_v2, 2  ;;  %v2082_v15 = vsel %vm1199_vm0, %v4516_v18, 0.0  ;;  %v2089_v47 = vsel %vm1199_vm0, %v4518_v11, 0.0 }
 0x161   :  { %v2045_v28 = vrot.slane %v2044_v51, 1  ;;  %v2058_v43 = vadd.f32 %v2057_v55, %v2056_v29  ;;  %v2065_v59 = vadd.f32 %v2064_v54, %v2063_v0  ;;  %v2077_v61 = vadd.f32 %v2076_v45, %v2075_v9  ;;  %v120_v54 = vld [vmem:[#allocation2 + $0x260] sm:$0xff] }
 0x162   :  { %v2052_v42 = vrot.slane %v2051_v19, 1  ;;  %v2072_v17 = vadd.f32 %v2071_v60, %v2070_v2  ;;  %v2083_v57 = vrot.slane %v2082_v15, 4  ;;  %v2090_v30 = vrot.slane %v2089_v47, 4  ;;  %v248_v45 = vld [vmem:[#allocation5 + $0x260] sm:$0xff] }
 0x163   :  { %v2046_v50 = vadd.f32 %v2045_v28, %v2044_v51  ;;  %v2059_v22 = vrot.slane %v2058_v43, 1  ;;  %v2066_v44 = vrot.slane %v2065_v59, 1  ;;  %v2078_v58 = vrot.slane %v2077_v61, 2 }
 0x164   :  { %v2053_v25 = vadd.f32 %v2052_v42, %v2051_v19  ;;  %v2073_v32 = vrot.slane %v2072_v17, 1  ;;  %v2084_v63 = vadd.f32 %v2083_v57, %v2082_v15  ;;  %v2091_v31 = vadd.f32 %v2090_v30, %v2089_v47  ;;  %v4634_v19 = vld.sshfl [vmem:[#allocation1] sm:$0xff pattern:$0x75316420] }
 0x165   :  { %v2060_v18 = vadd.f32 %v2059_v22, %v2058_v43  ;;  %v2067_v33 = vadd.f32 %v2066_v44, %v2065_v59  ;;  %v2079_v26 = vadd.f32 %v2078_v58, %v2077_v61  ;;  %v3050_v11 = vpack.c.bf16 %v2025_v62, %v2018_v10  ;;  %v4636_v62 = vld.sshfl [vmem:[#allocation1 + $0x8] sm:$0xff pattern:$0x75316420]  ;;  %v4638_v59 = vld.sshfl [vmem:[#allocation1 + $0x10] sm:$0xff pattern:$0x75316420] }
 0x166   :  { %v2074_v27 = vadd.f32 %v2073_v32, %v2072_v17  ;;  %v2085_v5 = vrot.slane %v2084_v63, 2  ;;  %v2092_v23 = vrot.slane %v2091_v31, 2  ;;  %v3051_v46 = vpack.c.bf16 %v2039_v40, %v2032_v8  ;;  %v4640_v61 = vld.sshfl [vmem:[#allocation1 + $0x18] sm:$0xff pattern:$0x75316420]  ;;  %v249_v22 = vld [vmem:[#allocation5 + $0x268] sm:$0xff] }
 0x167   :  { %v2080_v24 = vrot.slane %v2079_v26, 1  ;;  %v3052_v29 = vpack.c.bf16 %v2053_v25, %v2046_v50  ;;  %v3053_v0 = vpack.c.bf16 %v2067_v33, %v2060_v18  ;;  %v3364_v9 = vunpack.c.l.b16 %v3050_v11  ;;  %v121_v50 = vld [vmem:[#allocation2 + $0x268] sm:$0xff]  ;;  %v122_v44 = vld [vmem:[#allocation2 + $0x270] sm:$0xff]  ;;  %v123_v18 = vld [vmem:[#allocation2 + $0x278] sm:$0xff] }
 0x168   :  { %v2086_v6 = vadd.f32 %v2085_v5, %v2084_v63  ;;  %v2093_v2 = vadd.f32 %v2092_v23, %v2091_v31  ;;  %v3365_v51 = vunpack.c.h.b16 %v3050_v11  ;;  %v3366_v55 = vunpack.c.l.b16 %v3051_v46  ;;  %v250_v31 = vld [vmem:[#allocation5 + $0x270] sm:$0xff]  ;;  %v251_v33 = vld [vmem:[#allocation5 + $0x278] sm:$0xff]  ;;  %v124_v23 = vld [vmem:[#allocation2 + $0x280] sm:$0xff] }
 0x169   :  { %v2081_v60 = vadd.f32 %v2080_v24, %v2079_v26  ;;  %v3367_v15 = vunpack.c.h.b16 %v3051_v46  ;;  %v3368_v47 = vunpack.c.l.b16 %v3052_v29  ;;  %v3369_v10 = vunpack.c.h.b16 %v3052_v29  ;;  %v252_v46 = vld [vmem:[#allocation5 + $0x280] sm:$0xff]  ;;  %v4662_v24 = vld.sshfl [vmem:[#allocation1 + $0x30] sm:$0xff pattern:$0x75316420] }
 0x16a   :  { %v2087_v28 = vrot.slane %v2086_v6, 1  ;;  %v2094_v8 = vrot.slane %v2093_v2, 1  ;;  %v3370_v40 = vunpack.c.l.b16 %v3053_v0  ;;  %v3371_v43 = vunpack.c.h.b16 %v3053_v0  ;;  %v4664_v29 = vld.sshfl [vmem:[#allocation1 + $0x38] sm:$0xff pattern:$0x75316420] }
 0x16b   :  { %v3054_v42 = vpack.c.bf16 %v2081_v60, %v2074_v27  ;;  %v3609_v17 = vsel %vm3504_vm1, %v3362_v3, %v3360_v41  ;;  %v3616_v57 = vsel %vm3504_vm1, %v3363_v49, %v3361_v36  ;;  %v376_v30 = vmul.f32 %v248_v45, %v120_v54  ;;  %v4654_v41 = vld.sshfl [vmem:[#allocation1 + $0x20] sm:$0xff pattern:$0x75316420]  ;;  %v4658_v49 = vld.sshfl [vmem:[#allocation1 + $0x28] sm:$0xff pattern:$0x75316420] }
 0x16c   :  { %v2088_v58 = vadd.f32 %v2087_v28, %v2086_v6  ;;  %v2095_v25 = vadd.f32 %v2094_v8, %v2093_v2  ;;  %v3610_v32 = vsel %vm3506_vm2, %v3364_v9, %v3609_v17  ;;  %v3617_v63 = vsel %vm3506_vm2, %v3365_v51, %v3616_v57  ;;  %v254_v17 = vld [vmem:[#allocation5 + $0x290] sm:$0xff] }
 0x16d   :  { %v3372_v39 = vunpack.c.l.b16 %v3054_v42  ;;  %v3373_v3 = vunpack.c.h.b16 %v3054_v42  ;;  %v3611_v1 = vsel %vm3508_vm3, %v3366_v55, %v3610_v32  ;;  %v3618_v36 = vsel %vm3508_vm3, %v3367_v15, %v3617_v63  ;;  %787 = vst [vmem:[#allocation1] ss:$2 sm:$0xff] %v376_v30  ;;  %v125_v15 = vld [vmem:[#allocation2 + $0x288] sm:$0xff]  ;;  %v126_v42 = vld [vmem:[#allocation2 + $0x290] sm:$0xff]  ;;  %v255_v32 = vld [vmem:[#allocation5 + $0x298] sm:$0xff] }
 0x16e   :  { %v3055_v26 = vpack.c.bf16 %v2095_v25, %v2088_v58  ;;  %v3612_v11 = vsel %vm3510_vm4, %v3368_v47, %v3611_v1  ;;  %v3619_v27 = vsel %vm3510_vm4, %v3369_v10, %v3618_v36  ;;  %v377_v5 = vmul.f32 %v249_v22, %v121_v50  ;;  %v253_v47 = vld [vmem:[#allocation5 + $0x288] sm:$0xff]  ;;  %v127_v25 = vld [vmem:[#allocation2 + $0x298] sm:$0xff] }
 0x16f   :  { %v3613_v0 = vsel %vm3512_vm5, %v3370_v40, %v3612_v11  ;;  %v3620_v9 = vsel %vm3512_vm5, %v3371_v43, %v3619_v27  ;;  %v378_v6 = vmul.f32 %v250_v31, %v122_v44  ;;  %v379_v2 = vmul.f32 %v251_v33, %v123_v18 }
 0x170   :  { %v3374_v51 = vunpack.c.l.b16 %v3055_v26  ;;  %v3375_v55 = vunpack.c.h.b16 %v3055_v26  ;;  %v3614_v54 = vsel %vm3514_vm6, %v3372_v39, %v3613_v0  ;;  %v3621_v45 = vsel %vm3514_vm6, %v3373_v3, %v3620_v9  ;;  %790 = vst [vmem:[#allocation1 + $0x10] ss:$2 sm:$0xff] %v377_v5 }
 0x171   :  { %793 = vst [vmem:[#allocation1 + $0x20] ss:$2 sm:$0xff] %v378_v6  ;;  %v380_v60 = vmul.f32 %v252_v46, %v124_v23  ;;  %v2096_v8 = vsel %vm1199_vm0, %v4548_v53, 0.0  ;;  %v2103_v40 = vsel %vm1199_vm0, %v4550_v14, 0.0  ;;  %v2110_v50 = vsel %vm1199_vm0, %v4553_v34, 0.0 }
 0x172   :  { %v3615_v10 = vsel %vm3516_vm7, %v3374_v51, %v3614_v54  ;;  %v3622_v28 = vsel %vm3516_vm7, %v3375_v55, %v3621_v45  ;;  %796 = vst [vmem:[#allocation1 + $0x30] ss:$2 sm:$0xff] %v379_v2  ;;  %v2097_v57 = vrot.slane %v2096_v8, 4  ;;  %v2104_v30 = vrot.slane %v2103_v40, 4 }
 0x173   :  { %v3742_v43 = vpack.c.b16 %v3622_v28, %v3615_v10  ;;  %v381_v58 = vmul.f32 %v253_v47, %v125_v15  ;;  %v2111_v31 = vrot.slane %v2110_v50, 4  ;;  %v2117_v14 = vsel %vm1199_vm0, %v4555_v16, 0.0 }
 0x174   :  { %v4678_v22 = vld.sshfl [vmem:[#allocation1] sm:$0xff pattern:$0x75316420]  ;;  %v4680_v44 = vld.sshfl [vmem:[#allocation1 + $0x8] sm:$0xff pattern:$0x75316420]  ;;  %v2098_v53 = vadd.f32 %v2097_v57, %v2096_v8  ;;  %v2105_v63 = vadd.f32 %v2104_v30, %v2103_v40  ;;  %v382_v36 = vmul.f32 %v254_v17, %v126_v42  ;;  %v383_v27 = vmul.f32 %v255_v32, %v127_v25 }
 0x175   :  { %3774 = vst [vmem:[#allocation7 + $0x38] sm:$0xff] %v3742_v43  ;;  %v2118_v18 = vrot.slane %v2117_v14, 4  ;;  %v2124_v33 = vsel %vm1199_vm0, %v4559_v52, 0.0  ;;  %v2131_v34 = vsel %vm1199_vm0, %v4563_v20, 0.0  ;;  %v2138_v39 = vsel %vm1199_vm0, %v4565_v38, 0.0 }
 0x176   :  { %799 = vst [vmem:[#allocation1] ss:$2 sm:$0xff] %v380_v60  ;;  %v2112_v26 = vadd.f32 %v2111_v31, %v2110_v50  ;;  %v2099_v20 = vrot.slane %v2098_v53, 2  ;;  %v2106_v46 = vrot.slane %v2105_v63, 2  ;;  %v2125_v9 = vrot.slane %v2124_v33, 4 }
 0x177   :  { %v4690_v3 = vld.sshfl [vmem:[#allocation1 + $0x10] sm:$0xff pattern:$0x75316420]  ;;  %v4692_v1 = vld.sshfl [vmem:[#allocation1 + $0x18] sm:$0xff pattern:$0x75316420]  ;;  %v2119_v5 = vadd.f32 %v2118_v18, %v2117_v14 }
 0x178   :  { %v4694_v11 = vld.sshfl [vmem:[#allocation1 + $0x20] sm:$0xff pattern:$0x75316420]  ;;  %v4696_v16 = vld.sshfl [vmem:[#allocation1 + $0x28] sm:$0xff pattern:$0x75316420]  ;;  %v2100_v55 = vadd.f32 %v2099_v20, %v2098_v53  ;;  %v2107_v54 = vadd.f32 %v2106_v46, %v2105_v63  ;;  %v2126_v15 = vadd.f32 %v2125_v9, %v2124_v33 }
 0x179   :  { %v4698_v23 = vld.sshfl [vmem:[#allocation1 + $0x30] sm:$0xff pattern:$0x75316420]  ;;  %v4700_v52 = vld.sshfl [vmem:[#allocation1 + $0x38] sm:$0xff pattern:$0x75316420] }
 0x17a   :  { %802 = vst [vmem:[#allocation1 + $0x10] ss:$2 sm:$0xff] %v381_v58  ;;  %v2113_v38 = vrot.slane %v2112_v26, 2  ;;  %v2120_v0 = vrot.slane %v2119_v5, 2  ;;  %v2132_v6 = vrot.slane %v2131_v34, 4  ;;  %v2139_v2 = vrot.slane %v2138_v39, 4 }
 0x17b   :  { %805 = vst [vmem:[#allocation1 + $0x20] ss:$2 sm:$0xff] %v382_v36  ;;  %v2145_v51 = vsel %vm1199_vm0, %v4569_v13, 0.0  ;;  %v2101_v28 = vrot.slane %v2100_v55, 1  ;;  %v2108_v8 = vrot.slane %v2107_v54, 1  ;;  %v2127_v42 = vrot.slane %v2126_v15, 2 }
 0x17c   :  { %808 = vst [vmem:[#allocation1 + $0x30] ss:$2 sm:$0xff] %v383_v27  ;;  %v2114_v45 = vadd.f32 %v2113_v38, %v2112_v26  ;;  %v2121_v60 = vadd.f32 %v2120_v0, %v2119_v5  ;;  %v2133_v47 = vadd.f32 %v2132_v6, %v2131_v34  ;;  %v2140_v10 = vadd.f32 %v2139_v2, %v2138_v39 }
 0x17d   :  { %v2146_v30 = vrot.slane %v2145_v51, 4  ;;  %v2102_v50 = vadd.f32 %v2101_v28, %v2100_v55  ;;  %v2109_v58 = vadd.f32 %v2108_v8, %v2107_v54  ;;  %v2128_v32 = vadd.f32 %v2127_v42, %v2126_v15 }
 0x17e   :  { %v2115_v40 = vrot.slane %v2114_v45, 1  ;;  %v2122_v43 = vrot.slane %v2121_v60, 1  ;;  %v2134_v17 = vrot.slane %v2133_v47, 2  ;;  %v2141_v57 = vrot.slane %v2140_v10, 2 }
 0x17f   :  { %v2147_v31 = vadd.f32 %v2146_v30, %v2145_v51  ;;  %v4704_v14 = vpack.c.bf16 %v2109_v58, %v2102_v50  ;;  %v2129_v33 = vrot.slane %v2128_v32, 1  ;;  %v2152_v26 = vsel %vm1199_vm0, %v4590_v37, 0.0 }
 0x180   :  { %v2116_v25 = vadd.f32 %v2115_v40, %v2114_v45  ;;  %v2123_v13 = vadd.f32 %v2122_v43, %v2121_v60  ;;  %v2135_v53 = vadd.f32 %v2134_v17, %v2133_v47  ;;  %v2142_v63 = vadd.f32 %v2141_v57, %v2140_v10 }
 0x181   :  { %v2148_v36 = vrot.slane %v2147_v31, 2  ;;  %v2159_v27 = vsel %vm1199_vm0, %v4592_v21, 0.0  ;;  %v2166_v5 = vsel %vm1199_vm0, %v4594_v4, 0.0  ;;  %v2173_v20 = vsel %vm1199_vm0, %v4596_v7, 0.0 }
 0x182   :  { %v4706_v18 = vpack.c.bf16 %v2123_v13, %v2116_v25  ;;  %v2136_v34 = vrot.slane %v2135_v53, 1  ;;  %v2143_v39 = vrot.slane %v2142_v63, 1  ;;  %v2130_v46 = vadd.f32 %v2129_v33, %v2128_v32 }
 0x183   :  { %v2149_v9 = vadd.f32 %v2148_v36, %v2147_v31  ;;  %v2153_v6 = vrot.slane %v2152_v26, 4  ;;  %v2160_v2 = vrot.slane %v2159_v27, 4  ;;  %v2167_v51 = vrot.slane %v2166_v5, 4 }
 0x184   :  { %v2137_v38 = vadd.f32 %v2136_v34, %v2135_v53  ;;  %v2144_v0 = vadd.f32 %v2143_v39, %v2142_v63  ;;  %v2174_v55 = vrot.slane %v2173_v20, 4  ;;  %v2180_v37 = vsel %vm1199_vm0, %v4598_v35, 0.0 }
 0x185   :  { %v2150_v54 = vrot.slane %v2149_v9, 1  ;;  %v2187_v21 = vsel %vm1199_vm0, %v4600_v12, 0.0  ;;  %v2194_v4 = vsel %vm1199_vm0, %v4602_v48, 0.0  ;;  %v2154_v45 = vadd.f32 %v2153_v6, %v2152_v26 }
 0x186   :  { %v2161_v7 = vadd.f32 %v2160_v2, %v2159_v27  ;;  %v2168_v60 = vadd.f32 %v2167_v51, %v2166_v5  ;;  %v2175_v15 = vadd.f32 %v2174_v55, %v2173_v20  ;;  %v2181_v10 = vrot.slane %v2180_v37, 4 }
 0x187   :  { %v2151_v47 = vadd.f32 %v2150_v54, %v2149_v9  ;;  %v2188_v28 = vrot.slane %v2187_v21, 4  ;;  %v2195_v8 = vrot.slane %v2194_v4, 4  ;;  %v2155_v40 = vrot.slane %v2154_v45, 2 }
 0x188   :  { %v2162_v43 = vrot.slane %v2161_v7, 2  ;;  %v2169_v42 = vrot.slane %v2168_v60, 2  ;;  %v2176_v17 = vrot.slane %v2175_v15, 2  ;;  %v2182_v57 = vadd.f32 %v2181_v10, %v2180_v37 }
 0x189   :  { %v2189_v35 = vadd.f32 %v2188_v28, %v2187_v21  ;;  %v2196_v30 = vadd.f32 %v2195_v8, %v2194_v4  ;;  %v2201_v12 = vsel %vm1199_vm0, %v4604_v56, 0.0  ;;  %v2156_v50 = vadd.f32 %v2155_v40, %v2154_v45 }
 0x18a   :  { %v2163_v48 = vadd.f32 %v2162_v43, %v2161_v7  ;;  %v2170_v58 = vadd.f32 %v2169_v42, %v2168_v60  ;;  %v2177_v25 = vadd.f32 %v2176_v17, %v2175_v15  ;;  %v2183_v13 = vrot.slane %v2182_v57, 2  ;;  %v4728_v43 = vld.sshfl [vmem:[#allocation1] sm:$0xff pattern:$0x75316420] }
 0x18b   :  { %v2190_v32 = vrot.slane %v2189_v35, 2  ;;  %v2197_v53 = vrot.slane %v2196_v30, 2  ;;  %v2202_v63 = vrot.slane %v2201_v12, 4  ;;  %v2157_v31 = vrot.slane %v2156_v50, 1 }
 0x18c   :  { %v2164_v33 = vrot.slane %v2163_v48, 1  ;;  %v2171_v34 = vrot.slane %v2170_v58, 1  ;;  %v2178_v39 = vrot.slane %v2177_v25, 1  ;;  %v2184_v36 = vadd.f32 %v2183_v13, %v2182_v57  ;;  %v4730_v42 = vld.sshfl [vmem:[#allocation1 + $0x8] sm:$0xff pattern:$0x75316420] }
 0x18d   :  { %v2191_v26 = vadd.f32 %v2190_v32, %v2189_v35  ;;  %v2198_v27 = vadd.f32 %v2197_v53, %v2196_v30  ;;  %v2203_v5 = vadd.f32 %v2202_v63, %v2201_v12  ;;  %v2158_v20 = vadd.f32 %v2157_v31, %v2156_v50  ;;  %v256_v57 = vld [vmem:[#allocation5 + $0x2a0] sm:$0xff]  ;;  %v4732_v35 = vld.sshfl [vmem:[#allocation1 + $0x10] sm:$0xff pattern:$0x75316420]  ;;  %v258_v53 = vld [vmem:[#allocation5 + $0x2b0] sm:$0xff] }
 0x18e   :  { %v2165_v9 = vadd.f32 %v2164_v33, %v2163_v48  ;;  %v2172_v6 = vadd.f32 %v2171_v34, %v2170_v58  ;;  %v2179_v56 = vadd.f32 %v2178_v39, %v2177_v25  ;;  %v2185_v2 = vrot.slane %v2184_v36, 1  ;;  %v257_v48 = vld [vmem:[#allocation5 + $0x2a8] sm:$0xff]  ;;  %v130_v58 = vld [vmem:[#allocation2 + $0x2b0] sm:$0xff]  ;;  %v131_v63 = vld [vmem:[#allocation2 + $0x2b8] sm:$0xff] }
 0x18f   :  { %v2192_v51 = vrot.slane %v2191_v26, 1  ;;  %v2199_v55 = vrot.slane %v2198_v27, 1  ;;  %v2204_v54 = vrot.slane %v2203_v5, 2  ;;  %v3058_v37 = vpack.c.bf16 %v2137_v38, %v2130_v46  ;;  %v259_v31 = vld [vmem:[#allocation5 + $0x2b8] sm:$0xff] }
 0x190   :  { %v3059_v21 = vpack.c.bf16 %v2151_v47, %v2144_v0  ;;  %v3060_v4 = vpack.c.bf16 %v2165_v9, %v2158_v20  ;;  %v2186_v45 = vadd.f32 %v2185_v2, %v2184_v36  ;;  %v3061_v15 = vpack.c.bf16 %v2179_v56, %v2172_v6  ;;  %v128_v47 = vld [vmem:[#allocation2 + $0x2a0] sm:$0xff]  ;;  %v4734_v33 = vld.sshfl [vmem:[#allocation1 + $0x18] sm:$0xff pattern:$0x75316420] }
 0x191   :  { %v2193_v7 = vadd.f32 %v2192_v51, %v2191_v26  ;;  %v2205_v60 = vadd.f32 %v2204_v54, %v2203_v5  ;;  %v3376_v10 = vunpack.c.l.b16 %v4704_v14  ;;  %v3377_v28 = vunpack.c.h.b16 %v4704_v14  ;;  %v129_v14 = vld [vmem:[#allocation2 + $0x2a8] sm:$0xff]  ;;  %v4736_v34 = vld.sshfl [vmem:[#allocation1 + $0x20] sm:$0xff pattern:$0x75316420] }
 0x192   :  { %v3378_v8 = vunpack.c.l.b16 %v4706_v18  ;;  %v3379_v40 = vunpack.c.h.b16 %v4706_v18  ;;  %v2200_v17 = vadd.f32 %v2199_v55, %v2198_v27  ;;  %v3380_v38 = vunpack.c.l.b16 %v3058_v37  ;;  %v4740_v5 = vld.sshfl [vmem:[#allocation1 + $0x28] sm:$0xff pattern:$0x75316420]  ;;  %v4742_v20 = vld.sshfl [vmem:[#allocation1 + $0x30] sm:$0xff pattern:$0x75316420] }
 0x193   :  { %v2206_v46 = vrot.slane %v2205_v60, 1  ;;  %v3381_v0 = vunpack.c.h.b16 %v3058_v37  ;;  %v3062_v30 = vpack.c.bf16 %v2193_v7, %v2186_v45  ;;  %v3382_v12 = vunpack.c.l.b16 %v3059_v21  ;;  %v4746_v51 = vld.sshfl [vmem:[#allocation1 + $0x38] sm:$0xff pattern:$0x75316420] }
 0x194   :  { %v3383_v50 = vunpack.c.h.b16 %v3059_v21  ;;  %v3384_v18 = vunpack.c.l.b16 %v3060_v4  ;;  %v3385_v13 = vunpack.c.h.b16 %v3060_v4  ;;  %v3386_v32 = vunpack.c.l.b16 %v3061_v15 }
 0x195   :  { %v2207_v25 = vadd.f32 %v2206_v46, %v2205_v60  ;;  %v3387_v39 = vunpack.c.h.b16 %v3061_v15  ;;  %v3623_v36 = vsel %vm3504_vm1, %v3378_v8, %v3376_v10  ;;  %v3630_v26 = vsel %vm3504_vm1, %v3379_v40, %v3377_v28 }
 0x196   :  { %v384_v27 = vmul.f32 %v256_v57, %v128_v47  ;;  %v3624_v6 = vsel %vm3506_vm2, %v3380_v38, %v3623_v36  ;;  %v3631_v56 = vsel %vm3506_vm2, %v3381_v0, %v3630_v26  ;;  %v385_v2 = vmul.f32 %v257_v48, %v129_v14  ;;  %v132_v0 = vld [vmem:[#allocation2 + $0x2c0] sm:$0xff]  ;;  %v133_v57 = vld [vmem:[#allocation2 + $0x2c8] sm:$0xff]  ;;  %v134_v48 = vld [vmem:[#allocation2 + $0x2d0] sm:$0xff] }
 0x197   :  { %v3063_v9 = vpack.c.bf16 %v2207_v25, %v2200_v17  ;;  %v3625_v55 = vsel %vm3508_vm3, %v3382_v12, %v3624_v6  ;;  %v3632_v54 = vsel %vm3508_vm3, %v3383_v50, %v3631_v56  ;;  %v386_v37 = vmul.f32 %v258_v53, %v130_v58  ;;  %v260_v47 = vld [vmem:[#allocation5 + $0x2c0] sm:$0xff]  ;;  %v261_v14 = vld [vmem:[#allocation5 + $0x2c8] sm:$0xff]  ;;  %v262_v58 = vld [vmem:[#allocation5 + $0x2d0] sm:$0xff] }
 0x198   :  { %811 = vst [vmem:[#allocation1] ss:$2 sm:$0xff] %v384_v27  ;;  %v387_v21 = vmul.f32 %v259_v31, %v131_v63  ;;  %v3388_v4 = vunpack.c.l.b16 %v3062_v30  ;;  %v3389_v45 = vunpack.c.h.b16 %v3062_v30  ;;  %v3626_v7 = vsel %vm3510_vm4, %v3384_v18, %v3625_v55  ;;  %v263_v53 = vld [vmem:[#allocation5 + $0x2d8] sm:$0xff] }
 0x199   :  { %v3633_v60 = vsel %vm3510_vm4, %v3385_v13, %v3632_v54  ;;  %814 = vst [vmem:[#allocation1 + $0x10] ss:$2 sm:$0xff] %v385_v2  ;;  %v3390_v15 = vunpack.c.l.b16 %v3063_v9  ;;  %v3391_v10 = vunpack.c.h.b16 %v3063_v9  ;;  %v3627_v28 = vsel %vm3512_vm5, %v3386_v32, %v3626_v7  ;;  %v135_v32 = vld [vmem:[#allocation2 + $0x2d8] sm:$0xff] }
 0x19a   :  { %v3634_v8 = vsel %vm3512_vm5, %v3387_v39, %v3633_v60  ;;  %817 = vst [vmem:[#allocation1 + $0x20] ss:$2 sm:$0xff] %v386_v37  ;;  %v3628_v40 = vsel %vm3514_vm6, %v3388_v4, %v3627_v28  ;;  %v2208_v30 = vsel %vm1199_vm0, %v4634_v19, 0.0  ;;  %v2215_v12 = vsel %vm1199_vm0, %v4636_v62, 0.0 }
 0x19b   :  { %v3635_v17 = vsel %vm3514_vm6, %v3389_v45, %v3634_v8  ;;  %820 = vst [vmem:[#allocation1 + $0x30] ss:$2 sm:$0xff] %v387_v21  ;;  %v3629_v46 = vsel %vm3516_vm7, %v3390_v15, %v3628_v40  ;;  %v2209_v25 = vrot.slane %v2208_v30, 4  ;;  %v2216_v18 = vrot.slane %v2215_v12, 4 }
 0x19c   :  { %v3636_v38 = vsel %vm3516_vm7, %v3391_v10, %v3635_v17  ;;  %v2222_v13 = vsel %vm1199_vm0, %v4638_v59, 0.0  ;;  %v2229_v31 = vsel %vm1199_vm0, %v4640_v61, 0.0  ;;  %v2236_v19 = vsel %vm1199_vm0, %v4654_v41, 0.0 }
 0x19d   :  { %v3743_v50 = vpack.c.b16 %v3636_v38, %v3629_v46  ;;  %v2223_v63 = vrot.slane %v2222_v13, 4  ;;  %v2243_v62 = vsel %vm1199_vm0, %v4658_v49, 0.0  ;;  %v388_v36 = vmul.f32 %v260_v47, %v132_v0 }
 0x19e   :  { %v2210_v26 = vadd.f32 %v2209_v25, %v2208_v30  ;;  %v2230_v27 = vrot.slane %v2229_v31, 4  ;;  %v2237_v9 = vrot.slane %v2236_v19, 4  ;;  %v389_v56 = vmul.f32 %v261_v14, %v133_v57 }
 0x19f   :  { %3775 = vst [vmem:[#allocation7 + $0x40] sm:$0xff] %v3743_v50  ;;  %v4770_v39 = vld.sshfl [vmem:[#allocation1] sm:$0xff pattern:$0x75316420]  ;;  %v2217_v2 = vadd.f32 %v2216_v18, %v2215_v12  ;;  %v2224_v61 = vadd.f32 %v2223_v63, %v2222_v13  ;;  %v390_v54 = vmul.f32 %v262_v58, %v134_v48  ;;  %v391_v45 = vmul.f32 %v263_v53, %v135_v32 }
 0x1a0   :  { %v4772_v59 = vld.sshfl [vmem:[#allocation1 + $0x8] sm:$0xff pattern:$0x75316420]  ;;  %v4774_v6 = vld.sshfl [vmem:[#allocation1 + $0x10] sm:$0xff pattern:$0x75316420]  ;;  %v2231_v49 = vadd.f32 %v2230_v27, %v2229_v31  ;;  %v2238_v37 = vadd.f32 %v2237_v9, %v2236_v19 }
 0x1a1   :  { %v4776_v55 = vld.sshfl [vmem:[#allocation1 + $0x18] sm:$0xff pattern:$0x75316420]  ;;  %v4778_v41 = vld.sshfl [vmem:[#allocation1 + $0x20] sm:$0xff pattern:$0x75316420] }
 0x1a2   :  { %v4780_v21 = vld.sshfl [vmem:[#allocation1 + $0x28] sm:$0xff pattern:$0x75316420]  ;;  %v4782_v4 = vld.sshfl [vmem:[#allocation1 + $0x30] sm:$0xff pattern:$0x75316420] }
 0x1a3   :  { %v4784_v7 = vld.sshfl [vmem:[#allocation1 + $0x38] sm:$0xff pattern:$0x75316420]  ;;  %823 = vst [vmem:[#allocation1] ss:$2 sm:$0xff] %v388_v36  ;;  %v2211_v60 = vrot.slane %v2210_v26, 2 }
 0x1a4   :  { %826 = vst [vmem:[#allocation1 + $0x10] ss:$2 sm:$0xff] %v389_v56  ;;  %v2218_v15 = vrot.slane %v2217_v2, 2  ;;  %v2225_v10 = vrot.slane %v2224_v61, 2  ;;  %v2232_v28 = vrot.slane %v2231_v49, 2  ;;  %v2239_v8 = vrot.slane %v2238_v37, 2 }
 0x1a5   :  { %829 = vst [vmem:[#allocation1 + $0x20] ss:$2 sm:$0xff] %v390_v54  ;;  %v2212_v40 = vadd.f32 %v2211_v60, %v2210_v26  ;;  %v2244_v17 = vrot.slane %v2243_v62, 4  ;;  %v2250_v46 = vsel %vm1199_vm0, %v4662_v24, 0.0  ;;  %v2257_v38 = vsel %vm1199_vm0, %v4664_v29, 0.0 }
 0x1a6   :  { %832 = vst [vmem:[#allocation1 + $0x30] ss:$2 sm:$0xff] %v391_v45  ;;  %v2219_v0 = vadd.f32 %v2218_v15, %v2217_v2  ;;  %v2226_v47 = vadd.f32 %v2225_v10, %v2224_v61  ;;  %v2233_v57 = vadd.f32 %v2232_v28, %v2231_v49  ;;  %v2240_v30 = vadd.f32 %v2239_v8, %v2238_v37 }
 0x1a7   :  { %v2213_v12 = vrot.slane %v2212_v40, 1  ;;  %v2245_v50 = vadd.f32 %v2244_v17, %v2243_v62  ;;  %v2251_v14 = vrot.slane %v2250_v46, 4  ;;  %v2258_v48 = vrot.slane %v2257_v38, 4 }
 0x1a8   :  { %v2220_v58 = vrot.slane %v2219_v0, 1  ;;  %v2227_v25 = vrot.slane %v2226_v47, 1  ;;  %v2234_v18 = vrot.slane %v2233_v57, 1  ;;  %v2241_v32 = vrot.slane %v2240_v30, 1 }
 0x1a9   :  { %v2214_v13 = vadd.f32 %v2213_v12, %v2212_v40  ;;  %v2246_v53 = vrot.slane %v2245_v50, 2  ;;  %v2252_v63 = vadd.f32 %v2251_v14, %v2250_v46  ;;  %v2259_v29 = vadd.f32 %v2258_v48, %v2257_v38 }
 0x1aa   :  { %v2221_v24 = vadd.f32 %v2220_v58, %v2219_v0  ;;  %v2228_v31 = vadd.f32 %v2227_v25, %v2226_v47  ;;  %v2235_v19 = vadd.f32 %v2234_v18, %v2233_v57  ;;  %v2242_v26 = vadd.f32 %v2241_v32, %v2240_v30 }
 0x1ab   :  { %v2247_v36 = vadd.f32 %v2246_v53, %v2245_v50  ;;  %v2253_v56 = vrot.slane %v2252_v63, 2  ;;  %v2260_v2 = vrot.slane %v2259_v29, 2  ;;  %v2264_v61 = vsel %vm1199_vm0, %v4678_v22, 0.0 }
 0x1ac   :  { %v4790_v27 = vpack.c.bf16 %v2221_v24, %v2214_v13  ;;  %v4792_v9 = vpack.c.bf16 %v2235_v19, %v2228_v31  ;;  %v2265_v54 = vrot.slane %v2264_v61, 4  ;;  %v2271_v49 = vsel %vm1199_vm0, %v4680_v44, 0.0 }
 0x1ad   :  { %v2248_v62 = vrot.slane %v2247_v36, 1  ;;  %v2278_v37 = vsel %vm1199_vm0, %v4690_v3, 0.0  ;;  %v2285_v45 = vsel %vm1199_vm0, %v4692_v1, 0.0  ;;  %v2254_v15 = vadd.f32 %v2253_v56, %v2252_v63 }
 0x1ae   :  { %v2261_v10 = vadd.f32 %v2260_v2, %v2259_v29  ;;  %v2272_v28 = vrot.slane %v2271_v49, 4  ;;  %v2266_v8 = vadd.f32 %v2265_v54, %v2264_v61  ;;  %v2279_v40 = vrot.slane %v2278_v37, 4 }
 0x1af   :  { %v2249_v60 = vadd.f32 %v2248_v62, %v2247_v36  ;;  %v2286_v17 = vrot.slane %v2285_v45, 4  ;;  %v2292_v22 = vsel %vm1199_vm0, %v4694_v11, 0.0  ;;  %v2255_v46 = vrot.slane %v2254_v15, 1 }
 0x1b0   :  { %v2262_v38 = vrot.slane %v2261_v10, 1  ;;  %v2273_v0 = vadd.f32 %v2272_v28, %v2271_v49  ;;  %v2293_v44 = vrot.slane %v2292_v22, 4  ;;  %v2267_v47 = vrot.slane %v2266_v8, 2 }
 0x1b1   :  { %v2280_v57 = vadd.f32 %v2279_v40, %v2278_v37  ;;  %v2287_v3 = vadd.f32 %v2286_v17, %v2285_v45  ;;  %v2299_v1 = vsel %vm1199_vm0, %v4696_v16, 0.0  ;;  %v2256_v30 = vadd.f32 %v2255_v46, %v2254_v15 }
 0x1b2   :  { %v2263_v12 = vadd.f32 %v2262_v38, %v2261_v10  ;;  %v2274_v50 = vrot.slane %v2273_v0, 2  ;;  %v2294_v14 = vadd.f32 %v2293_v44, %v2292_v22  ;;  %v2268_v48 = vadd.f32 %v2267_v47, %v2266_v8 }
 0x1b3   :  { %v2281_v58 = vrot.slane %v2280_v57, 2  ;;  %v2288_v25 = vrot.slane %v2287_v3, 2  ;;  %v2300_v18 = vrot.slane %v2299_v1, 4  ;;  %v2306_v32 = vsel %vm1199_vm0, %v4698_v23, 0.0 }
 0x1b4   :  { %v2275_v13 = vadd.f32 %v2274_v50, %v2273_v0  ;;  %v2295_v11 = vrot.slane %v2294_v14, 2  ;;  %v2313_v53 = vsel %vm1199_vm0, %v4700_v52, 0.0  ;;  %v2269_v63 = vrot.slane %v2268_v48, 1 }
 0x1b5   :  { %v2282_v24 = vadd.f32 %v2281_v58, %v2280_v57  ;;  %v2289_v31 = vadd.f32 %v2288_v25, %v2287_v3  ;;  %v2301_v16 = vadd.f32 %v2300_v18, %v2299_v1  ;;  %v2307_v36 = vrot.slane %v2306_v32, 4  ;;  %v4816_v25 = vld.sshfl [vmem:[#allocation1 + $0x8] sm:$0xff pattern:$0x75316420] }
 0x1b6   :  { %v2276_v19 = vrot.slane %v2275_v13, 1  ;;  %v2296_v29 = vadd.f32 %v2295_v11, %v2294_v14  ;;  %v2314_v62 = vrot.slane %v2313_v53, 4  ;;  %v2270_v56 = vadd.f32 %v2269_v63, %v2268_v48  ;;  %v264_v63 = vld [vmem:[#allocation5 + $0x2e0] sm:$0xff] }
 0x1b7   :  { %v2283_v2 = vrot.slane %v2282_v24, 1  ;;  %v2290_v61 = vrot.slane %v2289_v31, 1  ;;  %v2302_v54 = vrot.slane %v2301_v16, 2  ;;  %v2308_v45 = vadd.f32 %v2307_v36, %v2306_v32  ;;  %v266_v36 = vld [vmem:[#allocation5 + $0x2f0] sm:$0xff] }
 0x1b8   :  { %v2277_v49 = vadd.f32 %v2276_v19, %v2275_v13  ;;  %v2297_v37 = vrot.slane %v2296_v29, 1  ;;  %v2315_v15 = vadd.f32 %v2314_v62, %v2313_v53  ;;  %v3066_v52 = vpack.c.bf16 %v2249_v60, %v2242_v26  ;;  %v136_v53 = vld [vmem:[#allocation2 + $0x2e0] sm:$0xff]  ;;  %v265_v19 = vld [vmem:[#allocation5 + $0x2e8] sm:$0xff] }
 0x1b9   :  { %v2284_v23 = vadd.f32 %v2283_v2, %v2282_v24  ;;  %v2291_v10 = vadd.f32 %v2290_v61, %v2289_v31  ;;  %v2303_v28 = vadd.f32 %v2302_v54, %v2301_v16  ;;  %v2309_v8 = vrot.slane %v2308_v45, 2  ;;  %v137_v24 = vld [vmem:[#allocation2 + $0x2e8] sm:$0xff] }
 0x1ba   :  { %v2316_v40 = vrot.slane %v2315_v15, 2  ;;  %v3067_v17 = vpack.c.bf16 %v2263_v12, %v2256_v30  ;;  %v2298_v22 = vadd.f32 %v2297_v37, %v2296_v29  ;;  %v3068_v38 = vpack.c.bf16 %v2277_v49, %v2270_v56  ;;  %v4814_v12 = vld.sshfl [vmem:[#allocation1] sm:$0xff pattern:$0x75316420]  ;;  %v138_v29 = vld [vmem:[#allocation2 + $0x2f0] sm:$0xff] }
 0x1bb   :  { %v2304_v46 = vrot.slane %v2303_v28, 1  ;;  %v3069_v0 = vpack.c.bf16 %v2291_v10, %v2284_v23  ;;  %v2310_v44 = vadd.f32 %v2309_v8, %v2308_v45  ;;  %v3392_v57 = vunpack.c.l.b16 %v4790_v27  ;;  %v4819_v62 = vld.sshfl [vmem:[#allocation1 + $0x10] sm:$0xff pattern:$0x75316420] }
 0x1bc   :  { %v2317_v47 = vadd.f32 %v2316_v40, %v2315_v15  ;;  %v3394_v3 = vunpack.c.l.b16 %v4792_v9  ;;  %v3393_v50 = vunpack.c.h.b16 %v4790_v27  ;;  %v3395_v14 = vunpack.c.h.b16 %v4792_v9  ;;  %v4821_v56 = vld.sshfl [vmem:[#allocation1 + $0x18] sm:$0xff pattern:$0x75316420]  ;;  %v4825_v37 = vld.sshfl [vmem:[#allocation1 + $0x20] sm:$0xff pattern:$0x75316420] }
 0x1bd   :  { %v2305_v1 = vadd.f32 %v2304_v46, %v2303_v28  ;;  %v3396_v48 = vunpack.c.l.b16 %v3066_v52  ;;  %v2311_v26 = vrot.slane %v2310_v44, 1  ;;  %v3397_v58 = vunpack.c.h.b16 %v3066_v52  ;;  %v139_v28 = vld [vmem:[#allocation2 + $0x2f8] sm:$0xff]  ;;  %v4829_v8 = vld.sshfl [vmem:[#allocation1 + $0x28] sm:$0xff pattern:$0x75316420] }
 0x1be   :  { %v2318_v60 = vrot.slane %v2317_v47, 1  ;;  %v3398_v30 = vunpack.c.l.b16 %v3067_v17  ;;  %v3399_v13 = vunpack.c.h.b16 %v3067_v17  ;;  %v3400_v11 = vunpack.c.l.b16 %v3068_v38  ;;  %v267_v52 = vld [vmem:[#allocation5 + $0x2f8] sm:$0xff]  ;;  %v4831_v40 = vld.sshfl [vmem:[#allocation1 + $0x30] sm:$0xff pattern:$0x75316420] }
 0x1bf   :  { %v3070_v18 = vpack.c.bf16 %v2305_v1, %v2298_v22  ;;  %v3401_v32 = vunpack.c.h.b16 %v3068_v38  ;;  %v2312_v31 = vadd.f32 %v2311_v26, %v2310_v44  ;;  %v3402_v16 = vunpack.c.l.b16 %v3069_v0 }
 0x1c0   :  { %v2319_v27 = vadd.f32 %v2318_v60, %v2317_v47  ;;  %v3637_v9 = vsel %vm3504_vm1, %v3394_v3, %v3392_v57  ;;  %v3403_v2 = vunpack.c.h.b16 %v3069_v0  ;;  %v3644_v49 = vsel %vm3504_vm1, %v3395_v14, %v3393_v50  ;;  %v4835_v0 = vld.sshfl [vmem:[#allocation1 + $0x38] sm:$0xff pattern:$0x75316420] }
 0x1c1   :  { %v3404_v61 = vunpack.c.l.b16 %v3070_v18  ;;  %v3638_v54 = vsel %vm3506_vm2, %v3396_v48, %v3637_v9  ;;  %v3645_v23 = vsel %vm3506_vm2, %v3397_v58, %v3644_v49  ;;  %v392_v10 = vmul.f32 %v264_v63, %v136_v53  ;;  %v141_v53 = vld [vmem:[#allocation2 + $0x308] sm:$0xff]  ;;  %v270_v9 = vld [vmem:[#allocation5 + $0x310] sm:$0xff] }
 0x1c2   :  { %v3071_v45 = vpack.c.bf16 %v2319_v27, %v2312_v31  ;;  %v3639_v15 = vsel %vm3508_vm3, %v3398_v30, %v3638_v54  ;;  %v3646_v22 = vsel %vm3508_vm3, %v3399_v13, %v3645_v23  ;;  %v393_v46 = vmul.f32 %v265_v19, %v137_v24  ;;  %v269_v27 = vld [vmem:[#allocation5 + $0x308] sm:$0xff] }
 0x1c3   :  { %v3640_v17 = vsel %vm3510_vm4, %v3400_v11, %v3639_v15  ;;  %v394_v38 = vmul.f32 %v266_v36, %v138_v29  ;;  %v3405_v44 = vunpack.c.h.b16 %v3070_v18  ;;  %v3647_v3 = vsel %vm3510_vm4, %v3401_v32, %v3646_v22  ;;  %835 = vst [vmem:[#allocation1] ss:$2 sm:$0xff] %v392_v10  ;;  %v140_v11 = vld [vmem:[#allocation2 + $0x300] sm:$0xff]  ;;  %v271_v36 = vld [vmem:[#allocation5 + $0x318] sm:$0xff] }
 0x1c4   :  { %v3406_v47 = vunpack.c.l.b16 %v3071_v45  ;;  %v3641_v57 = vsel %vm3512_vm5, %v3402_v16, %v3640_v17  ;;  %v3407_v1 = vunpack.c.h.b16 %v3071_v45  ;;  %v3648_v14 = vsel %vm3512_vm5, %v3403_v2, %v3647_v3  ;;  %838 = vst [vmem:[#allocation1 + $0x10] ss:$2 sm:$0xff] %v393_v46  ;;  %v268_v32 = vld [vmem:[#allocation5 + $0x300] sm:$0xff]  ;;  %v142_v16 = vld [vmem:[#allocation2 + $0x310] sm:$0xff] }
 0x1c5   :  { %v3642_v50 = vsel %vm3514_vm6, %v3404_v61, %v3641_v57  ;;  %v395_v48 = vmul.f32 %v267_v52, %v139_v28  ;;  %v3649_v60 = vsel %vm3514_vm6, %v3405_v44, %v3648_v14  ;;  %841 = vst [vmem:[#allocation1 + $0x20] ss:$2 sm:$0xff] %v394_v38  ;;  %v2320_v30 = vsel %vm1199_vm0, %v4728_v43, 0.0 }
 0x1c6   :  { %v3643_v26 = vsel %vm3516_vm7, %v3406_v47, %v3642_v50  ;;  %v3650_v58 = vsel %vm3516_vm7, %v3407_v1, %v3649_v60  ;;  %v2327_v18 = vsel %vm1199_vm0, %v4730_v42, 0.0  ;;  %v2321_v63 = vrot.slane %v2320_v30, 4  ;;  %v143_v42 = vld [vmem:[#allocation2 + $0x318] sm:$0xff] }
 0x1c7   :  { %844 = vst [vmem:[#allocation1 + $0x30] ss:$2 sm:$0xff] %v395_v48  ;;  %v3744_v13 = vpack.c.b16 %v3650_v58, %v3643_v26  ;;  %v2328_v24 = vrot.slane %v2327_v18, 4  ;;  %v2334_v31 = vsel %vm1199_vm0, %v4732_v35, 0.0  ;;  %v2341_v29 = vsel %vm1199_vm0, %v4734_v33, 0.0 }
 0x1c8   :  { %v2335_v19 = vrot.slane %v2334_v31, 4  ;;  %v2348_v43 = vsel %vm1199_vm0, %v4736_v34, 0.0  ;;  %v2342_v2 = vrot.slane %v2341_v29, 4  ;;  %v2355_v54 = vsel %vm1199_vm0, %v4740_v5, 0.0 }
 0x1c9   :  { %3776 = vst [vmem:[#allocation7 + $0x48] sm:$0xff] %v3744_v13  ;;  %v2349_v61 = vrot.slane %v2348_v43, 4  ;;  %v396_v45 = vmul.f32 %v268_v32, %v140_v11  ;;  %v2322_v15 = vadd.f32 %v2321_v63, %v2320_v30  ;;  %v2329_v23 = vadd.f32 %v2328_v24, %v2327_v18 }
 0x1ca   :  { %v4856_v49 = vld.sshfl [vmem:[#allocation1] sm:$0xff pattern:$0x75316420]  ;;  %v4858_v35 = vld.sshfl [vmem:[#allocation1 + $0x8] sm:$0xff pattern:$0x75316420]  ;;  %v2336_v10 = vadd.f32 %v2335_v19, %v2334_v31  ;;  %v397_v34 = vmul.f32 %v269_v27, %v141_v53  ;;  %v2343_v52 = vadd.f32 %v2342_v2, %v2341_v29  ;;  %v398_v5 = vmul.f32 %v270_v9, %v142_v16 }
 0x1cb   :  { %v4860_v33 = vld.sshfl [vmem:[#allocation1 + $0x10] sm:$0xff pattern:$0x75316420]  ;;  %v4862_v28 = vld.sshfl [vmem:[#allocation1 + $0x18] sm:$0xff pattern:$0x75316420]  ;;  %v2350_v17 = vadd.f32 %v2349_v61, %v2348_v43  ;;  %v399_v47 = vmul.f32 %v271_v36, %v143_v42 }
 0x1cc   :  { %v4864_v22 = vld.sshfl [vmem:[#allocation1 + $0x20] sm:$0xff pattern:$0x75316420]  ;;  %v4866_v46 = vld.sshfl [vmem:[#allocation1 + $0x28] sm:$0xff pattern:$0x75316420] }
 0x1cd   :  { %847 = vst [vmem:[#allocation1] ss:$2 sm:$0xff] %v396_v45  ;;  %v2323_v57 = vrot.slane %v2322_v15, 2  ;;  %v2330_v3 = vrot.slane %v2329_v23, 2  ;;  %v2337_v1 = vrot.slane %v2336_v10, 2  ;;  %v2344_v50 = vrot.slane %v2343_v52, 2 }
 0x1ce   :  { %v4868_v38 = vld.sshfl [vmem:[#allocation1 + $0x30] sm:$0xff pattern:$0x75316420]  ;;  %v4870_v44 = vld.sshfl [vmem:[#allocation1 + $0x38] sm:$0xff pattern:$0x75316420] }
 0x1cf   :  { %850 = vst [vmem:[#allocation1 + $0x10] ss:$2 sm:$0xff] %v397_v34  ;;  %v2351_v14 = vrot.slane %v2350_v17, 2  ;;  %v2356_v48 = vrot.slane %v2355_v54, 4  ;;  %v2362_v26 = vsel %vm1199_vm0, %v4742_v20, 0.0  ;;  %v2369_v60 = vsel %vm1199_vm0, %v4746_v51, 0.0 }
 0x1d0   :  { %853 = vst [vmem:[#allocation1 + $0x20] ss:$2 sm:$0xff] %v398_v5  ;;  %v2324_v58 = vadd.f32 %v2323_v57, %v2322_v15  ;;  %v2331_v30 = vadd.f32 %v2330_v3, %v2329_v23  ;;  %v2338_v18 = vadd.f32 %v2337_v1, %v2336_v10  ;;  %v2345_v13 = vadd.f32 %v2344_v50, %v2343_v52 }
 0x1d1   :  { %856 = vst [vmem:[#allocation1 + $0x30] ss:$2 sm:$0xff] %v399_v47  ;;  %v2352_v11 = vadd.f32 %v2351_v14, %v2350_v17  ;;  %v2357_v32 = vadd.f32 %v2356_v48, %v2355_v54  ;;  %v2363_v53 = vrot.slane %v2362_v26, 4  ;;  %v2370_v63 = vrot.slane %v2369_v60, 4 }
 0x1d2   :  { %v2325_v24 = vrot.slane %v2324_v58, 1  ;;  %v2332_v31 = vrot.slane %v2331_v30, 1  ;;  %v2339_v27 = vrot.slane %v2338_v18, 1  ;;  %v2346_v16 = vrot.slane %v2345_v13, 1 }
 0x1d3   :  { %v2353_v9 = vrot.slane %v2352_v11, 1  ;;  %v2358_v19 = vrot.slane %v2357_v32, 2  ;;  %v2364_v36 = vadd.f32 %v2363_v53, %v2362_v26  ;;  %v2371_v2 = vadd.f32 %v2370_v63, %v2369_v60 }
 0x1d4   :  { %v2326_v20 = vadd.f32 %v2325_v24, %v2324_v58  ;;  %v2333_v29 = vadd.f32 %v2332_v31, %v2331_v30  ;;  %v2340_v43 = vadd.f32 %v2339_v27, %v2338_v18  ;;  %v2347_v51 = vadd.f32 %v2346_v16, %v2345_v13 }
 0x1d5   :  { %v2359_v42 = vadd.f32 %v2358_v19, %v2357_v32  ;;  %v2354_v54 = vadd.f32 %v2353_v9, %v2352_v11  ;;  %v2365_v17 = vrot.slane %v2364_v36, 2  ;;  %v2372_v5 = vrot.slane %v2371_v2, 2 }
 0x1d6   :  { %v4876_v61 = vpack.c.bf16 %v2333_v29, %v2326_v20  ;;  %v4878_v45 = vpack.c.bf16 %v2347_v51, %v2340_v43  ;;  %v2376_v47 = vsel %vm1199_vm0, %v4770_v39, 0.0  ;;  %v2383_v3 = vsel %vm1199_vm0, %v4772_v59, 0.0 }
 0x1d7   :  { %v2360_v52 = vrot.slane %v2359_v42, 1  ;;  %v2377_v57 = vrot.slane %v2376_v47, 4  ;;  %v2390_v1 = vsel %vm1199_vm0, %v4774_v6, 0.0  ;;  %v2397_v50 = vsel %vm1199_vm0, %v4776_v55, 0.0 }
 0x1d8   :  { %v3408_v15 = vunpack.c.l.b16 %v4876_v61  ;;  %v3409_v23 = vunpack.c.h.b16 %v4876_v61  ;;  %v3410_v10 = vunpack.c.l.b16 %v4878_v45  ;;  %v3411_v34 = vunpack.c.h.b16 %v4878_v45 }
 0x1d9   :  { %v2361_v14 = vadd.f32 %v2360_v52, %v2359_v42  ;;  %v2366_v48 = vadd.f32 %v2365_v17, %v2364_v36  ;;  %v2373_v26 = vadd.f32 %v2372_v5, %v2371_v2  ;;  %v2384_v60 = vrot.slane %v2383_v3, 4 }
 0x1da   :  { %v2378_v58 = vadd.f32 %v2377_v57, %v2376_v47  ;;  %v2391_v30 = vrot.slane %v2390_v1, 4  ;;  %v2398_v18 = vrot.slane %v2397_v50, 4  ;;  %v2404_v39 = vsel %vm1199_vm0, %v4778_v41, 0.0 }
 0x1db   :  { %v2367_v13 = vrot.slane %v2366_v48, 1  ;;  %v2374_v11 = vrot.slane %v2373_v26, 1  ;;  %v2385_v32 = vadd.f32 %v2384_v60, %v2383_v3  ;;  %v2405_v59 = vrot.slane %v2404_v39, 4 }
 0x1dc   :  { %v2379_v53 = vrot.slane %v2378_v58, 2  ;;  %v2392_v63 = vadd.f32 %v2391_v30, %v2390_v1  ;;  %v2399_v6 = vadd.f32 %v2398_v18, %v2397_v50  ;;  %v2411_v55 = vsel %vm1199_vm0, %v4780_v21, 0.0 }
 0x1dd   :  { %v2368_v24 = vadd.f32 %v2367_v13, %v2366_v48  ;;  %v2375_v31 = vadd.f32 %v2374_v11, %v2373_v26  ;;  %v2386_v27 = vrot.slane %v2385_v32, 2  ;;  %v2406_v16 = vadd.f32 %v2405_v59, %v2404_v39 }
 0x1de   :  { %v2380_v9 = vadd.f32 %v2379_v53, %v2378_v58  ;;  %v2393_v19 = vrot.slane %v2392_v63, 2  ;;  %v2400_v20 = vrot.slane %v2399_v6, 2  ;;  %v2412_v29 = vrot.slane %v2411_v55, 4 }
 0x1df   :  { %v2387_v43 = vadd.f32 %v2386_v27, %v2385_v32  ;;  %v2407_v41 = vrot.slane %v2406_v16, 2  ;;  %v2418_v51 = vsel %vm1199_vm0, %v4782_v4, 0.0  ;;  %v2425_v42 = vsel %vm1199_vm0, %v4784_v7, 0.0 }
 0x1e0   :  { %v2381_v36 = vrot.slane %v2380_v9, 1  ;;  %v2394_v2 = vadd.f32 %v2393_v19, %v2392_v63  ;;  %v2401_v52 = vadd.f32 %v2400_v20, %v2399_v6  ;;  %v2413_v21 = vadd.f32 %v2412_v29, %v2411_v55  ;;  %v144_v20 = vld [vmem:[#allocation2 + $0x320] sm:$0xff] }
 0x1e1   :  { %v2388_v17 = vrot.slane %v2387_v43, 1  ;;  %v2408_v5 = vadd.f32 %v2407_v41, %v2406_v16  ;;  %v2419_v47 = vrot.slane %v2418_v51, 4  ;;  %v2426_v57 = vrot.slane %v2425_v42, 4  ;;  %v272_v29 = vld [vmem:[#allocation5 + $0x320] sm:$0xff] }
 0x1e2   :  { %v2382_v3 = vadd.f32 %v2381_v36, %v2380_v9  ;;  %v2395_v1 = vrot.slane %v2394_v2, 1  ;;  %v2402_v50 = vrot.slane %v2401_v52, 1  ;;  %v2414_v48 = vrot.slane %v2413_v21, 2 }
 0x1e3   :  { %v2389_v26 = vadd.f32 %v2388_v17, %v2387_v43  ;;  %v2409_v60 = vrot.slane %v2408_v5, 1  ;;  %v2420_v58 = vadd.f32 %v2419_v47, %v2418_v51  ;;  %v2427_v30 = vadd.f32 %v2426_v57, %v2425_v42  ;;  %v4900_v43 = vld.sshfl [vmem:[#allocation1] sm:$0xff pattern:$0x75316420] }
 0x1e4   :  { %v2396_v4 = vadd.f32 %v2395_v1, %v2394_v2  ;;  %v2403_v18 = vadd.f32 %v2402_v50, %v2401_v52  ;;  %v2415_v39 = vadd.f32 %v2414_v48, %v2413_v21  ;;  %v3074_v7 = vpack.c.bf16 %v2361_v14, %v2354_v54  ;;  %v4902_v14 = vld.sshfl [vmem:[#allocation1 + $0x8] sm:$0xff pattern:$0x75316420]  ;;  %v4904_v52 = vld.sshfl [vmem:[#allocation1 + $0x10] sm:$0xff pattern:$0x75316420] }
 0x1e5   :  { %v2410_v13 = vadd.f32 %v2409_v60, %v2408_v5  ;;  %v2421_v11 = vrot.slane %v2420_v58, 2  ;;  %v2428_v32 = vrot.slane %v2427_v30, 2  ;;  %v3075_v59 = vpack.c.bf16 %v2375_v31, %v2368_v24  ;;  %v4906_v21 = vld.sshfl [vmem:[#allocation1 + $0x18] sm:$0xff pattern:$0x75316420]  ;;  %v273_v1 = vld [vmem:[#allocation5 + $0x328] sm:$0xff] }
 0x1e6   :  { %v2416_v53 = vrot.slane %v2415_v39, 1  ;;  %v3076_v63 = vpack.c.bf16 %v2389_v26, %v2382_v3  ;;  %v3077_v6 = vpack.c.bf16 %v2403_v18, %v2396_v4  ;;  %v3412_v55 = vunpack.c.l.b16 %v3074_v7  ;;  %v145_v3 = vld [vmem:[#allocation2 + $0x328] sm:$0xff]  ;;  %v146_v50 = vld [vmem:[#allocation2 + $0x330] sm:$0xff]  ;;  %v147_v4 = vld [vmem:[#allocation2 + $0x338] sm:$0xff] }
 0x1e7   :  { %v2422_v27 = vadd.f32 %v2421_v11, %v2420_v58  ;;  %v2429_v16 = vadd.f32 %v2428_v32, %v2427_v30  ;;  %v3413_v9 = vunpack.c.h.b16 %v3074_v7  ;;  %v3414_v19 = vunpack.c.l.b16 %v3075_v59  ;;  %v274_v30 = vld [vmem:[#allocation5 + $0x330] sm:$0xff]  ;;  %v275_v18 = vld [vmem:[#allocation5 + $0x338] sm:$0xff]  ;;  %v148_v32 = vld [vmem:[#allocation2 + $0x340] sm:$0xff] }
 0x1e8   :  { %v2417_v41 = vadd.f32 %v2416_v53, %v2415_v39  ;;  %v3415_v51 = vunpack.c.h.b16 %v3075_v59  ;;  %v3416_v42 = vunpack.c.l.b16 %v3076_v63  ;;  %v3417_v54 = vunpack.c.h.b16 %v3076_v63  ;;  %v276_v59 = vld [vmem:[#allocation5 + $0x340] sm:$0xff]  ;;  %v4928_v53 = vld.sshfl [vmem:[#allocation1 + $0x30] sm:$0xff pattern:$0x75316420] }
 0x1e9   :  { %v2423_v36 = vrot.slane %v2422_v27, 1  ;;  %v2430_v24 = vrot.slane %v2429_v16, 1  ;;  %v3418_v31 = vunpack.c.l.b16 %v3077_v6  ;;  %v3419_v2 = vunpack.c.h.b16 %v3077_v6  ;;  %v4930_v63 = vld.sshfl [vmem:[#allocation1 + $0x38] sm:$0xff pattern:$0x75316420] }
 0x1ea   :  { %v3078_v17 = vpack.c.bf16 %v2417_v41, %v2410_v13  ;;  %v3651_v5 = vsel %vm3504_vm1, %v3410_v10, %v3408_v15  ;;  %v3658_v47 = vsel %vm3504_vm1, %v3411_v34, %v3409_v23  ;;  %v400_v57 = vmul.f32 %v272_v29, %v144_v20  ;;  %v4920_v15 = vld.sshfl [vmem:[#allocation1 + $0x20] sm:$0xff pattern:$0x75316420]  ;;  %v4924_v34 = vld.sshfl [vmem:[#allocation1 + $0x28] sm:$0xff pattern:$0x75316420] }
 0x1eb   :  { %v2424_v48 = vadd.f32 %v2423_v36, %v2422_v27  ;;  %v2431_v26 = vadd.f32 %v2430_v24, %v2429_v16  ;;  %v3652_v60 = vsel %vm3506_vm2, %v3412_v55, %v3651_v5  ;;  %v3659_v58 = vsel %vm3506_vm2, %v3413_v9, %v3658_v47  ;;  %v278_v5 = vld [vmem:[#allocation5 + $0x350] sm:$0xff] }
 0x1ec   :  { %v3420_v61 = vunpack.c.l.b16 %v3078_v17  ;;  %v3421_v10 = vunpack.c.h.b16 %v3078_v17  ;;  %v3653_v45 = vsel %vm3508_vm3, %v3414_v19, %v3652_v60  ;;  %v3660_v23 = vsel %vm3508_vm3, %v3415_v51, %v3659_v58  ;;  %859 = vst [vmem:[#allocation1] ss:$2 sm:$0xff] %v400_v57  ;;  %v149_v51 = vld [vmem:[#allocation2 + $0x348] sm:$0xff]  ;;  %v150_v17 = vld [vmem:[#allocation2 + $0x350] sm:$0xff]  ;;  %v279_v60 = vld [vmem:[#allocation5 + $0x358] sm:$0xff] }
 0x1ed   :  { %v3079_v39 = vpack.c.bf16 %v2431_v26, %v2424_v48  ;;  %v3654_v7 = vsel %vm3510_vm4, %v3416_v42, %v3653_v45  ;;  %v3661_v13 = vsel %vm3510_vm4, %v3417_v54, %v3660_v23  ;;  %v401_v11 = vmul.f32 %v273_v1, %v145_v3  ;;  %v277_v42 = vld [vmem:[#allocation5 + $0x348] sm:$0xff]  ;;  %v151_v26 = vld [vmem:[#allocation2 + $0x358] sm:$0xff] }
 0x1ee   :  { %v3655_v6 = vsel %vm3512_vm5, %v3418_v31, %v3654_v7  ;;  %v3662_v55 = vsel %vm3512_vm5, %v3419_v2, %v3661_v13  ;;  %v402_v27 = vmul.f32 %v274_v30, %v146_v50  ;;  %v403_v16 = vmul.f32 %v275_v18, %v147_v4 }
 0x1ef   :  { %v3422_v9 = vunpack.c.l.b16 %v3079_v39  ;;  %v3423_v19 = vunpack.c.h.b16 %v3079_v39  ;;  %v3656_v20 = vsel %vm3514_vm6, %v3420_v61, %v3655_v6  ;;  %v3663_v29 = vsel %vm3514_vm6, %v3421_v10, %v3662_v55  ;;  %862 = vst [vmem:[#allocation1 + $0x10] ss:$2 sm:$0xff] %v401_v11 }
 0x1f0   :  { %865 = vst [vmem:[#allocation1 + $0x20] ss:$2 sm:$0xff] %v402_v27  ;;  %v404_v41 = vmul.f32 %v276_v59, %v148_v32  ;;  %v2432_v24 = vsel %vm1199_vm0, %v4814_v12, 0.0  ;;  %v2439_v31 = vsel %vm1199_vm0, %v4816_v25, 0.0  ;;  %v2446_v3 = vsel %vm1199_vm0, %v4819_v62, 0.0 }
 0x1f1   :  { %v3657_v54 = vsel %vm3516_vm7, %v3422_v9, %v3656_v20  ;;  %v3664_v36 = vsel %vm3516_vm7, %v3423_v19, %v3663_v29  ;;  %868 = vst [vmem:[#allocation1 + $0x30] ss:$2 sm:$0xff] %v403_v16  ;;  %v2433_v47 = vrot.slane %v2432_v24, 4  ;;  %v2440_v57 = vrot.slane %v2439_v31, 4 }
 0x1f2   :  { %v3745_v2 = vpack.c.b16 %v3664_v36, %v3657_v54  ;;  %v405_v48 = vmul.f32 %v277_v42, %v149_v51  ;;  %v2447_v30 = vrot.slane %v2446_v3, 4  ;;  %v2453_v25 = vsel %vm1199_vm0, %v4821_v56, 0.0 }
 0x1f3   :  { %v4944_v1 = vld.sshfl [vmem:[#allocation1] sm:$0xff pattern:$0x75316420]  ;;  %v4946_v50 = vld.sshfl [vmem:[#allocation1 + $0x8] sm:$0xff pattern:$0x75316420]  ;;  %v2434_v12 = vadd.f32 %v2433_v47, %v2432_v24  ;;  %v2441_v58 = vadd.f32 %v2440_v57, %v2439_v31  ;;  %v406_v23 = vmul.f32 %v278_v5, %v150_v17  ;;  %v407_v13 = vmul.f32 %v279_v60, %v151_v26 }
 0x1f4   :  { %3777 = vst [vmem:[#allocation7 + $0x50] sm:$0xff] %v3745_v2  ;;  %v2454_v4 = vrot.slane %v2453_v25, 4  ;;  %v2460_v18 = vsel %vm1199_vm0, %v4825_v37, 0.0  ;;  %v2467_v62 = vsel %vm1199_vm0, %v4829_v8, 0.0  ;;  %v2474_v61 = vsel %vm1199_vm0, %v4831_v40, 0.0 }
 0x1f5   :  { %871 = vst [vmem:[#allocation1] ss:$2 sm:$0xff] %v404_v41  ;;  %v2448_v39 = vadd.f32 %v2447_v30, %v2446_v3  ;;  %v2435_v8 = vrot.slane %v2434_v12, 2  ;;  %v2442_v59 = vrot.slane %v2441_v58, 2  ;;  %v2461_v55 = vrot.slane %v2460_v18, 4 }
 0x1f6   :  { %v4956_v10 = vld.sshfl [vmem:[#allocation1 + $0x10] sm:$0xff pattern:$0x75316420]  ;;  %v4958_v45 = vld.sshfl [vmem:[#allocation1 + $0x18] sm:$0xff pattern:$0x75316420]  ;;  %v2455_v11 = vadd.f32 %v2454_v4, %v2453_v25 }
 0x1f7   :  { %v4960_v7 = vld.sshfl [vmem:[#allocation1 + $0x20] sm:$0xff pattern:$0x75316420]  ;;  %v4962_v56 = vld.sshfl [vmem:[#allocation1 + $0x28] sm:$0xff pattern:$0x75316420]  ;;  %v2436_v19 = vadd.f32 %v2435_v8, %v2434_v12  ;;  %v2443_v20 = vadd.f32 %v2442_v59, %v2441_v58  ;;  %v2462_v51 = vadd.f32 %v2461_v55, %v2460_v18 }
 0x1f8   :  { %v4964_v32 = vld.sshfl [vmem:[#allocation1 + $0x30] sm:$0xff pattern:$0x75316420]  ;;  %v4966_v37 = vld.sshfl [vmem:[#allocation1 + $0x38] sm:$0xff pattern:$0x75316420] }
 0x1f9   :  { %874 = vst [vmem:[#allocation1 + $0x10] ss:$2 sm:$0xff] %v405_v48  ;;  %v2449_v40 = vrot.slane %v2448_v39, 2  ;;  %v2456_v6 = vrot.slane %v2455_v11, 2  ;;  %v2468_v27 = vrot.slane %v2467_v62, 4  ;;  %v2475_v16 = vrot.slane %v2474_v61, 4 }
 0x1fa   :  { %877 = vst [vmem:[#allocation1 + $0x20] ss:$2 sm:$0xff] %v406_v23  ;;  %v2481_v9 = vsel %vm1199_vm0, %v4835_v0, 0.0  ;;  %v2437_v36 = vrot.slane %v2436_v19, 1  ;;  %v2444_v24 = vrot.slane %v2443_v20, 1  ;;  %v2463_v17 = vrot.slane %v2462_v51, 2 }
 0x1fb   :  { %880 = vst [vmem:[#allocation1 + $0x30] ss:$2 sm:$0xff] %v407_v13  ;;  %v2450_v29 = vadd.f32 %v2449_v40, %v2448_v39  ;;  %v2457_v41 = vadd.f32 %v2456_v6, %v2455_v11  ;;  %v2469_v42 = vadd.f32 %v2468_v27, %v2467_v62  ;;  %v2476_v54 = vadd.f32 %v2475_v16, %v2474_v61 }
 0x1fc   :  { %v2482_v57 = vrot.slane %v2481_v9, 4  ;;  %v2438_v3 = vadd.f32 %v2437_v36, %v2436_v19  ;;  %v2445_v48 = vadd.f32 %v2444_v24, %v2443_v20  ;;  %v2464_v60 = vadd.f32 %v2463_v17, %v2462_v51 }
 0x1fd   :  { %v2451_v31 = vrot.slane %v2450_v29, 1  ;;  %v2458_v2 = vrot.slane %v2457_v41, 1  ;;  %v2470_v5 = vrot.slane %v2469_v42, 2  ;;  %v2477_v47 = vrot.slane %v2476_v54, 2 }
 0x1fe   :  { %v2483_v30 = vadd.f32 %v2482_v57, %v2481_v9  ;;  %v4970_v25 = vpack.c.bf16 %v2445_v48, %v2438_v3  ;;  %v2465_v18 = vrot.slane %v2464_v60, 1  ;;  %v2488_v39 = vsel %vm1199_vm0, %v4856_v49, 0.0 }
 0x1ff   :  { %v2452_v26 = vadd.f32 %v2451_v31, %v2450_v29  ;;  %v2459_v0 = vadd.f32 %v2458_v2, %v2457_v41  ;;  %v2471_v12 = vadd.f32 %v2470_v5, %v2469_v42  ;;  %v2478_v58 = vadd.f32 %v2477_v47, %v2476_v54 }
 0x200   :  { %v2484_v23 = vrot.slane %v2483_v30, 2  ;;  %v2495_v13 = vsel %vm1199_vm0, %v4858_v35, 0.0  ;;  %v2502_v11 = vsel %vm1199_vm0, %v4860_v33, 0.0  ;;  %v2509_v8 = vsel %vm1199_vm0, %v4862_v28, 0.0 }
 0x201   :  { %v4972_v4 = vpack.c.bf16 %v2459_v0, %v2452_v26  ;;  %v2472_v62 = vrot.slane %v2471_v12, 1  ;;  %v2479_v61 = vrot.slane %v2478_v58, 1  ;;  %v2466_v59 = vadd.f32 %v2465_v18, %v2464_v60 }
 0x202   :  { %v2485_v55 = vadd.f32 %v2484_v23, %v2483_v30  ;;  %v2489_v27 = vrot.slane %v2488_v39, 4  ;;  %v2496_v16 = vrot.slane %v2495_v13, 4  ;;  %v2503_v9 = vrot.slane %v2502_v11, 4 }
 0x203   :  { %v2473_v40 = vadd.f32 %v2472_v62, %v2471_v12  ;;  %v2480_v6 = vadd.f32 %v2479_v61, %v2478_v58  ;;  %v2510_v19 = vrot.slane %v2509_v8, 4  ;;  %v2516_v49 = vsel %vm1199_vm0, %v4864_v22, 0.0 }
 0x204   :  { %v2486_v20 = vrot.slane %v2485_v55, 1  ;;  %v2523_v35 = vsel %vm1199_vm0, %v4866_v46, 0.0  ;;  %v2530_v33 = vsel %vm1199_vm0, %v4868_v38, 0.0  ;;  %v2490_v29 = vadd.f32 %v2489_v27, %v2488_v39 }
 0x205   :  { %v2497_v28 = vadd.f32 %v2496_v16, %v2495_v13  ;;  %v2504_v41 = vadd.f32 %v2503_v9, %v2502_v11  ;;  %v2511_v51 = vadd.f32 %v2510_v19, %v2509_v8  ;;  %v2517_v54 = vrot.slane %v2516_v49, 4 }
 0x206   :  { %v2487_v42 = vadd.f32 %v2486_v20, %v2485_v55  ;;  %v2524_v36 = vrot.slane %v2523_v35, 4  ;;  %v2531_v24 = vrot.slane %v2530_v33, 4  ;;  %v2491_v31 = vrot.slane %v2490_v29, 2 }
 0x207   :  { %v2498_v2 = vrot.slane %v2497_v28, 2  ;;  %v2505_v17 = vrot.slane %v2504_v41, 2  ;;  %v2512_v5 = vrot.slane %v2511_v51, 2  ;;  %v2518_v47 = vadd.f32 %v2517_v54, %v2516_v49 }
 0x208   :  { %v2525_v22 = vadd.f32 %v2524_v36, %v2523_v35  ;;  %v2532_v57 = vadd.f32 %v2531_v24, %v2530_v33  ;;  %v2537_v46 = vsel %vm1199_vm0, %v4870_v44, 0.0  ;;  %v2492_v3 = vadd.f32 %v2491_v31, %v2490_v29 }
 0x209   :  { %v2499_v38 = vadd.f32 %v2498_v2, %v2497_v28  ;;  %v2506_v48 = vadd.f32 %v2505_v17, %v2504_v41  ;;  %v2513_v26 = vadd.f32 %v2512_v5, %v2511_v51  ;;  %v2519_v0 = vrot.slane %v2518_v47, 2  ;;  %v4994_v2 = vld.sshfl [vmem:[#allocation1] sm:$0xff pattern:$0x75316420] }
 0x20a   :  { %v2526_v60 = vrot.slane %v2525_v22, 2  ;;  %v2533_v12 = vrot.slane %v2532_v57, 2  ;;  %v2538_v58 = vrot.slane %v2537_v46, 4  ;;  %v2493_v30 = vrot.slane %v2492_v3, 1 }
 0x20b   :  { %v2500_v18 = vrot.slane %v2499_v38, 1  ;;  %v2507_v62 = vrot.slane %v2506_v48, 1  ;;  %v2514_v61 = vrot.slane %v2513_v26, 1  ;;  %v2520_v23 = vadd.f32 %v2519_v0, %v2518_v47  ;;  %v4996_v17 = vld.sshfl [vmem:[#allocation1 + $0x8] sm:$0xff pattern:$0x75316420] }
 0x20c   :  { %v2527_v39 = vadd.f32 %v2526_v60, %v2525_v22  ;;  %v2534_v13 = vadd.f32 %v2533_v12, %v2532_v57  ;;  %v2539_v11 = vadd.f32 %v2538_v58, %v2537_v46  ;;  %v2494_v8 = vadd.f32 %v2493_v30, %v2492_v3  ;;  %v280_v47 = vld [vmem:[#allocation5 + $0x360] sm:$0xff]  ;;  %v4998_v22 = vld.sshfl [vmem:[#allocation1 + $0x10] sm:$0xff pattern:$0x75316420]  ;;  %v282_v12 = vld [vmem:[#allocation5 + $0x370] sm:$0xff] }
 0x20d   :  { %v2501_v55 = vadd.f32 %v2500_v18, %v2499_v38  ;;  %v2508_v27 = vadd.f32 %v2507_v62, %v2506_v48  ;;  %v2515_v44 = vadd.f32 %v2514_v61, %v2513_v26  ;;  %v2521_v16 = vrot.slane %v2520_v23, 1  ;;  %v281_v38 = vld [vmem:[#allocation5 + $0x368] sm:$0xff]  ;;  %v154_v48 = vld [vmem:[#allocation2 + $0x370] sm:$0xff]  ;;  %v155_v58 = vld [vmem:[#allocation2 + $0x378] sm:$0xff] }
 0x20e   :  { %v2528_v9 = vrot.slane %v2527_v39, 1  ;;  %v2535_v19 = vrot.slane %v2534_v13, 1  ;;  %v2540_v20 = vrot.slane %v2539_v11, 2  ;;  %v3082_v49 = vpack.c.bf16 %v2473_v40, %v2466_v59  ;;  %v283_v30 = vld [vmem:[#allocation5 + $0x378] sm:$0xff] }
 0x20f   :  { %v3083_v35 = vpack.c.bf16 %v2487_v42, %v2480_v6  ;;  %v3084_v33 = vpack.c.bf16 %v2501_v55, %v2494_v8  ;;  %v2522_v29 = vadd.f32 %v2521_v16, %v2520_v23  ;;  %v3085_v51 = vpack.c.bf16 %v2515_v44, %v2508_v27  ;;  %v152_v42 = vld [vmem:[#allocation2 + $0x360] sm:$0xff]  ;;  %v5000_v18 = vld.sshfl [vmem:[#allocation1 + $0x18] sm:$0xff pattern:$0x75316420] }
 0x210   :  { %v2529_v28 = vadd.f32 %v2528_v9, %v2527_v39  ;;  %v2541_v41 = vadd.f32 %v2540_v20, %v2539_v11  ;;  %v3424_v54 = vunpack.c.l.b16 %v4970_v25  ;;  %v3425_v36 = vunpack.c.h.b16 %v4970_v25  ;;  %v153_v25 = vld [vmem:[#allocation2 + $0x368] sm:$0xff]  ;;  %v5002_v62 = vld.sshfl [vmem:[#allocation1 + $0x20] sm:$0xff pattern:$0x75316420] }
 0x211   :  { %v3426_v24 = vunpack.c.l.b16 %v4972_v4  ;;  %v3427_v31 = vunpack.c.h.b16 %v4972_v4  ;;  %v2536_v5 = vadd.f32 %v2535_v19, %v2534_v13  ;;  %v3428_v40 = vunpack.c.l.b16 %v3082_v49  ;;  %v5006_v11 = vld.sshfl [vmem:[#allocation1 + $0x28] sm:$0xff pattern:$0x75316420]  ;;  %v5008_v8 = vld.sshfl [vmem:[#allocation1 + $0x30] sm:$0xff pattern:$0x75316420] }
 0x212   :  { %v2542_v59 = vrot.slane %v2541_v41, 1  ;;  %v3429_v6 = vunpack.c.h.b16 %v3082_v49  ;;  %v3086_v57 = vpack.c.bf16 %v2529_v28, %v2522_v29  ;;  %v3430_v46 = vunpack.c.l.b16 %v3083_v35  ;;  %v5012_v9 = vld.sshfl [vmem:[#allocation1 + $0x38] sm:$0xff pattern:$0x75316420] }
 0x213   :  { %v3431_v3 = vunpack.c.h.b16 %v3083_v35  ;;  %v3432_v4 = vunpack.c.l.b16 %v3084_v33  ;;  %v3433_v0 = vunpack.c.h.b16 %v3084_v33  ;;  %v3434_v60 = vunpack.c.l.b16 %v3085_v51 }
 0x214   :  { %v2543_v26 = vadd.f32 %v2542_v59, %v2541_v41  ;;  %v3435_v61 = vunpack.c.h.b16 %v3085_v51  ;;  %v3665_v23 = vsel %vm3504_vm1, %v3426_v24, %v3424_v54  ;;  %v3672_v39 = vsel %vm3504_vm1, %v3427_v31, %v3425_v36 }
 0x215   :  { %v408_v13 = vmul.f32 %v280_v47, %v152_v42  ;;  %v3666_v27 = vsel %vm3506_vm2, %v3428_v40, %v3665_v23  ;;  %v3673_v44 = vsel %vm3506_vm2, %v3429_v6, %v3672_v39  ;;  %v409_v16 = vmul.f32 %v281_v38, %v153_v25  ;;  %v156_v6 = vld [vmem:[#allocation2 + $0x380] sm:$0xff]  ;;  %v157_v47 = vld [vmem:[#allocation2 + $0x388] sm:$0xff]  ;;  %v158_v38 = vld [vmem:[#allocation2 + $0x390] sm:$0xff] }
 0x216   :  { %v3087_v55 = vpack.c.bf16 %v2543_v26, %v2536_v5  ;;  %v3667_v19 = vsel %vm3508_vm3, %v3430_v46, %v3666_v27  ;;  %v3674_v20 = vsel %vm3508_vm3, %v3431_v3, %v3673_v44  ;;  %v410_v49 = vmul.f32 %v282_v12, %v154_v48  ;;  %v284_v42 = vld [vmem:[#allocation5 + $0x380] sm:$0xff]  ;;  %v285_v25 = vld [vmem:[#allocation5 + $0x388] sm:$0xff]  ;;  %v286_v48 = vld [vmem:[#allocation5 + $0x390] sm:$0xff] }
 0x217   :  { %883 = vst [vmem:[#allocation1] ss:$2 sm:$0xff] %v408_v13  ;;  %v411_v35 = vmul.f32 %v283_v30, %v155_v58  ;;  %v3436_v33 = vunpack.c.l.b16 %v3086_v57  ;;  %v3437_v29 = vunpack.c.h.b16 %v3086_v57  ;;  %v3668_v28 = vsel %vm3510_vm4, %v3432_v4, %v3667_v19  ;;  %v287_v12 = vld [vmem:[#allocation5 + $0x398] sm:$0xff] }
 0x218   :  { %v3675_v41 = vsel %vm3510_vm4, %v3433_v0, %v3674_v20  ;;  %886 = vst [vmem:[#allocation1 + $0x10] ss:$2 sm:$0xff] %v409_v16  ;;  %v3438_v51 = vunpack.c.l.b16 %v3087_v55  ;;  %v3439_v54 = vunpack.c.h.b16 %v3087_v55  ;;  %v3669_v36 = vsel %vm3512_vm5, %v3434_v60, %v3668_v28  ;;  %v159_v60 = vld [vmem:[#allocation2 + $0x398] sm:$0xff] }
 0x219   :  { %v3676_v24 = vsel %vm3512_vm5, %v3435_v61, %v3675_v41  ;;  %889 = vst [vmem:[#allocation1 + $0x20] ss:$2 sm:$0xff] %v410_v49  ;;  %v3670_v31 = vsel %vm3514_vm6, %v3436_v33, %v3669_v36  ;;  %v2544_v57 = vsel %vm1199_vm0, %v4900_v43, 0.0  ;;  %v2551_v46 = vsel %vm1199_vm0, %v4902_v14, 0.0 }
 0x21a   :  { %v3677_v5 = vsel %vm3514_vm6, %v3437_v29, %v3676_v24  ;;  %892 = vst [vmem:[#allocation1 + $0x30] ss:$2 sm:$0xff] %v411_v35  ;;  %v3671_v59 = vsel %vm3516_vm7, %v3438_v51, %v3670_v31  ;;  %v2545_v26 = vrot.slane %v2544_v57, 4  ;;  %v2552_v4 = vrot.slane %v2551_v46, 4 }
 0x21b   :  { %v3678_v40 = vsel %vm3516_vm7, %v3439_v54, %v3677_v5  ;;  %v2558_v0 = vsel %vm1199_vm0, %v4904_v52, 0.0  ;;  %v2565_v30 = vsel %vm1199_vm0, %v4906_v21, 0.0  ;;  %v2572_v43 = vsel %vm1199_vm0, %v4920_v15, 0.0 }
 0x21c   :  { %v3746_v3 = vpack.c.b16 %v3678_v40, %v3671_v59  ;;  %v2559_v58 = vrot.slane %v2558_v0, 4  ;;  %v2579_v14 = vsel %vm1199_vm0, %v4924_v34, 0.0  ;;  %v412_v23 = vmul.f32 %v284_v42, %v156_v6 }
 0x21d   :  { %v2546_v39 = vadd.f32 %v2545_v26, %v2544_v57  ;;  %v2566_v13 = vrot.slane %v2565_v30, 4  ;;  %v2573_v55 = vrot.slane %v2572_v43, 4  ;;  %v413_v44 = vmul.f32 %v285_v25, %v157_v47 }
 0x21e   :  { %3778 = vst [vmem:[#allocation7 + $0x58] sm:$0xff] %v3746_v3  ;;  %v5036_v61 = vld.sshfl [vmem:[#allocation1] sm:$0xff pattern:$0x75316420]  ;;  %v2553_v16 = vadd.f32 %v2552_v4, %v2551_v46  ;;  %v2560_v21 = vadd.f32 %v2559_v58, %v2558_v0  ;;  %v414_v20 = vmul.f32 %v286_v48, %v158_v38  ;;  %v415_v29 = vmul.f32 %v287_v12, %v159_v60 }
 0x21f   :  { %v5038_v52 = vld.sshfl [vmem:[#allocation1 + $0x8] sm:$0xff pattern:$0x75316420]  ;;  %v5040_v27 = vld.sshfl [vmem:[#allocation1 + $0x10] sm:$0xff pattern:$0x75316420]  ;;  %v2567_v34 = vadd.f32 %v2566_v13, %v2565_v30  ;;  %v2574_v49 = vadd.f32 %v2573_v55, %v2572_v43 }
 0x220   :  { %v5042_v19 = vld.sshfl [vmem:[#allocation1 + $0x18] sm:$0xff pattern:$0x75316420]  ;;  %v5044_v15 = vld.sshfl [vmem:[#allocation1 + $0x20] sm:$0xff pattern:$0x75316420] }
 0x221   :  { %v5046_v35 = vld.sshfl [vmem:[#allocation1 + $0x28] sm:$0xff pattern:$0x75316420]  ;;  %v5048_v33 = vld.sshfl [vmem:[#allocation1 + $0x30] sm:$0xff pattern:$0x75316420] }
 0x222   :  { %v5050_v28 = vld.sshfl [vmem:[#allocation1 + $0x38] sm:$0xff pattern:$0x75316420]  ;;  %895 = vst [vmem:[#allocation1] ss:$2 sm:$0xff] %v412_v23  ;;  %v2547_v41 = vrot.slane %v2546_v39, 2 }
 0x223   :  { %898 = vst [vmem:[#allocation1 + $0x10] ss:$2 sm:$0xff] %v413_v44  ;;  %v2554_v51 = vrot.slane %v2553_v16, 2  ;;  %v2561_v54 = vrot.slane %v2560_v21, 2  ;;  %v2568_v36 = vrot.slane %v2567_v34, 2  ;;  %v2575_v24 = vrot.slane %v2574_v49, 2 }
 0x224   :  { %901 = vst [vmem:[#allocation1 + $0x20] ss:$2 sm:$0xff] %v414_v20  ;;  %v2548_v31 = vadd.f32 %v2547_v41, %v2546_v39  ;;  %v2580_v5 = vrot.slane %v2579_v14, 4  ;;  %v2586_v59 = vsel %vm1199_vm0, %v4928_v53, 0.0  ;;  %v2593_v40 = vsel %vm1199_vm0, %v4930_v63, 0.0 }
 0x225   :  { %904 = vst [vmem:[#allocation1 + $0x30] ss:$2 sm:$0xff] %v415_v29  ;;  %v2555_v6 = vadd.f32 %v2554_v51, %v2553_v16  ;;  %v2562_v42 = vadd.f32 %v2561_v54, %v2560_v21  ;;  %v2569_v47 = vadd.f32 %v2568_v36, %v2567_v34  ;;  %v2576_v57 = vadd.f32 %v2575_v24, %v2574_v49 }
 0x226   :  { %v2549_v46 = vrot.slane %v2548_v31, 1  ;;  %v2581_v3 = vadd.f32 %v2580_v5, %v2579_v14  ;;  %v2587_v25 = vrot.slane %v2586_v59, 4  ;;  %v2594_v38 = vrot.slane %v2593_v40, 4 }
 0x227   :  { %v2556_v48 = vrot.slane %v2555_v6, 1  ;;  %v2563_v26 = vrot.slane %v2562_v42, 1  ;;  %v2570_v4 = vrot.slane %v2569_v47, 1  ;;  %v2577_v60 = vrot.slane %v2576_v57, 1 }
 0x228   :  { %v2550_v0 = vadd.f32 %v2549_v46, %v2548_v31  ;;  %v2582_v12 = vrot.slane %v2581_v3, 2  ;;  %v2588_v58 = vadd.f32 %v2587_v25, %v2586_v59  ;;  %v2595_v63 = vadd.f32 %v2594_v38, %v2593_v40 }
 0x229   :  { %v2557_v53 = vadd.f32 %v2556_v48, %v2555_v6  ;;  %v2564_v30 = vadd.f32 %v2563_v26, %v2562_v42  ;;  %v2571_v43 = vadd.f32 %v2570_v4, %v2569_v47  ;;  %v2578_v39 = vadd.f32 %v2577_v60, %v2576_v57 }
 0x22a   :  { %v2583_v23 = vadd.f32 %v2582_v12, %v2581_v3  ;;  %v2589_v44 = vrot.slane %v2588_v58, 2  ;;  %v2596_v16 = vrot.slane %v2595_v63, 2  ;;  %v2600_v21 = vsel %vm1199_vm0, %v4944_v1, 0.0 }
 0x22b   :  { %v5056_v13 = vpack.c.bf16 %v2557_v53, %v2550_v0  ;;  %v5058_v55 = vpack.c.bf16 %v2571_v43, %v2564_v30  ;;  %v2601_v20 = vrot.slane %v2600_v21, 4  ;;  %v2607_v34 = vsel %vm1199_vm0, %v4946_v50, 0.0 }
 0x22c   :  { %v2584_v14 = vrot.slane %v2583_v23, 1  ;;  %v2614_v49 = vsel %vm1199_vm0, %v4956_v10, 0.0  ;;  %v2621_v29 = vsel %vm1199_vm0, %v4958_v45, 0.0  ;;  %v2590_v51 = vadd.f32 %v2589_v44, %v2588_v58 }
 0x22d   :  { %v2597_v54 = vadd.f32 %v2596_v16, %v2595_v63  ;;  %v2608_v36 = vrot.slane %v2607_v34, 4  ;;  %v2602_v24 = vadd.f32 %v2601_v20, %v2600_v21  ;;  %v2615_v31 = vrot.slane %v2614_v49, 4 }
 0x22e   :  { %v2585_v41 = vadd.f32 %v2584_v14, %v2583_v23  ;;  %v2622_v5 = vrot.slane %v2621_v29, 4  ;;  %v2628_v1 = vsel %vm1199_vm0, %v4960_v7, 0.0  ;;  %v2591_v59 = vrot.slane %v2590_v51, 1 }
 0x22f   :  { %v2598_v40 = vrot.slane %v2597_v54, 1  ;;  %v2609_v6 = vadd.f32 %v2608_v36, %v2607_v34  ;;  %v2629_v50 = vrot.slane %v2628_v1, 4  ;;  %v2603_v42 = vrot.slane %v2602_v24, 2 }
 0x230   :  { %v2616_v47 = vadd.f32 %v2615_v31, %v2614_v49  ;;  %v2623_v10 = vadd.f32 %v2622_v5, %v2621_v29  ;;  %v2635_v45 = vsel %vm1199_vm0, %v4962_v56, 0.0  ;;  %v2592_v57 = vadd.f32 %v2591_v59, %v2590_v51 }
 0x231   :  { %v2599_v46 = vadd.f32 %v2598_v40, %v2597_v54  ;;  %v2610_v3 = vrot.slane %v2609_v6, 2  ;;  %v2630_v25 = vadd.f32 %v2629_v50, %v2628_v1  ;;  %v2604_v38 = vadd.f32 %v2603_v42, %v2602_v24 }
 0x232   :  { %v2617_v48 = vrot.slane %v2616_v47, 2  ;;  %v2624_v26 = vrot.slane %v2623_v10, 2  ;;  %v2636_v4 = vrot.slane %v2635_v45, 4  ;;  %v2642_v60 = vsel %vm1199_vm0, %v4964_v32, 0.0 }
 0x233   :  { %v2611_v0 = vadd.f32 %v2610_v3, %v2609_v6  ;;  %v2631_v7 = vrot.slane %v2630_v25, 2  ;;  %v2649_v12 = vsel %vm1199_vm0, %v4966_v37, 0.0  ;;  %v2605_v58 = vrot.slane %v2604_v38, 1 }
 0x234   :  { %v2618_v53 = vadd.f32 %v2617_v48, %v2616_v47  ;;  %v2625_v30 = vadd.f32 %v2624_v26, %v2623_v10  ;;  %v2637_v56 = vadd.f32 %v2636_v4, %v2635_v45  ;;  %v2643_v23 = vrot.slane %v2642_v60, 4  ;;  %v5082_v26 = vld.sshfl [vmem:[#allocation1 + $0x8] sm:$0xff pattern:$0x75316420] }
 0x235   :  { %v2612_v43 = vrot.slane %v2611_v0, 1  ;;  %v2632_v63 = vadd.f32 %v2631_v7, %v2630_v25  ;;  %v2650_v14 = vrot.slane %v2649_v12, 4  ;;  %v2606_v44 = vadd.f32 %v2605_v58, %v2604_v38  ;;  %v288_v58 = vld [vmem:[#allocation5 + $0x3a0] sm:$0xff] }
 0x236   :  { %v2619_v16 = vrot.slane %v2618_v53, 1  ;;  %v2626_v21 = vrot.slane %v2625_v30, 1  ;;  %v2638_v20 = vrot.slane %v2637_v56, 2  ;;  %v2644_v29 = vadd.f32 %v2643_v23, %v2642_v60  ;;  %v290_v23 = vld [vmem:[#allocation5 + $0x3b0] sm:$0xff] }
 0x237   :  { %v2613_v34 = vadd.f32 %v2612_v43, %v2611_v0  ;;  %v2633_v49 = vrot.slane %v2632_v63, 1  ;;  %v2651_v51 = vadd.f32 %v2650_v14, %v2649_v12  ;;  %v3090_v37 = vpack.c.bf16 %v2585_v41, %v2578_v39  ;;  %v160_v12 = vld [vmem:[#allocation2 + $0x3a0] sm:$0xff]  ;;  %v289_v43 = vld [vmem:[#allocation5 + $0x3a8] sm:$0xff] }
 0x238   :  { %v2620_v32 = vadd.f32 %v2619_v16, %v2618_v53  ;;  %v2627_v54 = vadd.f32 %v2626_v21, %v2625_v30  ;;  %v2639_v36 = vadd.f32 %v2638_v20, %v2637_v56  ;;  %v2645_v24 = vrot.slane %v2644_v29, 2  ;;  %v161_v53 = vld [vmem:[#allocation2 + $0x3a8] sm:$0xff] }
 0x239   :  { %v2652_v31 = vrot.slane %v2651_v51, 2  ;;  %v3091_v5 = vpack.c.bf16 %v2599_v46, %v2592_v57  ;;  %v2634_v1 = vadd.f32 %v2633_v49, %v2632_v63  ;;  %v3092_v40 = vpack.c.bf16 %v2613_v34, %v2606_v44  ;;  %v5080_v46 = vld.sshfl [vmem:[#allocation1] sm:$0xff pattern:$0x75316420]  ;;  %v162_v63 = vld [vmem:[#allocation2 + $0x3b0] sm:$0xff] }
 0x23a   :  { %v2640_v59 = vrot.slane %v2639_v36, 1  ;;  %v3093_v6 = vpack.c.bf16 %v2627_v54, %v2620_v32  ;;  %v2646_v50 = vadd.f32 %v2645_v24, %v2644_v29  ;;  %v3440_v47 = vunpack.c.l.b16 %v5056_v13  ;;  %v5085_v14 = vld.sshfl [vmem:[#allocation1 + $0x10] sm:$0xff pattern:$0x75316420] }
 0x23b   :  { %v2653_v42 = vadd.f32 %v2652_v31, %v2651_v51  ;;  %v3442_v10 = vunpack.c.l.b16 %v5058_v55  ;;  %v3441_v3 = vunpack.c.h.b16 %v5056_v13  ;;  %v3443_v25 = vunpack.c.h.b16 %v5058_v55  ;;  %v5087_v44 = vld.sshfl [vmem:[#allocation1 + $0x18] sm:$0xff pattern:$0x75316420]  ;;  %v5091_v49 = vld.sshfl [vmem:[#allocation1 + $0x20] sm:$0xff pattern:$0x75316420] }
 0x23c   :  { %v2641_v45 = vadd.f32 %v2640_v59, %v2639_v36  ;;  %v3444_v38 = vunpack.c.l.b16 %v3090_v37  ;;  %v2647_v39 = vrot.slane %v2646_v50, 1  ;;  %v3445_v48 = vunpack.c.h.b16 %v3090_v37  ;;  %v163_v36 = vld [vmem:[#allocation2 + $0x3b8] sm:$0xff]  ;;  %v5095_v24 = vld.sshfl [vmem:[#allocation1 + $0x28] sm:$0xff pattern:$0x75316420] }
 0x23d   :  { %v2654_v41 = vrot.slane %v2653_v42, 1  ;;  %v3446_v57 = vunpack.c.l.b16 %v3091_v5  ;;  %v3447_v0 = vunpack.c.h.b16 %v3091_v5  ;;  %v3448_v7 = vunpack.c.l.b16 %v3092_v40  ;;  %v291_v37 = vld [vmem:[#allocation5 + $0x3b8] sm:$0xff]  ;;  %v5097_v31 = vld.sshfl [vmem:[#allocation1 + $0x30] sm:$0xff pattern:$0x75316420] }
 0x23e   :  { %v3094_v4 = vpack.c.bf16 %v2641_v45, %v2634_v1  ;;  %v3449_v60 = vunpack.c.h.b16 %v3092_v40  ;;  %v2648_v30 = vadd.f32 %v2647_v39, %v2646_v50  ;;  %v3450_v56 = vunpack.c.l.b16 %v3093_v6 }
 0x23f   :  { %v2655_v13 = vadd.f32 %v2654_v41, %v2653_v42  ;;  %v3679_v55 = vsel %vm3504_vm1, %v3442_v10, %v3440_v47  ;;  %v3451_v16 = vunpack.c.h.b16 %v3093_v6  ;;  %v3686_v34 = vsel %vm3504_vm1, %v3443_v25, %v3441_v3  ;;  %v5101_v6 = vld.sshfl [vmem:[#allocation1 + $0x38] sm:$0xff pattern:$0x75316420] }
 0x240   :  { %v3452_v21 = vunpack.c.l.b16 %v3094_v4  ;;  %v3680_v20 = vsel %vm3506_vm2, %v3444_v38, %v3679_v55  ;;  %v3687_v32 = vsel %vm3506_vm2, %v3445_v48, %v3686_v34  ;;  %v416_v54 = vmul.f32 %v288_v58, %v160_v12  ;;  %v165_v12 = vld [vmem:[#allocation2 + $0x3c8] sm:$0xff]  ;;  %v294_v55 = vld [vmem:[#allocation5 + $0x3d0] sm:$0xff] }
 0x241   :  { %v3095_v29 = vpack.c.bf16 %v2655_v13, %v2648_v30  ;;  %v3681_v51 = vsel %vm3508_vm3, %v3446_v57, %v3680_v20  ;;  %v3688_v1 = vsel %vm3508_vm3, %v3447_v0, %v3687_v32  ;;  %v417_v59 = vmul.f32 %v289_v43, %v161_v53  ;;  %v293_v13 = vld [vmem:[#allocation5 + $0x3c8] sm:$0xff] }
 0x242   :  { %v3682_v5 = vsel %vm3510_vm4, %v3448_v7, %v3681_v51  ;;  %v418_v40 = vmul.f32 %v290_v23, %v162_v63  ;;  %v3453_v50 = vunpack.c.h.b16 %v3094_v4  ;;  %v3689_v10 = vsel %vm3510_vm4, %v3449_v60, %v3688_v1  ;;  %907 = vst [vmem:[#allocation1] ss:$2 sm:$0xff] %v416_v54  ;;  %v164_v7 = vld [vmem:[#allocation2 + $0x3c0] sm:$0xff]  ;;  %v295_v23 = vld [vmem:[#allocation5 + $0x3d8] sm:$0xff] }
 0x243   :  { %v3454_v42 = vunpack.c.l.b16 %v3095_v29  ;;  %v3683_v47 = vsel %vm3512_vm5, %v3450_v56, %v3682_v5  ;;  %v3455_v45 = vunpack.c.h.b16 %v3095_v29  ;;  %v3690_v25 = vsel %vm3512_vm5, %v3451_v16, %v3689_v10  ;;  %910 = vst [vmem:[#allocation1 + $0x10] ss:$2 sm:$0xff] %v417_v59  ;;  %v292_v60 = vld [vmem:[#allocation5 + $0x3c0] sm:$0xff]  ;;  %v166_v56 = vld [vmem:[#allocation2 + $0x3d0] sm:$0xff] }
 0x244   :  { %v3684_v3 = vsel %vm3514_vm6, %v3452_v21, %v3683_v47  ;;  %v419_v38 = vmul.f32 %v291_v37, %v163_v36  ;;  %v3691_v41 = vsel %vm3514_vm6, %v3453_v50, %v3690_v25  ;;  %913 = vst [vmem:[#allocation1 + $0x20] ss:$2 sm:$0xff] %v418_v40  ;;  %v2656_v57 = vsel %vm1199_vm0, %v4994_v2, 0.0 }
 0x245   :  { %v3685_v39 = vsel %vm3516_vm7, %v3454_v42, %v3684_v3  ;;  %v3692_v48 = vsel %vm3516_vm7, %v3455_v45, %v3691_v41  ;;  %v2663_v4 = vsel %vm1199_vm0, %v4996_v17, 0.0  ;;  %v2657_v58 = vrot.slane %v2656_v57, 4  ;;  %v167_v17 = vld [vmem:[#allocation2 + $0x3d8] sm:$0xff] }
 0x246   :  { %916 = vst [vmem:[#allocation1 + $0x30] ss:$2 sm:$0xff] %v419_v38  ;;  %v3747_v0 = vpack.c.b16 %v3692_v48, %v3685_v39  ;;  %v2664_v53 = vrot.slane %v2663_v4, 4  ;;  %v2670_v30 = vsel %vm1199_vm0, %v4998_v22, 0.0  ;;  %v2677_v63 = vsel %vm1199_vm0, %v5000_v18, 0.0 }
 0x247   :  { %v2671_v43 = vrot.slane %v2670_v30, 4  ;;  %v2684_v2 = vsel %vm1199_vm0, %v5002_v62, 0.0  ;;  %v2678_v16 = vrot.slane %v2677_v63, 4  ;;  %v2691_v20 = vsel %vm1199_vm0, %v5006_v11, 0.0 }
 0x248   :  { %3779 = vst [vmem:[#allocation7 + $0x60] sm:$0xff] %v3747_v0  ;;  %v2685_v21 = vrot.slane %v2684_v2, 4  ;;  %v420_v29 = vmul.f32 %v292_v60, %v164_v7  ;;  %v2658_v51 = vadd.f32 %v2657_v58, %v2656_v57  ;;  %v2665_v32 = vadd.f32 %v2664_v53, %v2663_v4 }
 0x249   :  { %v5122_v34 = vld.sshfl [vmem:[#allocation1] sm:$0xff pattern:$0x75316420]  ;;  %v5124_v22 = vld.sshfl [vmem:[#allocation1 + $0x8] sm:$0xff pattern:$0x75316420]  ;;  %v2672_v54 = vadd.f32 %v2671_v43, %v2670_v30  ;;  %v421_v62 = vmul.f32 %v293_v13, %v165_v12  ;;  %v2679_v37 = vadd.f32 %v2678_v16, %v2677_v63  ;;  %v422_v11 = vmul.f32 %v294_v55, %v166_v56 }
 0x24a   :  { %v5126_v18 = vld.sshfl [vmem:[#allocation1 + $0x10] sm:$0xff pattern:$0x75316420]  ;;  %v5128_v36 = vld.sshfl [vmem:[#allocation1 + $0x18] sm:$0xff pattern:$0x75316420]  ;;  %v2686_v5 = vadd.f32 %v2685_v21, %v2684_v2  ;;  %v423_v42 = vmul.f32 %v295_v23, %v167_v17 }
 0x24b   :  { %v5130_v1 = vld.sshfl [vmem:[#allocation1 + $0x20] sm:$0xff pattern:$0x75316420]  ;;  %v5132_v59 = vld.sshfl [vmem:[#allocation1 + $0x28] sm:$0xff pattern:$0x75316420] }
 0x24c   :  { %919 = vst [vmem:[#allocation1] ss:$2 sm:$0xff] %v420_v29  ;;  %v2659_v47 = vrot.slane %v2658_v51, 2  ;;  %v2666_v10 = vrot.slane %v2665_v32, 2  ;;  %v2673_v45 = vrot.slane %v2672_v54, 2  ;;  %v2680_v3 = vrot.slane %v2679_v37, 2 }
 0x24d   :  { %v5134_v40 = vld.sshfl [vmem:[#allocation1 + $0x30] sm:$0xff pattern:$0x75316420]  ;;  %v5136_v50 = vld.sshfl [vmem:[#allocation1 + $0x38] sm:$0xff pattern:$0x75316420] }
 0x24e   :  { %922 = vst [vmem:[#allocation1 + $0x10] ss:$2 sm:$0xff] %v421_v62  ;;  %v2687_v25 = vrot.slane %v2686_v5, 2  ;;  %v2692_v38 = vrot.slane %v2691_v20, 4  ;;  %v2698_v39 = vsel %vm1199_vm0, %v5008_v8, 0.0  ;;  %v2705_v41 = vsel %vm1199_vm0, %v5012_v9, 0.0 }
 0x24f   :  { %925 = vst [vmem:[#allocation1 + $0x20] ss:$2 sm:$0xff] %v422_v11  ;;  %v2660_v48 = vadd.f32 %v2659_v47, %v2658_v51  ;;  %v2667_v57 = vadd.f32 %v2666_v10, %v2665_v32  ;;  %v2674_v4 = vadd.f32 %v2673_v45, %v2672_v54  ;;  %v2681_v0 = vadd.f32 %v2680_v3, %v2679_v37 }
 0x250   :  { %928 = vst [vmem:[#allocation1 + $0x30] ss:$2 sm:$0xff] %v423_v42  ;;  %v2688_v7 = vadd.f32 %v2687_v25, %v2686_v5  ;;  %v2693_v60 = vadd.f32 %v2692_v38, %v2691_v20  ;;  %v2699_v12 = vrot.slane %v2698_v39, 4  ;;  %v2706_v58 = vrot.slane %v2705_v41, 4 }
 0x251   :  { %v2661_v53 = vrot.slane %v2660_v48, 1  ;;  %v2668_v30 = vrot.slane %v2667_v57, 1  ;;  %v2675_v13 = vrot.slane %v2674_v4, 1  ;;  %v2682_v56 = vrot.slane %v2681_v0, 1 }
 0x252   :  { %v2689_v55 = vrot.slane %v2688_v7, 1  ;;  %v2694_v43 = vrot.slane %v2693_v60, 2  ;;  %v2700_v23 = vadd.f32 %v2699_v12, %v2698_v39  ;;  %v2707_v16 = vadd.f32 %v2706_v58, %v2705_v41 }
 0x253   :  { %v2662_v8 = vadd.f32 %v2661_v53, %v2660_v48  ;;  %v2669_v63 = vadd.f32 %v2668_v30, %v2667_v57  ;;  %v2676_v2 = vadd.f32 %v2675_v13, %v2674_v4  ;;  %v2683_v9 = vadd.f32 %v2682_v56, %v2681_v0 }
 0x254   :  { %v2695_v17 = vadd.f32 %v2694_v43, %v2693_v60  ;;  %v2690_v20 = vadd.f32 %v2689_v55, %v2688_v7  ;;  %v2701_v5 = vrot.slane %v2700_v23, 2  ;;  %v2708_v11 = vrot.slane %v2707_v16, 2 }
 0x255   :  { %v5142_v21 = vpack.c.bf16 %v2669_v63, %v2662_v8  ;;  %v5144_v29 = vpack.c.bf16 %v2683_v9, %v2676_v2  ;;  %v2712_v42 = vsel %vm1199_vm0, %v5036_v61, 0.0  ;;  %v2719_v10 = vsel %vm1199_vm0, %v5038_v52, 0.0 }
 0x256   :  { %v2696_v37 = vrot.slane %v2695_v17, 1  ;;  %v2713_v47 = vrot.slane %v2712_v42, 4  ;;  %v2726_v45 = vsel %vm1199_vm0, %v5040_v27, 0.0  ;;  %v2733_v3 = vsel %vm1199_vm0, %v5042_v19, 0.0 }
 0x257   :  { %v3456_v51 = vunpack.c.l.b16 %v5142_v21  ;;  %v3457_v32 = vunpack.c.h.b16 %v5142_v21  ;;  %v3458_v54 = vunpack.c.l.b16 %v5144_v29  ;;  %v3459_v62 = vunpack.c.h.b16 %v5144_v29 }
 0x258   :  { %v2697_v25 = vadd.f32 %v2696_v37, %v2695_v17  ;;  %v2702_v38 = vadd.f32 %v2701_v5, %v2700_v23  ;;  %v2709_v39 = vadd.f32 %v2708_v11, %v2707_v16  ;;  %v2720_v41 = vrot.slane %v2719_v10, 4 }
 0x259   :  { %v2714_v48 = vadd.f32 %v2713_v47, %v2712_v42  ;;  %v2727_v57 = vrot.slane %v2726_v45, 4  ;;  %v2734_v4 = vrot.slane %v2733_v3, 4  ;;  %v2740_v61 = vsel %vm1199_vm0, %v5044_v15, 0.0 }
 0x25a   :  { %v2703_v0 = vrot.slane %v2702_v38, 1  ;;  %v2710_v7 = vrot.slane %v2709_v39, 1  ;;  %v2721_v60 = vadd.f32 %v2720_v41, %v2719_v10  ;;  %v2741_v52 = vrot.slane %v2740_v61, 4 }
 0x25b   :  { %v2715_v12 = vrot.slane %v2714_v48, 2  ;;  %v2728_v58 = vadd.f32 %v2727_v57, %v2726_v45  ;;  %v2735_v27 = vadd.f32 %v2734_v4, %v2733_v3  ;;  %v2747_v19 = vsel %vm1199_vm0, %v5046_v35, 0.0 }
 0x25c   :  { %v2704_v53 = vadd.f32 %v2703_v0, %v2702_v38  ;;  %v2711_v30 = vadd.f32 %v2710_v7, %v2709_v39  ;;  %v2722_v13 = vrot.slane %v2721_v60, 2  ;;  %v2742_v56 = vadd.f32 %v2741_v52, %v2740_v61 }
 0x25d   :  { %v2716_v55 = vadd.f32 %v2715_v12, %v2714_v48  ;;  %v2729_v43 = vrot.slane %v2728_v58, 2  ;;  %v2736_v8 = vrot.slane %v2735_v27, 2  ;;  %v2748_v63 = vrot.slane %v2747_v19, 4 }
 0x25e   :  { %v2723_v2 = vadd.f32 %v2722_v13, %v2721_v60  ;;  %v2743_v15 = vrot.slane %v2742_v56, 2  ;;  %v2754_v9 = vsel %vm1199_vm0, %v5048_v33, 0.0  ;;  %v2761_v17 = vsel %vm1199_vm0, %v5050_v28, 0.0 }
 0x25f   :  { %v2717_v23 = vrot.slane %v2716_v55, 1  ;;  %v2730_v16 = vadd.f32 %v2729_v43, %v2728_v58  ;;  %v2737_v37 = vadd.f32 %v2736_v8, %v2735_v27  ;;  %v2749_v35 = vadd.f32 %v2748_v63, %v2747_v19  ;;  %v168_v8 = vld [vmem:[#allocation2 + $0x3e0] sm:$0xff] }
 0x260   :  { %v2724_v5 = vrot.slane %v2723_v2, 1  ;;  %v2744_v11 = vadd.f32 %v2743_v15, %v2742_v56  ;;  %v2755_v42 = vrot.slane %v2754_v9, 4  ;;  %v2762_v47 = vrot.slane %v2761_v17, 4  ;;  %v296_v63 = vld [vmem:[#allocation5 + $0x3e0] sm:$0xff] }
 0x261   :  { %v2718_v10 = vadd.f32 %v2717_v23, %v2716_v55  ;;  %v2731_v45 = vrot.slane %v2730_v16, 1  ;;  %v2738_v3 = vrot.slane %v2737_v37, 1  ;;  %v2750_v38 = vrot.slane %v2749_v35, 2 }
 0x262   :  { %v2725_v39 = vadd.f32 %v2724_v5, %v2723_v2  ;;  %v2745_v41 = vrot.slane %v2744_v11, 1  ;;  %v2756_v48 = vadd.f32 %v2755_v42, %v2754_v9  ;;  %v2763_v57 = vadd.f32 %v2762_v47, %v2761_v17  ;;  %v5166_v2 = vld.sshfl [vmem:[#allocation1] sm:$0xff pattern:$0x75316420]  ;;  %v169_v47 = vld [vmem:[#allocation2 + $0x3e8] sm:$0xff] }
 0x263   :  { %v2732_v33 = vadd.f32 %v2731_v45, %v2730_v16  ;;  %v2739_v4 = vadd.f32 %v2738_v3, %v2737_v37  ;;  %v2751_v61 = vadd.f32 %v2750_v38, %v2749_v35  ;;  %v3098_v28 = vpack.c.bf16 %v2697_v25, %v2690_v20  ;;  %v5168_v25 = vld.sshfl [vmem:[#allocation1 + $0x8] sm:$0xff pattern:$0x75316420]  ;;  %v5170_v37 = vld.sshfl [vmem:[#allocation1 + $0x10] sm:$0xff pattern:$0x75316420] }
 0x264   :  { %v2746_v0 = vadd.f32 %v2745_v41, %v2744_v11  ;;  %v2757_v7 = vrot.slane %v2756_v48, 2  ;;  %v2764_v60 = vrot.slane %v2763_v57, 2  ;;  %v3099_v52 = vpack.c.bf16 %v2711_v30, %v2704_v53  ;;  %v170_v45 = vld [vmem:[#allocation2 + $0x3f0] sm:$0xff] }
 0x265   :  { %v2752_v12 = vrot.slane %v2751_v61, 1  ;;  %v3100_v58 = vpack.c.bf16 %v2725_v39, %v2718_v10  ;;  %v3101_v27 = vpack.c.bf16 %v2739_v4, %v2732_v33  ;;  %v3460_v19 = vunpack.c.l.b16 %v3098_v28  ;;  %v297_v10 = vld [vmem:[#allocation5 + $0x3e8] sm:$0xff]  ;;  %v299_v33 = vld [vmem:[#allocation5 + $0x3f8] sm:$0xff]  ;;  %v5190_v4 = vld.sshfl [vmem:[#allocation1 + $0x28] sm:$0xff pattern:$0x75316420] }
 0x266   :  { %v2758_v13 = vadd.f32 %v2757_v7, %v2756_v48  ;;  %v2765_v56 = vadd.f32 %v2764_v60, %v2763_v57  ;;  %v3461_v55 = vunpack.c.h.b16 %v3098_v28  ;;  %v3462_v43 = vunpack.c.l.b16 %v3099_v52  ;;  %v298_v48 = vld [vmem:[#allocation5 + $0x3f0] sm:$0xff]  ;;  %v171_v57 = vld [vmem:[#allocation2 + $0x3f8] sm:$0xff]  ;;  %v5194_v60 = vld.sshfl [vmem:[#allocation1 + $0x30] sm:$0xff pattern:$0x75316420] }
 0x267   :  { %v2753_v15 = vadd.f32 %v2752_v12, %v2751_v61  ;;  %v3463_v9 = vunpack.c.h.b16 %v3099_v52  ;;  %v3464_v17 = vunpack.c.l.b16 %v3100_v58  ;;  %v3465_v20 = vunpack.c.h.b16 %v3100_v58  ;;  %v5196_v52 = vld.sshfl [vmem:[#allocation1 + $0x38] sm:$0xff pattern:$0x75316420] }
 0x268   :  { %v2759_v23 = vrot.slane %v2758_v13, 1  ;;  %v2766_v53 = vrot.slane %v2765_v56, 1  ;;  %v3466_v30 = vunpack.c.l.b16 %v3101_v27  ;;  %v3467_v16 = vunpack.c.h.b16 %v3101_v27 }
 0x269   :  { %v3102_v35 = vpack.c.bf16 %v2753_v15, %v2746_v0  ;;  %v3693_v5 = vsel %vm3504_vm1, %v3458_v54, %v3456_v51  ;;  %v3700_v11 = vsel %vm3504_vm1, %v3459_v62, %v3457_v32  ;;  %v424_v42 = vmul.f32 %v296_v63, %v168_v8  ;;  %v5184_v51 = vld.sshfl [vmem:[#allocation1 + $0x18] sm:$0xff pattern:$0x75316420]  ;;  %v5188_v62 = vld.sshfl [vmem:[#allocation1 + $0x20] sm:$0xff pattern:$0x75316420] }
 0x26a   :  { %v2760_v3 = vadd.f32 %v2759_v23, %v2758_v13  ;;  %v2767_v38 = vadd.f32 %v2766_v53, %v2765_v56  ;;  %v3694_v39 = vsel %vm3506_vm2, %v3460_v19, %v3693_v5  ;;  %v3701_v41 = vsel %vm3506_vm2, %v3461_v55, %v3700_v11 }
 0x26b   :  { %v3468_v21 = vunpack.c.l.b16 %v3102_v35  ;;  %v3469_v54 = vunpack.c.h.b16 %v3102_v35  ;;  %v3695_v29 = vsel %vm3508_vm3, %v3462_v43, %v3694_v39  ;;  %v3702_v32 = vsel %vm3508_vm3, %v3463_v9, %v3701_v41  ;;  %931 = vst [vmem:[#allocation1] ss:$2 sm:$0xff] %v424_v42 }
 0x26c   :  { %v3103_v61 = vpack.c.bf16 %v2767_v38, %v2760_v3  ;;  %v3696_v28 = vsel %vm3510_vm4, %v3464_v17, %v3695_v29  ;;  %v3703_v0 = vsel %vm3510_vm4, %v3465_v20, %v3702_v32  ;;  %v425_v7 = vmul.f32 %v297_v10, %v169_v47 }
 0x26d   :  { %v3697_v12 = vsel %vm3512_vm5, %v3466_v30, %v3696_v28  ;;  %v3704_v58 = vsel %vm3512_vm5, %v3467_v16, %v3703_v0  ;;  %v426_v27 = vmul.f32 %v298_v48, %v170_v45  ;;  %v427_v19 = vmul.f32 %v299_v33, %v171_v57 }
 0x26e   :  { %v3470_v13 = vunpack.c.l.b16 %v3103_v61  ;;  %v3471_v56 = vunpack.c.h.b16 %v3103_v61  ;;  %v3698_v55 = vsel %vm3514_vm6, %v3468_v21, %v3697_v12  ;;  %v3705_v43 = vsel %vm3514_vm6, %v3469_v54, %v3704_v58  ;;  %934 = vst [vmem:[#allocation1 + $0x10] ss:$2 sm:$0xff] %v425_v7 }
 0x26f   :  { %937 = vst [vmem:[#allocation1 + $0x20] ss:$2 sm:$0xff] %v426_v27  ;;  %v2768_v8 = vsel %vm1199_vm0, %v5080_v46, 0.0  ;;  %v2775_v63 = vsel %vm1199_vm0, %v5082_v26, 0.0  ;;  %v2782_v15 = vsel %vm1199_vm0, %v5085_v14, 0.0  ;;  %v2789_v9 = vsel %vm1199_vm0, %v5087_v44, 0.0 }
 0x270   :  { %v3699_v17 = vsel %vm3516_vm7, %v3470_v13, %v3698_v55  ;;  %v3706_v20 = vsel %vm3516_vm7, %v3471_v56, %v3705_v43  ;;  %940 = vst [vmem:[#allocation1 + $0x30] ss:$2 sm:$0xff] %v427_v19  ;;  %v2769_v23 = vrot.slane %v2768_v8, 4  ;;  %v2776_v53 = vrot.slane %v2775_v63, 4 }
 0x271   :  { %v3748_v30 = vpack.c.b16 %v3706_v20, %v3699_v17  ;;  %v2783_v16 = vrot.slane %v2782_v15, 4  ;;  %v2790_v35 = vrot.slane %v2789_v9, 4  ;;  %v2796_v46 = vsel %vm1199_vm0, %v5091_v49, 0.0 }
 0x272   :  { %v2770_v26 = vadd.f32 %v2769_v23, %v2768_v8  ;;  %v2777_v5 = vadd.f32 %v2776_v53, %v2775_v63  ;;  %v2797_v11 = vrot.slane %v2796_v46, 4  ;;  %v2803_v14 = vsel %vm1199_vm0, %v5095_v24, 0.0 }
 0x273   :  { %3780 = vst [vmem:[#allocation7 + $0x68] sm:$0xff] %v3748_v30  ;;  %v2784_v44 = vadd.f32 %v2783_v16, %v2782_v15  ;;  %v2791_v42 = vadd.f32 %v2790_v35, %v2789_v9  ;;  %v2804_v47 = vrot.slane %v2803_v14, 4  ;;  %v2810_v10 = vsel %vm1199_vm0, %v5097_v31, 0.0 }
 0x274   :  { %v2771_v45 = vrot.slane %v2770_v26, 2  ;;  %v2778_v3 = vrot.slane %v2777_v5, 2  ;;  %v2798_v38 = vadd.f32 %v2797_v11, %v2796_v46  ;;  %v2811_v39 = vrot.slane %v2810_v10, 4 }
 0x275   :  { %v2785_v41 = vrot.slane %v2784_v44, 2  ;;  %v2792_v48 = vrot.slane %v2791_v42, 2  ;;  %v2805_v49 = vadd.f32 %v2804_v47, %v2803_v14  ;;  %v2817_v57 = vsel %vm1199_vm0, %v5101_v6, 0.0 }
 0x276   :  { %v2772_v33 = vadd.f32 %v2771_v45, %v2770_v26  ;;  %v2779_v21 = vadd.f32 %v2778_v3, %v2777_v5  ;;  %v2799_v24 = vrot.slane %v2798_v38, 2  ;;  %v2812_v54 = vadd.f32 %v2811_v39, %v2810_v10 }
 0x277   :  { %v2786_v29 = vadd.f32 %v2785_v41, %v2784_v44  ;;  %v2793_v32 = vadd.f32 %v2792_v48, %v2791_v42  ;;  %v2806_v61 = vrot.slane %v2805_v49, 2  ;;  %v2818_v28 = vrot.slane %v2817_v57, 4 }
 0x278   :  { %v2773_v0 = vrot.slane %v2772_v33, 1  ;;  %v2780_v31 = vrot.slane %v2779_v21, 1  ;;  %v2800_v7 = vadd.f32 %v2799_v24, %v2798_v38  ;;  %v2813_v12 = vrot.slane %v2812_v54, 2 }
 0x279   :  { %v2787_v58 = vrot.slane %v2786_v29, 1  ;;  %v2794_v27 = vrot.slane %v2793_v32, 1  ;;  %v2807_v19 = vadd.f32 %v2806_v61, %v2805_v49  ;;  %v2819_v13 = vadd.f32 %v2818_v28, %v2817_v57 }
 0x27a   :  { %v2774_v56 = vadd.f32 %v2773_v0, %v2772_v33  ;;  %v2781_v55 = vadd.f32 %v2780_v31, %v2779_v21  ;;  %v2801_v43 = vrot.slane %v2800_v7, 1  ;;  %v2814_v6 = vadd.f32 %v2813_v12, %v2812_v54 }
 0x27b   :  { %v2788_v8 = vadd.f32 %v2787_v58, %v2786_v29  ;;  %v2795_v63 = vadd.f32 %v2794_v27, %v2793_v32  ;;  %v2808_v15 = vrot.slane %v2807_v19, 1  ;;  %v2820_v9 = vrot.slane %v2819_v13, 2 }
 0x27c   :  { %v2802_v17 = vadd.f32 %v2801_v43, %v2800_v7  ;;  %v2815_v20 = vrot.slane %v2814_v6, 1  ;;  %v2824_v23 = vsel %vm1199_vm0, %v5122_v34, 0.0  ;;  %v2831_v53 = vsel %vm1199_vm0, %v5124_v22, 0.0 }
 0x27d   :  { %v2809_v30 = vadd.f32 %v2808_v15, %v2807_v19  ;;  %v2821_v16 = vadd.f32 %v2820_v9, %v2819_v13  ;;  %v2825_v35 = vrot.slane %v2824_v23, 4  ;;  %v2832_v46 = vrot.slane %v2831_v53, 4 }
 0x27e   :  { %v2816_v26 = vadd.f32 %v2815_v20, %v2814_v6  ;;  %v2838_v5 = vsel %vm1199_vm0, %v5126_v18, 0.0  ;;  %v2845_v11 = vsel %vm1199_vm0, %v5128_v36, 0.0  ;;  %v2852_v14 = vsel %vm1199_vm0, %v5130_v1, 0.0 }
 0x27f   :  { %v2822_v44 = vrot.slane %v2821_v16, 1  ;;  %v2826_v42 = vadd.f32 %v2825_v35, %v2824_v23  ;;  %v2833_v34 = vadd.f32 %v2832_v46, %v2831_v53  ;;  %v2839_v47 = vrot.slane %v2838_v5, 4 }
 0x280   :  { %v2846_v10 = vrot.slane %v2845_v11, 4  ;;  %v2853_v22 = vrot.slane %v2852_v14, 4  ;;  %v2859_v45 = vsel %vm1199_vm0, %v5132_v59, 0.0  ;;  %v2866_v3 = vsel %vm1199_vm0, %v5134_v40, 0.0 }
 0x281   :  { %v2823_v38 = vadd.f32 %v2822_v44, %v2821_v16  ;;  %v2827_v18 = vrot.slane %v2826_v42, 2  ;;  %v2834_v39 = vrot.slane %v2833_v34, 2  ;;  %v2840_v41 = vadd.f32 %v2839_v47, %v2838_v5 }
 0x282   :  { %v2847_v36 = vadd.f32 %v2846_v10, %v2845_v11  ;;  %v2854_v48 = vadd.f32 %v2853_v22, %v2852_v14  ;;  %v2860_v49 = vrot.slane %v2859_v45, 4  ;;  %v2867_v1 = vrot.slane %v2866_v3, 4 }
 0x283   :  { %v2828_v57 = vadd.f32 %v2827_v18, %v2826_v42  ;;  %v2835_v33 = vadd.f32 %v2834_v39, %v2833_v34  ;;  %v2841_v21 = vrot.slane %v2840_v41, 2  ;;  %v2873_v24 = vsel %vm1199_vm0, %v5136_v50, 0.0 }
 0x284   :  { %v2848_v54 = vrot.slane %v2847_v36, 2  ;;  %v2855_v29 = vrot.slane %v2854_v48, 2  ;;  %v2861_v59 = vadd.f32 %v2860_v49, %v2859_v45  ;;  %v2868_v32 = vadd.f32 %v2867_v1, %v2866_v3 }
 0x285   :  { %v2829_v61 = vrot.slane %v2828_v57, 1  ;;  %v2836_v40 = vrot.slane %v2835_v33, 1  ;;  %v2842_v28 = vadd.f32 %v2841_v21, %v2840_v41  ;;  %v2874_v0 = vrot.slane %v2873_v24, 4 }
 0x286   :  { %v2849_v31 = vadd.f32 %v2848_v54, %v2847_v36  ;;  %v2856_v7 = vadd.f32 %v2855_v29, %v2854_v48  ;;  %v2862_v12 = vrot.slane %v2861_v59, 2  ;;  %v2869_v58 = vrot.slane %v2868_v32, 2 }
 0x287   :  { %v2830_v27 = vadd.f32 %v2829_v61, %v2828_v57  ;;  %v2837_v19 = vadd.f32 %v2836_v40, %v2835_v33  ;;  %v2843_v13 = vrot.slane %v2842_v28, 1  ;;  %v2875_v43 = vadd.f32 %v2874_v0, %v2873_v24 }
 0x288   :  { %v2850_v6 = vrot.slane %v2849_v31, 1  ;;  %v2857_v15 = vrot.slane %v2856_v7, 1  ;;  %v2863_v9 = vadd.f32 %v2862_v12, %v2861_v59  ;;  %v2870_v50 = vadd.f32 %v2869_v58, %v2868_v32 }
 0x289   :  { %v2844_v20 = vadd.f32 %v2843_v13, %v2842_v28  ;;  %v2876_v23 = vrot.slane %v2875_v43, 2  ;;  %v3104_v53 = vpack.c.bf16 %v2781_v55, %v2774_v56  ;;  %v3105_v16 = vpack.c.bf16 %v2795_v63, %v2788_v8 }
 0x28a   :  { %v2851_v35 = vadd.f32 %v2850_v6, %v2849_v31  ;;  %v2858_v46 = vadd.f32 %v2857_v15, %v2856_v7  ;;  %v2864_v5 = vrot.slane %v2863_v9, 1  ;;  %v2871_v11 = vrot.slane %v2870_v50, 1 }
 0x28b   :  { %v2877_v14 = vadd.f32 %v2876_v23, %v2875_v43  ;;  %v3106_v44 = vpack.c.bf16 %v2809_v30, %v2802_v17  ;;  %v3107_v42 = vpack.c.bf16 %v2823_v38, %v2816_v26  ;;  %v3108_v34 = vpack.c.bf16 %v2837_v19, %v2830_v27 }
 0x28c   :  { %v2865_v47 = vadd.f32 %v2864_v5, %v2863_v9  ;;  %v2872_v10 = vadd.f32 %v2871_v11, %v2870_v50  ;;  %v3109_v22 = vpack.c.bf16 %v2851_v35, %v2844_v20  ;;  %v3472_v45 = vunpack.c.l.b16 %v3104_v53 }
 0x28d   :  { %v2878_v3 = vrot.slane %v2877_v14, 1  ;;  %v3473_v18 = vunpack.c.h.b16 %v3104_v53  ;;  %v3474_v39 = vunpack.c.l.b16 %v3105_v16  ;;  %v3475_v41 = vunpack.c.h.b16 %v3105_v16 }
 0x28e   :  { %v3110_v36 = vpack.c.bf16 %v2865_v47, %v2858_v46  ;;  %v3476_v48 = vunpack.c.l.b16 %v3106_v44  ;;  %v3477_v56 = vunpack.c.h.b16 %v3106_v44  ;;  %v3478_v55 = vunpack.c.l.b16 %v3107_v42  ;;  %v932_v47 = vld.sshfl [vmem:[#allocation1] sm:$0xff pattern:$0x75316420] }
 0x28f   :  { %v2879_v8 = vadd.f32 %v2878_v3, %v2877_v14  ;;  %v3479_v63 = vunpack.c.h.b16 %v3107_v42  ;;  %v3480_v49 = vunpack.c.l.b16 %v3108_v34  ;;  %v3481_v1 = vunpack.c.h.b16 %v3108_v34 }
 0x290   :  { %v3482_v57 = vunpack.c.l.b16 %v3109_v22  ;;  %v3483_v17 = vunpack.c.h.b16 %v3109_v22  ;;  %v3484_v30 = vunpack.c.l.b16 %v3110_v36  ;;  %v3485_v26 = vunpack.c.h.b16 %v3110_v36 }
 0x291   :  { %v3111_v38 = vpack.c.bf16 %v2879_v8, %v2872_v10  ;;  %v3707_v33 = vsel %vm3504_vm1, %v3474_v39, %v3472_v45  ;;  %v3714_v21 = vsel %vm3504_vm1, %v3475_v41, %v3473_v18  ;;  %v2880_v24 = vsel %vm1199_vm0, %v5166_v2, 0.0 }
 0x292   :  { %v3708_v54 = vsel %vm3506_vm2, %v3476_v48, %v3707_v33  ;;  %v3715_v29 = vsel %vm3506_vm2, %v3477_v56, %v3714_v21  ;;  %v2881_v59 = vrot.slane %v2880_v24, 4  ;;  %v2887_v32 = vsel %vm1199_vm0, %v5168_v25, 0.0 }
 0x293   :  { %v3486_v61 = vunpack.c.l.b16 %v3111_v38  ;;  %v3487_v40 = vunpack.c.h.b16 %v3111_v38  ;;  %v3709_v28 = vsel %vm3508_vm3, %v3478_v55, %v3708_v54  ;;  %v3716_v0 = vsel %vm3508_vm3, %v3479_v63, %v3715_v29  ;;  %v936_v38 = vld.sshfl [vmem:[#allocation1 + $0x18] sm:$0xff pattern:$0x75316420] }
 0x294   :  { %v3710_v31 = vsel %vm3510_vm4, %v3480_v49, %v3709_v28  ;;  %v3717_v7 = vsel %vm3510_vm4, %v3481_v1, %v3716_v0  ;;  %v2882_v12 = vadd.f32 %v2881_v59, %v2880_v24  ;;  %v2888_v2 = vrot.slane %v2887_v32, 4  ;;  %v935_v1 = vld.sshfl [vmem:[#allocation1 + $0x10] sm:$0xff pattern:$0x75316420] }
 0x295   :  { %v3711_v58 = vsel %vm3512_vm5, %v3482_v57, %v3710_v31  ;;  %v3718_v27 = vsel %vm3512_vm5, %v3483_v17, %v3717_v7  ;;  %v2894_v19 = vsel %vm1199_vm0, %v5170_v37, 0.0  ;;  %v2901_v25 = vsel %vm1199_vm0, %v5184_v51, 0.0  ;;  %v939_v7 = vld.sshfl [vmem:[#allocation1 + $0x28] sm:$0xff pattern:$0x75316420] }
 0x296   :  { %v3712_v13 = vsel %vm3514_vm6, %v3484_v30, %v3711_v58  ;;  %v3719_v43 = vsel %vm3514_vm6, %v3485_v26, %v3718_v27  ;;  %v2883_v6 = vrot.slane %v2882_v12, 2  ;;  %v2889_v15 = vadd.f32 %v2888_v2, %v2887_v32 }
 0x297   :  { %v3713_v9 = vsel %vm3516_vm7, %v3486_v61, %v3712_v13  ;;  %v3720_v50 = vsel %vm3516_vm7, %v3487_v40, %v3719_v43  ;;  %v2895_v20 = vrot.slane %v2894_v19, 4  ;;  %v2902_v23 = vrot.slane %v2901_v25, 4  ;;  %v938_v61 = vld.sshfl [vmem:[#allocation1 + $0x20] sm:$0xff pattern:$0x75316420] }
 0x298   :  { %v3749_v53 = vpack.c.b16 %v3720_v50, %v3713_v9  ;;  %v2884_v16 = vadd.f32 %v2883_v6, %v2882_v12  ;;  %v2890_v35 = vrot.slane %v2889_v15, 2  ;;  %v2908_v37 = vsel %vm1199_vm0, %v5188_v62, 0.0 }
 0x299   :  { %v2896_v46 = vadd.f32 %v2895_v20, %v2894_v19  ;;  %v2903_v51 = vadd.f32 %v2902_v23, %v2901_v25  ;;  %v2909_v5 = vrot.slane %v2908_v37, 4  ;;  %v2915_v11 = vsel %vm1199_vm0, %v5190_v4, 0.0  ;;  %v933_v4 = vld.sshfl [vmem:[#allocation1 + $0x8] sm:$0xff pattern:$0x75316420] }
 0x29a   :  { %3781 = vst [vmem:[#allocation7 + $0x70] sm:$0xff] %v3749_v53  ;;  %v2885_v14 = vrot.slane %v2884_v16, 1  ;;  %v2891_v44 = vadd.f32 %v2890_v35, %v2889_v15  ;;  %v2916_v42 = vrot.slane %v2915_v11, 4  ;;  %v2922_v34 = vsel %vm1199_vm0, %v5194_v60, 0.0 }
 0x29b   :  { %v2897_v10 = vrot.slane %v2896_v46, 2  ;;  %v2904_v22 = vrot.slane %v2903_v51, 2  ;;  %v2910_v45 = vadd.f32 %v2909_v5, %v2908_v37  ;;  %v2923_v3 = vrot.slane %v2922_v34, 4  ;;  %v941_v19 = vld.sshfl [vmem:[#allocation1 + $0x30] sm:$0xff pattern:$0x75316420] }
 0x29c   :  { %v5264_v18 = vadd.f32 %v2885_v14, %v2884_v16  ;;  %v2892_v62 = vrot.slane %v2891_v44, 1  ;;  %v2917_v39 = vadd.f32 %v2916_v42, %v2915_v11  ;;  %v2929_v41 = vsel %vm1199_vm0, %v5196_v52, 0.0  ;;  %v942_v37 = vld.sshfl [vmem:[#allocation1 + $0x38] sm:$0xff pattern:$0x75316420] }
 0x29d   :  { %v2898_v36 = vadd.f32 %v2897_v10, %v2896_v46  ;;  %v2905_v48 = vadd.f32 %v2904_v22, %v2903_v51  ;;  %v2911_v56 = vrot.slane %v2910_v45, 2  ;;  %v2924_v55 = vadd.f32 %v2923_v3, %v2922_v34 }
 0x29e   :  { %v5268_v8 = vadd.f32 %v2892_v62, %v2891_v44  ;;  %v2918_v60 = vrot.slane %v2917_v39, 2  ;;  %v2930_v63 = vrot.slane %v2929_v41, 4  ;;  %v2936_v49 = vsel %vm1199_vm0, %v932_v47, 0.0 }
 0x29f   :  { %v2899_v57 = vrot.slane %v2898_v36, 1  ;;  %v2906_v17 = vrot.slane %v2905_v48, 1  ;;  %v2912_v30 = vadd.f32 %v2911_v56, %v2910_v45  ;;  %v2925_v26 = vrot.slane %v2924_v55, 2 }
 0x2a0   :  { %v2919_v33 = vadd.f32 %v2918_v60, %v2917_v39  ;;  %v2931_v21 = vadd.f32 %v2930_v63, %v2929_v41  ;;  %v2937_v52 = vrot.slane %v2936_v49, 4  ;;  %v2943_v24 = vsel %vm1199_vm0, %v933_v4, 0.0 }
 0x2a1   :  { %v2900_v54 = vadd.f32 %v2899_v57, %v2898_v36  ;;  %v2907_v29 = vadd.f32 %v2906_v17, %v2905_v48  ;;  %v2913_v59 = vrot.slane %v2912_v30, 1  ;;  %v2926_v32 = vadd.f32 %v2925_v26, %v2924_v55 }
 0x2a2   :  { %v2920_v40 = vrot.slane %v2919_v33, 1  ;;  %v2932_v28 = vrot.slane %v2931_v21, 2  ;;  %v2938_v0 = vadd.f32 %v2937_v52, %v2936_v49  ;;  %v2944_v31 = vrot.slane %v2943_v24, 4 }
 0x2a3   :  { %v2914_v12 = vadd.f32 %v2913_v59, %v2912_v30  ;;  %v2927_v2 = vrot.slane %v2926_v32, 1  ;;  %v2950_v58 = vsel %vm1199_vm0, %v935_v1, 0.0  ;;  %v2957_v27 = vsel %vm1199_vm0, %v936_v38, 0.0 }
 0x2a4   :  { %v2921_v25 = vadd.f32 %v2920_v40, %v2919_v33  ;;  %v2933_v13 = vadd.f32 %v2932_v28, %v2931_v21  ;;  %v2939_v43 = vrot.slane %v2938_v0, 2  ;;  %v2945_v6 = vadd.f32 %v2944_v31, %v2943_v24 }
 0x2a5   :  { %v2928_v15 = vadd.f32 %v2927_v2, %v2926_v32  ;;  %v2951_v9 = vrot.slane %v2950_v58, 4  ;;  %v2958_v50 = vrot.slane %v2957_v27, 4  ;;  %v2964_v20 = vsel %vm1199_vm0, %v938_v61, 0.0 }
 0x2a6   :  { %v2934_v23 = vrot.slane %v2933_v13, 1  ;;  %v2940_v53 = vadd.f32 %v2939_v43, %v2938_v0  ;;  %v2946_v16 = vrot.slane %v2945_v6, 2  ;;  %v2965_v35 = vrot.slane %v2964_v20, 4 }
 0x2a7   :  { %v2952_v46 = vadd.f32 %v2951_v9, %v2950_v58  ;;  %v2959_v51 = vadd.f32 %v2958_v50, %v2957_v27  ;;  %v2971_v5 = vsel %vm1199_vm0, %v939_v7, 0.0  ;;  %v2978_v11 = vsel %vm1199_vm0, %v941_v19, 0.0 }
 0x2a8   :  { %v2935_v14 = vadd.f32 %v2934_v23, %v2933_v13  ;;  %v2941_v44 = vrot.slane %v2940_v53, 1  ;;  %v2947_v42 = vadd.f32 %v2946_v16, %v2945_v6  ;;  %v2966_v34 = vadd.f32 %v2965_v35, %v2964_v20 }
 0x2a9   :  { %v2953_v47 = vrot.slane %v2952_v46, 2  ;;  %v2960_v10 = vrot.slane %v2959_v51, 2  ;;  %v2972_v22 = vrot.slane %v2971_v5, 4  ;;  %v2979_v45 = vrot.slane %v2978_v11, 4 }
 0x2aa   :  { %v2942_v3 = vadd.f32 %v2941_v44, %v2940_v53  ;;  %v2948_v62 = vrot.slane %v2947_v42, 1  ;;  %v2967_v39 = vrot.slane %v2966_v34, 2  ;;  %v2985_v41 = vsel %vm1199_vm0, %v942_v37, 0.0 }
 0x2ab   :  { %v2954_v4 = vadd.f32 %v2953_v47, %v2952_v46  ;;  %v2961_v36 = vadd.f32 %v2960_v10, %v2959_v51  ;;  %v2973_v48 = vadd.f32 %v2972_v22, %v2971_v5  ;;  %v2980_v56 = vadd.f32 %v2979_v45, %v2978_v11 }
 0x2ac   :  { %v2949_v55 = vadd.f32 %v2948_v62, %v2947_v42  ;;  %v2968_v60 = vadd.f32 %v2967_v39, %v2966_v34  ;;  %v2986_v63 = vrot.slane %v2985_v41, 4  ;;  %v3112_v49 = vpack.c.bf16 %v5268_v8, %v5264_v18 }
 0x2ad   :  { %v2955_v1 = vrot.slane %v2954_v4, 1  ;;  %v2962_v57 = vrot.slane %v2961_v36, 1  ;;  %v2974_v17 = vrot.slane %v2973_v48, 2  ;;  %v2981_v30 = vrot.slane %v2980_v56, 2 }
 0x2ae   :  { %v2969_v26 = vrot.slane %v2968_v60, 1  ;;  %v2987_v38 = vadd.f32 %v2986_v63, %v2985_v41  ;;  %v3113_v33 = vpack.c.bf16 %v2907_v29, %v2900_v54  ;;  %v3114_v21 = vpack.c.bf16 %v2921_v25, %v2914_v12 }
 0x2af   :  { %v2956_v52 = vadd.f32 %v2955_v1, %v2954_v4  ;;  %v2963_v24 = vadd.f32 %v2962_v57, %v2961_v36  ;;  %v2975_v59 = vadd.f32 %v2974_v17, %v2973_v48  ;;  %v2982_v32 = vadd.f32 %v2981_v30, %v2980_v56 }
 0x2b0   :  { %v2970_v61 = vadd.f32 %v2969_v26, %v2968_v60  ;;  %v2988_v40 = vrot.slane %v2987_v38, 2  ;;  %v3115_v28 = vpack.c.bf16 %v2935_v14, %v2928_v15  ;;  %v3116_v0 = vpack.c.bf16 %v2949_v55, %v2942_v3 }
 0x2b1   :  { %v2976_v31 = vrot.slane %v2975_v59, 1  ;;  %v2983_v7 = vrot.slane %v2982_v32, 1  ;;  %v3117_v2 = vpack.c.bf16 %v2963_v24, %v2956_v52  ;;  %v3488_v18 = vunpack.c.l.b16 %v3112_v49 }
 0x2b2   :  { %v2989_v8 = vadd.f32 %v2988_v40, %v2987_v38  ;;  %v3489_v58 = vunpack.c.h.b16 %v3112_v49  ;;  %v3490_v27 = vunpack.c.l.b16 %v3113_v33  ;;  %v3491_v19 = vunpack.c.h.b16 %v3113_v33 }
 0x2b3   :  { %v2977_v13 = vadd.f32 %v2976_v31, %v2975_v59  ;;  %v3492_v43 = vunpack.c.l.b16 %v3114_v21  ;;  %v3493_v54 = vunpack.c.h.b16 %v3114_v21  ;;  %v2984_v29 = vadd.f32 %v2983_v7, %v2982_v32 }
 0x2b4   :  { %v2990_v12 = vrot.slane %v2989_v8, 1  ;;  %v3494_v25 = vunpack.c.l.b16 %v3115_v28  ;;  %v3495_v6 = vunpack.c.h.b16 %v3115_v28  ;;  %v3496_v50 = vunpack.c.l.b16 %v3116_v0 }
 0x2b5   :  { %v3118_v9 = vpack.c.bf16 %v2977_v13, %v2970_v61  ;;  %v3497_v20 = vunpack.c.h.b16 %v3116_v0  ;;  %v3498_v15 = vunpack.c.l.b16 %v3117_v2  ;;  %v3499_v53 = vunpack.c.h.b16 %v3117_v2 }
 0x2b6   :  { %v2991_v23 = vadd.f32 %v2990_v12, %v2989_v8  ;;  %v3721_v16 = vsel %vm3504_vm1, %v3490_v27, %v3488_v18  ;;  %v3728_v35 = vsel %vm3504_vm1, %v3491_v19, %v3489_v58 }
 0x2b7   :  { %v3722_v37 = vsel %vm3506_vm2, %v3492_v43, %v3721_v16  ;;  %v3729_v46 = vsel %vm3506_vm2, %v3493_v54, %v3728_v35  ;;  %v3500_v14 = vunpack.c.l.b16 %v3118_v9  ;;  %v3501_v44 = vunpack.c.h.b16 %v3118_v9 }
 0x2b8   :  { %v3119_v51 = vpack.c.bf16 %v2991_v23, %v2984_v29  ;;  %v3723_v5 = vsel %vm3508_vm3, %v3494_v25, %v3722_v37  ;;  %v3730_v11 = vsel %vm3508_vm3, %v3495_v6, %v3729_v46 }
 0x2b9   :  { %v3724_v42 = vsel %vm3510_vm4, %v3496_v50, %v3723_v5  ;;  %v3731_v34 = vsel %vm3510_vm4, %v3497_v20, %v3730_v11 }
 0x2ba   :  { %v3502_v47 = vunpack.c.l.b16 %v3119_v51  ;;  %v3503_v10 = vunpack.c.h.b16 %v3119_v51  ;;  %v3725_v22 = vsel %vm3512_vm5, %v3498_v15, %v3724_v42  ;;  %v3732_v45 = vsel %vm3512_vm5, %v3499_v53, %v3731_v34 }
 0x2bb   :  { %v3726_v3 = vsel %vm3514_vm6, %v3500_v14, %v3725_v22  ;;  %v3733_v62 = vsel %vm3514_vm6, %v3501_v44, %v3732_v45 }
 0x2bc   :  { %v3727_v39 = vsel %vm3516_vm7, %v3502_v47, %v3726_v3  ;;  %v3734_v41 = vsel %vm3516_vm7, %v3503_v10, %v3733_v62 }
 0x2bd   :  { %v3750_v4 = vpack.c.b16 %v3734_v41, %v3727_v39 }
 0x2bf   :  { %3782 = vst [vmem:[#allocation7 + $0x78] sm:$0xff] %v3750_v4 }
 0x2c0   :  { %3795 = dma.vmem_to_hbm [thread:$0]  %s3788_s1, 2048, %s3790_s23, [#allocation4], %s3887_s17, %s3887_s17, %s3888_s18  }
 0x2c1   :  { %3884 = dma.done.wait [#allocation4], 2048  }
 0x2c2   :  { %3885 = vsyncadd [#allocation4], 4294965248 }
 0x2c3   :  { %3800 = vsyncpa [#allocation3], 1 }
 0x2c4   :  { %3801 = vsyncpa [#allocation6], 1 }
 0x2c5   :  { %3802 = vsyncpa [#allocation4], 1 }

</bundles_post_ra>
